<compile_context>
chip_gen: v5e
topology: v5e:2x2
jax: 0.10.0
libtpu: 0.0.40
codegen_flags: <defaults>
</compile_context>

<pallas_src>
import math
from functools import partial

import jax
import jax.numpy as jnp
from jax.experimental import pallas as pl
from jax.experimental.pallas import tpu as pltpu

_LN_EPS = 1e-12  # BERT LayerNorm eps


# --------------------------- in-kernel helpers (f32) ---------------------------

def _layernorm(x, g, b):
    mu = jnp.mean(x, axis=-1, keepdims=True)
    var = jnp.mean(jnp.square(x - mu), axis=-1, keepdims=True)
    return (x - mu) * jax.lax.rsqrt(var + _LN_EPS) * g + b


def _bf16_matmul(x, w_bf16, bias):
    # bf16 MXU inputs, f32 accumulate, f32 bias add.
    y = jnp.dot(x.astype(jnp.bfloat16), w_bf16,
                preferred_element_type=jnp.float32)
    return y + bias


def _erf(x):
    # Abramowitz & Stegun 7.1.26 rational approximation; max abs error 1.5e-7
    # (below f32 resolution), uses only exp + VPU ops -> always lowers on Mosaic.
    p = 0.3275911
    a1, a2, a3, a4, a5 = (0.254829592, -0.284496736, 1.421413741,
                          -1.453152027, 1.061405429)
    ax = jnp.abs(x)
    t = 1.0 / (1.0 + p * ax)
    poly = ((((a5 * t + a4) * t + a3) * t + a2) * t + a1) * t
    y = 1.0 - poly * jnp.exp(-ax * ax)
    return jnp.where(x >= 0, y, -y)


def _gelu_exact(x):
    # PyTorch default GELU ("gelu" act in BERT): x * 0.5 * (1 + erf(x / sqrt(2)))
    return x * 0.5 * (1.0 + _erf(x * 0.7071067811865475))


def _mha(q, k, v, nH, Dh):
    # q: (Lq, H), k/v: (Lk, H) f32.  Unrolled per-head 2-D matmuls; scores keep
    # Lk on the lane axis.  Head merge happens in-register (concat on lanes).
    scale = 1.0 / math.sqrt(Dh)
    ctx = []
    for h in range(nH):
        sl = slice(h * Dh, (h + 1) * Dh)
        qh, kh, vh = q[:, sl], k[:, sl], v[:, sl]
        s = jax.lax.dot_general(qh, kh, (((1,), (1,)), ((), ())),
                                preferred_element_type=jnp.float32) * scale
        s = s - jnp.max(s, axis=-1, keepdims=True)
        p = jnp.exp(s)
        p = p * pl.reciprocal(jnp.sum(p, axis=-1, keepdims=True), approx=True)
        ctx.append(jnp.dot(p, vh, preferred_element_type=jnp.float32))
    return jnp.concatenate(ctx, axis=-1)          # (Lq, H)


# --------------------------------- kernels -------------------------------------

def _embed_kernel(x_ref, e_ref, w_ref, b_ref, qt_ref, g_ref, lb_ref,
                  enc_ref, hs_ref):
    # enc = in_fc(x + input_embs);   hs0 = LayerNorm(query_tokens)
    x = (x_ref[...] + e_ref[...]).astype(jnp.float32)           # (S, Fin)
    enc_ref[...] = _bf16_matmul(x, w_ref[...], b_ref[...]).astype(enc_ref.dtype)
    qt = qt_ref[...].astype(jnp.float32)                        # (Q, H)
    hs_ref[...] = _layernorm(qt, g_ref[...], lb_ref[...]).astype(hs_ref.dtype)


def _layer_kernel(hs_ref, enc_ref,
                  s_wqkv, s_bqkv, s_wo, s_bo, s_g, s_b,
                  c_wq, c_bq, c_wkv, c_bkv, c_wo, c_bo, c_g, c_b,
                  f_wi, f_bi, f_wo, f_bo, f_g, f_b,
                  out_ref, *, nH, Dh):
    # One full BERT layer (self-attn, cross-attn, query-FFN) fused per batch element.
    H = nH * Dh
    hs = hs_ref[...].astype(jnp.float32)          # (Q, H)
    enc = enc_ref[...].astype(jnp.float32)        # (S, encoder_width)

    # ---- self attention (fused QKV projection) ----
    qkv = _bf16_matmul(hs, s_wqkv[...], s_bqkv[...])            # (Q, 3H)
    ctx = _mha(qkv[:, :H], qkv[:, H:2 * H], qkv[:, 2 * H:], nH, Dh)
    attn = _bf16_matmul(ctx, s_wo[...], s_bo[...])
    hs = _layernorm(attn + hs, s_g[...], s_b[...])

    # ---- cross attention (fused KV projection of enc, VMEM resident) ----
    qc = _bf16_matmul(hs, c_wq[...], c_bq[...])                 # (Q, H)
    kv = _bf16_matmul(enc, c_wkv[...], c_bkv[...])              # (S, 2H)
    ctx = _mha(qc, kv[:, :H], kv[:, H:], nH, Dh)
    attn = _bf16_matmul(ctx, c_wo[...], c_bo[...])
    hs = _layernorm(attn + hs, c_g[...], c_b[...])

    # ---- query-branch FFN:  Linear -> exact GELU -> Linear -> Add&LN ----
    inter = _gelu_exact(_bf16_matmul(hs, f_wi[...], f_bi[...]))  # (Q, I)
    ffn = _bf16_matmul(inter, f_wo[...], f_bo[...])
    hs = _layernorm(ffn + hs, f_g[...], f_b[...])

    out_ref[...] = hs.astype(out_ref.dtype)


def _outfc_kernel(hs_ref, w_ref, b_ref, o_ref):
    h = hs_ref[...].astype(jnp.float32)
    o_ref[...] = _bf16_matmul(h, w_ref[...], b_ref[...]).astype(o_ref.dtype)


# ------------------------------- forward glue -----------------------------------

def _full2d(shape):
    # whole-array (weight / bias / LN param) block, replicated across the batch grid
    return pl.BlockSpec(shape, lambda b: (0, 0))


def qformer_forward(params, x, input_embs, cfg):
    B, S, Fin = x.shape
    H, nH, Dh = cfg["hidden"], cfg["heads"], cfg["head_dim"]
    Q, Fout, I = cfg["num_query"], cfg["out_features"], cfg["intermediate"]
    EW = Fout                     # config.encoder_width = out_features
    f32 = jnp.float32
    par = pltpu.CompilerParams(dimension_semantics=("parallel",))

    # ---- stage 1: enc = in_fc(x + input_embs);  hs = LN(query_tokens) (one call) ----
    enc, hs = pl.pallas_call(
        _embed_kernel,
        grid=(B,),
        out_shape=(jax.ShapeDtypeStruct((B, S, Fout), f32),
                   jax.ShapeDtypeStruct((B, Q, H), f32)),
        in_specs=[
            pl.BlockSpec((None, S, Fin), lambda b: (b, 0, 0)),   # x
            pl.BlockSpec((None, S, Fin), lambda b: (b, 0, 0)),   # input_embs
            _full2d((Fin, Fout)),                                # in_fc W^T (bf16)
            _full2d((1, Fout)),                                  # in_fc bias
            pl.BlockSpec((None, Q, H), lambda b: (0, 0, 0)),     # query_tokens
            _full2d((1, H)),                                     # emb LN gamma
            _full2d((1, H)),                                     # emb LN beta
        ],
        out_specs=(pl.BlockSpec((None, S, Fout), lambda b: (b, 0, 0)),
                   pl.BlockSpec((None, Q, H), lambda b: (b, 0, 0))),
        compiler_params=par,
    )(x, input_embs, params["in_fc_w_t"], params["in_fc_b"],
      params["query_tokens"], params["emb_ln_g"], params["emb_ln_b"])

    # ---- stage 2: one fused pallas_call per BERT layer ----
    layer_call = pl.pallas_call(
        partial(_layer_kernel, nH=nH, Dh=Dh),
        grid=(B,),
        out_shape=jax.ShapeDtypeStruct((B, Q, H), f32),
        in_specs=[
            pl.BlockSpec((None, Q, H), lambda b: (b, 0, 0)),     # hs
            pl.BlockSpec((None, S, EW), lambda b: (b, 0, 0)),    # enc
            _full2d((H, 3 * H)), _full2d((1, 3 * H)),            # self fused QKV
            _full2d((H, H)), _full2d((1, H)),                    # self out proj
            _full2d((1, H)), _full2d((1, H)),                    # self LN
            _full2d((H, H)), _full2d((1, H)),                    # cross Q proj
            _full2d((EW, 2 * H)), _full2d((1, 2 * H)),           # cross fused KV
            _full2d((H, H)), _full2d((1, H)),                    # cross out proj
            _full2d((1, H)), _full2d((1, H)),                    # cross LN
            _full2d((H, I)), _full2d((1, I)),                    # ffn intermediate
            _full2d((I, H)), _full2d((1, H)),                    # ffn output
            _full2d((1, H)), _full2d((1, H)),                    # ffn LN
        ],
        out_specs=pl.BlockSpec((None, Q, H), lambda b: (b, 0, 0)),
        compiler_params=par,
    )

    for lp in params["layers"]:
        s, c, f = lp["self"], lp["cross"], lp["ffn"]
        hs = layer_call(
            hs, enc,
            s["wqkv_t"], s["bqkv"], s["wo_t"], s["bo"], s["ln_g"], s["ln_b"],
            c["wq_t"], c["bq"], c["wkv_t"], c["bkv"], c["wo_t"], c["bo"],
            c["ln_g"], c["ln_b"],
            f["wi_t"], f["bi"], f["wo2_t"], f["bo2"], f["ln_g"], f["ln_b"],
        )

    # ---- stage 3: out_fc ----
    out = pl.pallas_call(
        _outfc_kernel,
        grid=(B,),
        out_shape=jax.ShapeDtypeStruct((B, Q, Fout), f32),
        in_specs=[
            pl.BlockSpec((None, Q, H), lambda b: (b, 0, 0)),
            _full2d((H, Fout)), _full2d((1, Fout)),
        ],
        out_specs=pl.BlockSpec((None, Q, Fout), lambda b: (b, 0, 0)),
        compiler_params=par,
    )(hs, params["out_fc_w_t"], params["out_fc_b"])

    return out


# ----------------------------- parameter creation -------------------------------

def init_params(key, cfg):
    Fin, Fout = cfg["in_features"], cfg["out_features"]
    H, I, Q = cfg["hidden"], cfg["intermediate"], cfg["num_query"]
    EW = Fout                                 # encoder_width
    std = 0.02                                # BERT initializer_range
    f32, bf16 = jnp.float32, jnp.bfloat16
    keys = iter(jax.random.split(key, 256))

    def w(shape):   # weight matrices: pre-transposed (in, out), bf16 for the MXU
        return (jax.random.normal(next(keys), shape, f32) * std).astype(bf16)

    def b(n):       # biases / small vectors stay f32, shaped (1, n) for broadcast
        return jax.random.normal(next(keys), (1, n), f32) * std

    ones = lambda n: jnp.ones((1, n), f32)
    zeros = lambda n: jnp.zeros((1, n), f32)

    params = {
        "in_fc_w_t": w((Fin, Fout)), "in_fc_b": b(Fout),
        "query_tokens": jax.random.normal(next(keys), (1, Q, H), f32) * std,
        "emb_ln_g": ones(H), "emb_ln_b": zeros(H),
        "out_fc_w_t": w((H, Fout)), "out_fc_b": b(Fout),
        "layers": [],
    }
    for _ in range(cfg["layers"]):
        params["layers"].append({
            "self": dict(wqkv_t=w((H, 3 * H)), bqkv=b(3 * H),
                         wo_t=w((H, H)), bo=b(H),
                         ln_g=ones(H), ln_b=zeros(H)),
            "cross": dict(wq_t=w((H, H)), bq=b(H),
                          wkv_t=w((EW, 2 * H)), bkv=b(2 * H),
                          wo_t=w((H, H)), bo=b(H),
                          ln_g=ones(H), ln_b=zeros(H)),
            "ffn": dict(wi_t=w((H, I)), bi=b(I),
                        wo2_t=w((I, H)), bo2=b(H),
                        ln_g=ones(H), ln_b=zeros(H)),
        })
    return params


# ------------------------------------ main ---------------------------------------

if __name__ == "__main__":
    # scaled-down, self-consistent config (out_features == hidden_size, as the
    # original module's out_fc requires for its shapes to work)
    cfg = dict(in_features=16, out_features=32, hidden=32, heads=4, head_dim=8,
               intermediate=64, num_query=8, layers=2)

    key = jax.random.PRNGKey(0)
    kp, kx, ke = jax.random.split(key, 3)
    params = init_params(kp, cfg)

    B, S = 2, 8
    x = jax.random.normal(kx, (B, S, cfg["in_features"]), jnp.float32)
    input_embs = jax.random.normal(ke, (B, S, cfg["in_features"]), jnp.float32)

    fwd = jax.jit(lambda p, a, e: qformer_forward(p, a, e, cfg))
    out = jax.block_until_ready(fwd(params, x, input_embs))

    assert out.shape == (B, cfg["num_query"], cfg["out_features"])
    assert bool(jnp.all(jnp.isfinite(out)))
    # TODO(synk): dropout layers are treated as identity (eval-mode semantics);
    # pretrained bert-base weights are replaced by synthetic deterministic init.
    # TODO(synk): at this toy width (H=32) stores are lane-sparse; at the real
    # bert-base config (H=768, I=3072) the same kernels become lane-dense and the
    # per-layer weight set (~18 MB bf16) still fits VMEM for whole-layer fusion.
    print("KERNEL_OK")
</pallas_src>

<mosaic_0001>
module attributes {stable_mosaic.version = 11 : i64} {
  func.func @_embed_kernel(%arg0: i32, %arg1: memref<1x8x16xf32, #tpu.memory_space<vmem>>, %arg2: memref<1x8x16xf32, #tpu.memory_space<vmem>>, %arg3: memref<16x32xbf16, #tpu.memory_space<vmem>>, %arg4: memref<1x32xf32, #tpu.memory_space<vmem>>, %arg5: memref<1x8x32xf32, #tpu.memory_space<vmem>>, %arg6: memref<1x32xf32, #tpu.memory_space<vmem>>, %arg7: memref<1x32xf32, #tpu.memory_space<vmem>>, %arg8: memref<1x8x32xf32, #tpu.memory_space<vmem>>, %arg9: memref<1x8x32xf32, #tpu.memory_space<vmem>>) attributes {dimension_semantics = [#tpu.dimension_semantics<parallel>], iteration_bounds = array<i64: 2>, scalar_prefetch = 0 : i64, scratch_operands = 0 : i64, tpu.core_type = #tpu.core_type<tc>, window_params = [{transform_indices = @transform_0, window_bounds = array<i64: 1, 8, 16>}, {transform_indices = @transform_1, window_bounds = array<i64: 1, 8, 16>}, {pipeline_mode = #tpu.pipeline_mode<synchronous>, transform_indices = @transform_2, window_bounds = array<i64: 16, 32>}, {pipeline_mode = #tpu.pipeline_mode<synchronous>, transform_indices = @transform_3, window_bounds = array<i64: 1, 32>}, {pipeline_mode = #tpu.pipeline_mode<synchronous>, transform_indices = @transform_4, window_bounds = array<i64: 1, 8, 32>}, {pipeline_mode = #tpu.pipeline_mode<synchronous>, transform_indices = @transform_5, window_bounds = array<i64: 1, 32>}, {pipeline_mode = #tpu.pipeline_mode<synchronous>, transform_indices = @transform_6, window_bounds = array<i64: 1, 32>}, {transform_indices = @transform_7, window_bounds = array<i64: 1, 8, 32>}, {transform_indices = @transform_8, window_bounds = array<i64: 1, 8, 32>}]} {
    %c0 = arith.constant 0 : index
    %c0_0 = arith.constant 0 : index
    %c0_1 = arith.constant 0 : index
    %0 = vector.load %arg1[%c0, %c0_0, %c0_1] : memref<1x8x16xf32, #tpu.memory_space<vmem>>, vector<1x8x16xf32>
    %1 = vector.shape_cast %0 : vector<1x8x16xf32> to vector<8x16xf32>
    %c0_2 = arith.constant 0 : index
    %c0_3 = arith.constant 0 : index
    %c0_4 = arith.constant 0 : index
    %2 = vector.load %arg2[%c0_2, %c0_3, %c0_4] : memref<1x8x16xf32, #tpu.memory_space<vmem>>, vector<1x8x16xf32>
    %3 = vector.shape_cast %2 : vector<1x8x16xf32> to vector<8x16xf32>
    %4 = arith.addf %1, %3 : vector<8x16xf32>
    %c0_5 = arith.constant 0 : index
    %c0_6 = arith.constant 0 : index
    %5 = vector.load %arg3[%c0_5, %c0_6] : memref<16x32xbf16, #tpu.memory_space<vmem>>, vector<16x32xbf16>
    %c0_7 = arith.constant 0 : index
    %c0_8 = arith.constant 0 : index
    %6 = vector.load %arg4[%c0_7, %c0_8] : memref<1x32xf32, #tpu.memory_space<vmem>>, vector<1x32xf32>
    %7 = arith.truncf %4 : vector<8x16xf32> to vector<8x16xbf16>
    %cst = arith.constant dense<0.000000e+00> : vector<8x32xf32>
    %8 = tpu.matmul %7, %5, %cst {dimension_numbers = #tpu.dot_dimension_numbers<[1], [0], [0], [1], [0, 0, 1, 1], [], []>} : vector<8x16xbf16>, vector<16x32xbf16>, vector<8x32xf32> -> vector<8x32xf32>
    %9 = vector.broadcast %6 : vector<1x32xf32> to vector<8x32xf32>
    %10 = arith.addf %8, %9 : vector<8x32xf32>
    %c0_9 = arith.constant 0 : index
    %c0_10 = arith.constant 0 : index
    %c0_11 = arith.constant 0 : index
    %11 = vector.load %arg8[%c0_9, %c0_10, %c0_11] : memref<1x8x32xf32, #tpu.memory_space<vmem>>, vector<1x8x32xf32>
    %12 = vector.shape_cast %11 : vector<1x8x32xf32> to vector<8x32xf32>
    %13 = vector.shape_cast %10 : vector<8x32xf32> to vector<1x8x32xf32>
    tpu.vector_store %arg8[%c0_9, %c0_10, %c0_11], %13 {strides = array<i32>} : memref<1x8x32xf32, #tpu.memory_space<vmem>>, vector<1x8x32xf32>,
    %c0_12 = arith.constant 0 : index
    %c0_13 = arith.constant 0 : index
    %c0_14 = arith.constant 0 : index
    %14 = vector.load %arg5[%c0_12, %c0_13, %c0_14] : memref<1x8x32xf32, #tpu.memory_space<vmem>>, vector<1x8x32xf32>
    %15 = vector.shape_cast %14 : vector<1x8x32xf32> to vector<8x32xf32>
    %c0_15 = arith.constant 0 : index
    %c0_16 = arith.constant 0 : index
    %16 = vector.load %arg6[%c0_15, %c0_16] : memref<1x32xf32, #tpu.memory_space<vmem>>, vector<1x32xf32>
    %c0_17 = arith.constant 0 : index
    %c0_18 = arith.constant 0 : index
    %17 = vector.load %arg7[%c0_17, %c0_18] : memref<1x32xf32, #tpu.memory_space<vmem>>, vector<1x32xf32>
    %cst_19 = arith.constant dense<0.000000e+00> : vector<8xf32>
    %18 = vector.multi_reduction <add>, %15, %cst_19 [1] : vector<8x32xf32> to vector<8xf32>
    %19 = vector.shape_cast %18 : vector<8xf32> to vector<8x1xf32>
    %cst_20 = arith.constant 3.200000e+01 : f32
    %20 = vector.broadcast %cst_20 : f32 to vector<8x1xf32>
    %21 = arith.divf %19, %20 : vector<8x1xf32>
    %22 = vector.broadcast %21 : vector<8x1xf32> to vector<8x32xf32>
    %23 = arith.subf %15, %22 : vector<8x32xf32>
    %24 = arith.mulf %23, %23 : vector<8x32xf32>
    %cst_21 = arith.constant dense<0.000000e+00> : vector<8xf32>
    %25 = vector.multi_reduction <add>, %24, %cst_21 [1] : vector<8x32xf32> to vector<8xf32>
    %26 = vector.shape_cast %25 : vector<8xf32> to vector<8x1xf32>
    %cst_22 = arith.constant 3.200000e+01 : f32
    %27 = vector.broadcast %cst_22 : f32 to vector<8x1xf32>
    %28 = arith.divf %26, %27 : vector<8x1xf32>
    %29 = vector.broadcast %21 : vector<8x1xf32> to vector<8x32xf32>
    %30 = arith.subf %15, %29 : vector<8x32xf32>
    %cst_23 = arith.constant 9.99999996E-13 : f32
    %31 = vector.broadcast %cst_23 : f32 to vector<8x1xf32>
    %32 = arith.addf %28, %31 : vector<8x1xf32>
    %33 = math.rsqrt %32 : vector<8x1xf32>
    %34 = vector.broadcast %33 : vector<8x1xf32> to vector<8x32xf32>
    %35 = arith.mulf %30, %34 : vector<8x32xf32>
    %36 = vector.broadcast %16 : vector<1x32xf32> to vector<8x32xf32>
    %37 = arith.mulf %35, %36 : vector<8x32xf32>
    %38 = vector.broadcast %17 : vector<1x32xf32> to vector<8x32xf32>
    %39 = arith.addf %37, %38 : vector<8x32xf32>
    %c0_24 = arith.constant 0 : index
    %c0_25 = arith.constant 0 : index
    %c0_26 = arith.constant 0 : index
    %40 = vector.load %arg9[%c0_24, %c0_25, %c0_26] : memref<1x8x32xf32, #tpu.memory_space<vmem>>, vector<1x8x32xf32>
    %41 = vector.shape_cast %40 : vector<1x8x32xf32> to vector<8x32xf32>
    %42 = vector.shape_cast %39 : vector<8x32xf32> to vector<1x8x32xf32>
    tpu.vector_store %arg9[%c0_24, %c0_25, %c0_26], %42 {strides = array<i32>} : memref<1x8x32xf32, #tpu.memory_space<vmem>>, vector<1x8x32xf32>,
    return
  }
  func.func @transform_0(%arg0: i32) -> (i32, i32, i32) {
    %c0_i32 = arith.constant 0 : i32
    %c0_i32_0 = arith.constant 0 : i32
    %c0_i32_1 = arith.constant 0 : i32
    return %arg0, %c0_i32, %c0_i32_0 : i32, i32, i32
  }
  func.func @transform_1(%arg0: i32) -> (i32, i32, i32) {
    %c0_i32 = arith.constant 0 : i32
    %c0_i32_0 = arith.constant 0 : i32
    %c0_i32_1 = arith.constant 0 : i32
    return %arg0, %c0_i32, %c0_i32_0 : i32, i32, i32
  }
  func.func @transform_2(%arg0: i32) -> (i32, i32) {
    %c0_i32 = arith.constant 0 : i32
    %c0_i32_0 = arith.constant 0 : i32
    %c0_i32_1 = arith.constant 0 : i32
    return %c0_i32, %c0_i32_0 : i32, i32
  }
  func.func @transform_3(%arg0: i32) -> (i32, i32) {
    %c0_i32 = arith.constant 0 : i32
    %c0_i32_0 = arith.constant 0 : i32
    %c0_i32_1 = arith.constant 0 : i32
    return %c0_i32, %c0_i32_0 : i32, i32
  }
  func.func @transform_4(%arg0: i32) -> (i32, i32, i32) {
    %c0_i32 = arith.constant 0 : i32
    %c0_i32_0 = arith.constant 0 : i32
    %c0_i32_1 = arith.constant 0 : i32
    %c0_i32_2 = arith.constant 0 : i32
    return %c0_i32, %c0_i32_0, %c0_i32_1 : i32, i32, i32
  }
  func.func @transform_5(%arg0: i32) -> (i32, i32) {
    %c0_i32 = arith.constant 0 : i32
    %c0_i32_0 = arith.constant 0 : i32
    %c0_i32_1 = arith.constant 0 : i32
    return %c0_i32, %c0_i32_0 : i32, i32
  }
  func.func @transform_6(%arg0: i32) -> (i32, i32) {
    %c0_i32 = arith.constant 0 : i32
    %c0_i32_0 = arith.constant 0 : i32
    %c0_i32_1 = arith.constant 0 : i32
    return %c0_i32, %c0_i32_0 : i32, i32
  }
  func.func @transform_7(%arg0: i32) -> (i32, i32, i32) {
    %c0_i32 = arith.constant 0 : i32
    %c0_i32_0 = arith.constant 0 : i32
    %c0_i32_1 = arith.constant 0 : i32
    return %arg0, %c0_i32, %c0_i32_0 : i32, i32, i32
  }
  func.func @transform_8(%arg0: i32) -> (i32, i32, i32) {
    %c0_i32 = arith.constant 0 : i32
    %c0_i32_0 = arith.constant 0 : i32
    %c0_i32_1 = arith.constant 0 : i32
    return %arg0, %c0_i32, %c0_i32_0 : i32, i32, i32
  }
}

module attributes {stable_mosaic.version = 11 : i64} {
  func.func @_layer_kernel(%arg0: i32, %arg1: memref<1x8x32xf32, #tpu.memory_space<vmem>>, %arg2: memref<1x8x32xf32, #tpu.memory_space<vmem>>, %arg3: memref<32x96xbf16, #tpu.memory_space<vmem>>, %arg4: memref<1x96xf32, #tpu.memory_space<vmem>>, %arg5: memref<32x32xbf16, #tpu.memory_space<vmem>>, %arg6: memref<1x32xf32, #tpu.memory_space<vmem>>, %arg7: memref<1x32xf32, #tpu.memory_space<vmem>>, %arg8: memref<1x32xf32, #tpu.memory_space<vmem>>, %arg9: memref<32x32xbf16, #tpu.memory_space<vmem>>, %arg10: memref<1x32xf32, #tpu.memory_space<vmem>>, %arg11: memref<32x64xbf16, #tpu.memory_space<vmem>>, %arg12: memref<1x64xf32, #tpu.memory_space<vmem>>, %arg13: memref<32x32xbf16, #tpu.memory_space<vmem>>, %arg14: memref<1x32xf32, #tpu.memory_space<vmem>>, %arg15: memref<1x32xf32, #tpu.memory_space<vmem>>, %arg16: memref<1x32xf32, #tpu.memory_space<vmem>>, %arg17: memref<32x64xbf16, #tpu.memory_space<vmem>>, %arg18: memref<1x64xf32, #tpu.memory_space<vmem>>, %arg19: memref<64x32xbf16, #tpu.memory_space<vmem>>, %arg20: memref<1x32xf32, #tpu.memory_space<vmem>>, %arg21: memref<1x32xf32, #tpu.memory_space<vmem>>, %arg22: memref<1x32xf32, #tpu.memory_space<vmem>>, %arg23: memref<1x8x32xf32, #tpu.memory_space<vmem>>) attributes {dimension_semantics = [#tpu.dimension_semantics<parallel>], iteration_bounds = array<i64: 2>, scalar_prefetch = 0 : i64, scratch_operands = 0 : i64, tpu.core_type = #tpu.core_type<tc>, window_params = [{transform_indices = @transform_0, window_bounds = array<i64: 1, 8, 32>}, {transform_indices = @transform_1, window_bounds = array<i64: 1, 8, 32>}, {pipeline_mode = #tpu.pipeline_mode<synchronous>, transform_indices = @transform_2, window_bounds = array<i64: 32, 96>}, {pipeline_mode = #tpu.pipeline_mode<synchronous>, transform_indices = @transform_3, window_bounds = array<i64: 1, 96>}, {pipeline_mode = #tpu.pipeline_mode<synchronous>, transform_indices = @transform_4, window_bounds = array<i64: 32, 32>}, {pipeline_mode = #tpu.pipeline_mode<synchronous>, transform_indices = @transform_5, window_bounds = array<i64: 1, 32>}, {pipeline_mode = #tpu.pipeline_mode<synchronous>, transform_indices = @transform_6, window_bounds = array<i64: 1, 32>}, {pipeline_mode = #tpu.pipeline_mode<synchronous>, transform_indices = @transform_7, window_bounds = array<i64: 1, 32>}, {pipeline_mode = #tpu.pipeline_mode<synchronous>, transform_indices = @transform_8, window_bounds = array<i64: 32, 32>}, {pipeline_mode = #tpu.pipeline_mode<synchronous>, transform_indices = @transform_9, window_bounds = array<i64: 1, 32>}, {pipeline_mode = #tpu.pipeline_mode<synchronous>, transform_indices = @transform_10, window_bounds = array<i64: 32, 64>}, {pipeline_mode = #tpu.pipeline_mode<synchronous>, transform_indices = @transform_11, window_bounds = array<i64: 1, 64>}, {pipeline_mode = #tpu.pipeline_mode<synchronous>, transform_indices = @transform_12, window_bounds = array<i64: 32, 32>}, {pipeline_mode = #tpu.pipeline_mode<synchronous>, transform_indices = @transform_13, window_bounds = array<i64: 1, 32>}, {pipeline_mode = #tpu.pipeline_mode<synchronous>, transform_indices = @transform_14, window_bounds = array<i64: 1, 32>}, {pipeline_mode = #tpu.pipeline_mode<synchronous>, transform_indices = @transform_15, window_bounds = array<i64: 1, 32>}, {pipeline_mode = #tpu.pipeline_mode<synchronous>, transform_indices = @transform_16, window_bounds = array<i64: 32, 64>}, {pipeline_mode = #tpu.pipeline_mode<synchronous>, transform_indices = @transform_17, window_bounds = array<i64: 1, 64>}, {pipeline_mode = #tpu.pipeline_mode<synchronous>, transform_indices = @transform_18, window_bounds = array<i64: 64, 32>}, {pipeline_mode = #tpu.pipeline_mode<synchronous>, transform_indices = @transform_19, window_bounds = array<i64: 1, 32>}, {pipeline_mode = #tpu.pipeline_mode<synchronous>, transform_indices = @transform_20, window_bounds = array<i64: 1, 32>}, {pipeline_mode = #tpu.pipeline_mode<synchronous>, transform_indices = @transform_21, window_bounds = array<i64: 1, 32>}, {transform_indices = @transform_22, window_bounds = array<i64: 1, 8, 32>}]} {
    %c0 = arith.constant 0 : index
    %c0_0 = arith.constant 0 : index
    %c0_1 = arith.constant 0 : index
    %0 = vector.load %arg1[%c0, %c0_0, %c0_1] : memref<1x8x32xf32, #tpu.memory_space<vmem>>, vector<1x8x32xf32>
    %1 = vector.shape_cast %0 : vector<1x8x32xf32> to vector<8x32xf32>
    %c0_2 = arith.constant 0 : index
    %c0_3 = arith.constant 0 : index
    %c0_4 = arith.constant 0 : index
    %2 = vector.load %arg2[%c0_2, %c0_3, %c0_4] : memref<1x8x32xf32, #tpu.memory_space<vmem>>, vector<1x8x32xf32>
    %3 = vector.shape_cast %2 : vector<1x8x32xf32> to vector<8x32xf32>
    %c0_5 = arith.constant 0 : index
    %c0_6 = arith.constant 0 : index
    %4 = vector.load %arg3[%c0_5, %c0_6] : memref<32x96xbf16, #tpu.memory_space<vmem>>, vector<32x96xbf16>
    %c0_7 = arith.constant 0 : index
    %c0_8 = arith.constant 0 : index
    %5 = vector.load %arg4[%c0_7, %c0_8] : memref<1x96xf32, #tpu.memory_space<vmem>>, vector<1x96xf32>
    %6 = arith.truncf %1 : vector<8x32xf32> to vector<8x32xbf16>
    %cst = arith.constant dense<0.000000e+00> : vector<8x96xf32>
    %7 = tpu.matmul %6, %4, %cst {dimension_numbers = #tpu.dot_dimension_numbers<[1], [0], [0], [1], [0, 0, 1, 1], [], []>} : vector<8x32xbf16>, vector<32x96xbf16>, vector<8x96xf32> -> vector<8x96xf32>
    %8 = vector.broadcast %5 : vector<1x96xf32> to vector<8x96xf32>
    %9 = arith.addf %7, %8 : vector<8x96xf32>
    %10 = vector.extract_strided_slice %9 {offsets = [0, 0], sizes = [8, 32], strides = [1, 1]} : vector<8x96xf32> to vector<8x32xf32>
    %11 = vector.extract_strided_slice %9 {offsets = [0, 32], sizes = [8, 32], strides = [1, 1]} : vector<8x96xf32> to vector<8x32xf32>
    %12 = vector.extract_strided_slice %9 {offsets = [0, 64], sizes = [8, 32], strides = [1, 1]} : vector<8x96xf32> to vector<8x32xf32>
    %13 = vector.extract_strided_slice %10 {offsets = [0, 0], sizes = [8, 8], strides = [1, 1]} : vector<8x32xf32> to vector<8x8xf32>
    %14 = vector.extract_strided_slice %11 {offsets = [0, 0], sizes = [8, 8], strides = [1, 1]} : vector<8x32xf32> to vector<8x8xf32>
    %15 = vector.extract_strided_slice %12 {offsets = [0, 0], sizes = [8, 8], strides = [1, 1]} : vector<8x32xf32> to vector<8x8xf32>
    %cst_9 = arith.constant dense<0.000000e+00> : vector<8x8xf32>
    %16 = tpu.matmul %13, %14, %cst_9 {dimension_numbers = #tpu.dot_dimension_numbers<[1], [1], [0], [0], [0, 0, 1, 0], [], []>} : vector<8x8xf32>, vector<8x8xf32>, vector<8x8xf32> -> vector<8x8xf32>
    %cst_10 = arith.constant 0.353553385 : f32
    %17 = vector.broadcast %cst_10 : f32 to vector<8x8xf32>
    %18 = arith.mulf %16, %17 : vector<8x8xf32>
    %cst_11 = arith.constant dense<0xFF800000> : vector<8xf32>
    %19 = vector.multi_reduction <maximumf>, %18, %cst_11 [1] : vector<8x8xf32> to vector<8xf32>
    %20 = vector.shape_cast %19 : vector<8xf32> to vector<8x1xf32>
    %21 = vector.broadcast %20 : vector<8x1xf32> to vector<8x8xf32>
    %22 = arith.subf %18, %21 : vector<8x8xf32>
    %23 = math.exp %22 : vector<8x8xf32>
    %cst_12 = arith.constant dense<0.000000e+00> : vector<8xf32>
    %24 = vector.multi_reduction <add>, %23, %cst_12 [1] : vector<8x8xf32> to vector<8xf32>
    %25 = vector.shape_cast %24 : vector<8xf32> to vector<8x1xf32>
    %26 = tpu.reciprocal %25 {approx = true} : vector<8x1xf32> -> vector<8x1xf32>
    %27 = vector.broadcast %26 : vector<8x1xf32> to vector<8x8xf32>
    %28 = arith.mulf %23, %27 : vector<8x8xf32>
    %cst_13 = arith.constant dense<0.000000e+00> : vector<8x8xf32>
    %29 = tpu.matmul %28, %15, %cst_13 {dimension_numbers = #tpu.dot_dimension_numbers<[1], [0], [0], [1], [0, 0, 1, 1], [], []>} : vector<8x8xf32>, vector<8x8xf32>, vector<8x8xf32> -> vector<8x8xf32>
    %30 = vector.extract_strided_slice %10 {offsets = [0, 8], sizes = [8, 8], strides = [1, 1]} : vector<8x32xf32> to vector<8x8xf32>
    %31 = vector.extract_strided_slice %11 {offsets = [0, 8], sizes = [8, 8], strides = [1, 1]} : vector<8x32xf32> to vector<8x8xf32>
    %32 = vector.extract_strided_slice %12 {offsets = [0, 8], sizes = [8, 8], strides = [1, 1]} : vector<8x32xf32> to vector<8x8xf32>
    %cst_14 = arith.constant dense<0.000000e+00> : vector<8x8xf32>
    %33 = tpu.matmul %30, %31, %cst_14 {dimension_numbers = #tpu.dot_dimension_numbers<[1], [1], [0], [0], [0, 0, 1, 0], [], []>} : vector<8x8xf32>, vector<8x8xf32>, vector<8x8xf32> -> vector<8x8xf32>
    %cst_15 = arith.constant 0.353553385 : f32
    %34 = vector.broadcast %cst_15 : f32 to vector<8x8xf32>
    %35 = arith.mulf %33, %34 : vector<8x8xf32>
    %cst_16 = arith.constant dense<0xFF800000> : vector<8xf32>
    %36 = vector.multi_reduction <maximumf>, %35, %cst_16 [1] : vector<8x8xf32> to vector<8xf32>
    %37 = vector.shape_cast %36 : vector<8xf32> to vector<8x1xf32>
    %38 = vector.broadcast %37 : vector<8x1xf32> to vector<8x8xf32>
    %39 = arith.subf %35, %38 : vector<8x8xf32>
    %40 = math.exp %39 : vector<8x8xf32>
    %cst_17 = arith.constant dense<0.000000e+00> : vector<8xf32>
    %41 = vector.multi_reduction <add>, %40, %cst_17 [1] : vector<8x8xf32> to vector<8xf32>
    %42 = vector.shape_cast %41 : vector<8xf32> to vector<8x1xf32>
    %43 = tpu.reciprocal %42 {approx = true} : vector<8x1xf32> -> vector<8x1xf32>
    %44 = vector.broadcast %43 : vector<8x1xf32> to vector<8x8xf32>
    %45 = arith.mulf %40, %44 : vector<8x8xf32>
    %cst_18 = arith.constant dense<0.000000e+00> : vector<8x8xf32>
    %46 = tpu.matmul %45, %32, %cst_18 {dimension_numbers = #tpu.dot_dimension_numbers<[1], [0], [0], [1], [0, 0, 1, 1], [], []>} : vector<8x8xf32>, vector<8x8xf32>, vector<8x8xf32> -> vector<8x8xf32>
    %47 = vector.extract_strided_slice %10 {offsets = [0, 16], sizes = [8, 8], strides = [1, 1]} : vector<8x32xf32> to vector<8x8xf32>
    %48 = vector.extract_strided_slice %11 {offsets = [0, 16], sizes = [8, 8], strides = [1, 1]} : vector<8x32xf32> to vector<8x8xf32>
    %49 = vector.extract_strided_slice %12 {offsets = [0, 16], sizes = [8, 8], strides = [1, 1]} : vector<8x32xf32> to vector<8x8xf32>
    %cst_19 = arith.constant dense<0.000000e+00> : vector<8x8xf32>
    %50 = tpu.matmul %47, %48, %cst_19 {dimension_numbers = #tpu.dot_dimension_numbers<[1], [1], [0], [0], [0, 0, 1, 0], [], []>} : vector<8x8xf32>, vector<8x8xf32>, vector<8x8xf32> -> vector<8x8xf32>
    %cst_20 = arith.constant 0.353553385 : f32
    %51 = vector.broadcast %cst_20 : f32 to vector<8x8xf32>
    %52 = arith.mulf %50, %51 : vector<8x8xf32>
    %cst_21 = arith.constant dense<0xFF800000> : vector<8xf32>
    %53 = vector.multi_reduction <maximumf>, %52, %cst_21 [1] : vector<8x8xf32> to vector<8xf32>
    %54 = vector.shape_cast %53 : vector<8xf32> to vector<8x1xf32>
    %55 = vector.broadcast %54 : vector<8x1xf32> to vector<8x8xf32>
    %56 = arith.subf %52, %55 : vector<8x8xf32>
    %57 = math.exp %56 : vector<8x8xf32>
    %cst_22 = arith.constant dense<0.000000e+00> : vector<8xf32>
    %58 = vector.multi_reduction <add>, %57, %cst_22 [1] : vector<8x8xf32> to vector<8xf32>
    %59 = vector.shape_cast %58 : vector<8xf32> to vector<8x1xf32>
    %60 = tpu.reciprocal %59 {approx = true} : vector<8x1xf32> -> vector<8x1xf32>
    %61 = vector.broadcast %60 : vector<8x1xf32> to vector<8x8xf32>
    %62 = arith.mulf %57, %61 : vector<8x8xf32>
    %cst_23 = arith.constant dense<0.000000e+00> : vector<8x8xf32>
    %63 = tpu.matmul %62, %49, %cst_23 {dimension_numbers = #tpu.dot_dimension_numbers<[1], [0], [0], [1], [0, 0, 1, 1], [], []>} : vector<8x8xf32>, vector<8x8xf32>, vector<8x8xf32> -> vector<8x8xf32>
    %64 = vector.extract_strided_slice %10 {offsets = [0, 24], sizes = [8, 8], strides = [1, 1]} : vector<8x32xf32> to vector<8x8xf32>
    %65 = vector.extract_strided_slice %11 {offsets = [0, 24], sizes = [8, 8], strides = [1, 1]} : vector<8x32xf32> to vector<8x8xf32>
    %66 = vector.extract_strided_slice %12 {offsets = [0, 24], sizes = [8, 8], strides = [1, 1]} : vector<8x32xf32> to vector<8x8xf32>
    %cst_24 = arith.constant dense<0.000000e+00> : vector<8x8xf32>
    %67 = tpu.matmul %64, %65, %cst_24 {dimension_numbers = #tpu.dot_dimension_numbers<[1], [1], [0], [0], [0, 0, 1, 0], [], []>} : vector<8x8xf32>, vector<8x8xf32>, vector<8x8xf32> -> vector<8x8xf32>
    %cst_25 = arith.constant 0.353553385 : f32
    %68 = vector.broadcast %cst_25 : f32 to vector<8x8xf32>
    %69 = arith.mulf %67, %68 : vector<8x8xf32>
    %cst_26 = arith.constant dense<0xFF800000> : vector<8xf32>
    %70 = vector.multi_reduction <maximumf>, %69, %cst_26 [1] : vector<8x8xf32> to vector<8xf32>
    %71 = vector.shape_cast %70 : vector<8xf32> to vector<8x1xf32>
    %72 = vector.broadcast %71 : vector<8x1xf32> to vector<8x8xf32>
    %73 = arith.subf %69, %72 : vector<8x8xf32>
    %74 = math.exp %73 : vector<8x8xf32>
    %cst_27 = arith.constant dense<0.000000e+00> : vector<8xf32>
    %75 = vector.multi_reduction <add>, %74, %cst_27 [1] : vector<8x8xf32> to vector<8xf32>
    %76 = vector.shape_cast %75 : vector<8xf32> to vector<8x1xf32>
    %77 = tpu.reciprocal %76 {approx = true} : vector<8x1xf32> -> vector<8x1xf32>
    %78 = vector.broadcast %77 : vector<8x1xf32> to vector<8x8xf32>
    %79 = arith.mulf %74, %78 : vector<8x8xf32>
    %cst_28 = arith.constant dense<0.000000e+00> : vector<8x8xf32>
    %80 = tpu.matmul %79, %66, %cst_28 {dimension_numbers = #tpu.dot_dimension_numbers<[1], [0], [0], [1], [0, 0, 1, 1], [], []>} : vector<8x8xf32>, vector<8x8xf32>, vector<8x8xf32> -> vector<8x8xf32>
    %81 = tpu.concatenate %29, %46, %63, %80 in 1 : vector<8x8xf32>, vector<8x8xf32>, vector<8x8xf32>, vector<8x8xf32> -> vector<8x32xf32>
    %c0_29 = arith.constant 0 : index
    %c0_30 = arith.constant 0 : index
    %82 = vector.load %arg5[%c0_29, %c0_30] : memref<32x32xbf16, #tpu.memory_space<vmem>>, vector<32x32xbf16>
    %c0_31 = arith.constant 0 : index
    %c0_32 = arith.constant 0 : index
    %83 = vector.load %arg6[%c0_31, %c0_32] : memref<1x32xf32, #tpu.memory_space<vmem>>, vector<1x32xf32>
    %84 = arith.truncf %81 : vector<8x32xf32> to vector<8x32xbf16>
    %cst_33 = arith.constant dense<0.000000e+00> : vector<8x32xf32>
    %85 = tpu.matmul %84, %82, %cst_33 {dimension_numbers = #tpu.dot_dimension_numbers<[1], [0], [0], [1], [0, 0, 1, 1], [], []>} : vector<8x32xbf16>, vector<32x32xbf16>, vector<8x32xf32> -> vector<8x32xf32>
    %86 = vector.broadcast %83 : vector<1x32xf32> to vector<8x32xf32>
    %87 = arith.addf %85, %86 : vector<8x32xf32>
    %88 = arith.addf %87, %1 : vector<8x32xf32>
    %c0_34 = arith.constant 0 : index
    %c0_35 = arith.constant 0 : index
    %89 = vector.load %arg7[%c0_34, %c0_35] : memref<1x32xf32, #tpu.memory_space<vmem>>, vector<1x32xf32>
    %c0_36 = arith.constant 0 : index
    %c0_37 = arith.constant 0 : index
    %90 = vector.load %arg8[%c0_36, %c0_37] : memref<1x32xf32, #tpu.memory_space<vmem>>, vector<1x32xf32>
    %cst_38 = arith.constant dense<0.000000e+00> : vector<8xf32>
    %91 = vector.multi_reduction <add>, %88, %cst_38 [1] : vector<8x32xf32> to vector<8xf32>
    %92 = vector.shape_cast %91 : vector<8xf32> to vector<8x1xf32>
    %cst_39 = arith.constant 3.200000e+01 : f32
    %93 = vector.broadcast %cst_39 : f32 to vector<8x1xf32>
    %94 = arith.divf %92, %93 : vector<8x1xf32>
    %95 = vector.broadcast %94 : vector<8x1xf32> to vector<8x32xf32>
    %96 = arith.subf %88, %95 : vector<8x32xf32>
    %97 = arith.mulf %96, %96 : vector<8x32xf32>
    %cst_40 = arith.constant dense<0.000000e+00> : vector<8xf32>
    %98 = vector.multi_reduction <add>, %97, %cst_40 [1] : vector<8x32xf32> to vector<8xf32>
    %99 = vector.shape_cast %98 : vector<8xf32> to vector<8x1xf32>
    %cst_41 = arith.constant 3.200000e+01 : f32
    %100 = vector.broadcast %cst_41 : f32 to vector<8x1xf32>
    %101 = arith.divf %99, %100 : vector<8x1xf32>
    %102 = vector.broadcast %94 : vector<8x1xf32> to vector<8x32xf32>
    %103 = arith.subf %88, %102 : vector<8x32xf32>
    %cst_42 = arith.constant 9.99999996E-13 : f32
    %104 = vector.broadcast %cst_42 : f32 to vector<8x1xf32>
    %105 = arith.addf %101, %104 : vector<8x1xf32>
    %106 = math.rsqrt %105 : vector<8x1xf32>
    %107 = vector.broadcast %106 : vector<8x1xf32> to vector<8x32xf32>
    %108 = arith.mulf %103, %107 : vector<8x32xf32>
    %109 = vector.broadcast %89 : vector<1x32xf32> to vector<8x32xf32>
    %110 = arith.mulf %108, %109 : vector<8x32xf32>
    %111 = vector.broadcast %90 : vector<1x32xf32> to vector<8x32xf32>
    %112 = arith.addf %110, %111 : vector<8x32xf32>
    %c0_43 = arith.constant 0 : index
    %c0_44 = arith.constant 0 : index
    %113 = vector.load %arg9[%c0_43, %c0_44] : memref<32x32xbf16, #tpu.memory_space<vmem>>, vector<32x32xbf16>
    %c0_45 = arith.constant 0 : index
    %c0_46 = arith.constant 0 : index
    %114 = vector.load %arg10[%c0_45, %c0_46] : memref<1x32xf32, #tpu.memory_space<vmem>>, vector<1x32xf32>
    %115 = arith.truncf %112 : vector<8x32xf32> to vector<8x32xbf16>
    %cst_47 = arith.constant dense<0.000000e+00> : vector<8x32xf32>
    %116 = tpu.matmul %115, %113, %cst_47 {dimension_numbers = #tpu.dot_dimension_numbers<[1], [0], [0], [1], [0, 0, 1, 1], [], []>} : vector<8x32xbf16>, vector<32x32xbf16>, vector<8x32xf32> -> vector<8x32xf32>
    %117 = vector.broadcast %114 : vector<1x32xf32> to vector<8x32xf32>
    %118 = arith.addf %116, %117 : vector<8x32xf32>
    %c0_48 = arith.constant 0 : index
    %c0_49 = arith.constant 0 : index
    %119 = vector.load %arg11[%c0_48, %c0_49] : memref<32x64xbf16, #tpu.memory_space<vmem>>, vector<32x64xbf16>
    %c0_50 = arith.constant 0 : index
    %c0_51 = arith.constant 0 : index
    %120 = vector.load %arg12[%c0_50, %c0_51] : memref<1x64xf32, #tpu.memory_space<vmem>>, vector<1x64xf32>
    %121 = arith.truncf %3 : vector<8x32xf32> to vector<8x32xbf16>
    %cst_52 = arith.constant dense<0.000000e+00> : vector<8x64xf32>
    %122 = tpu.matmul %121, %119, %cst_52 {dimension_numbers = #tpu.dot_dimension_numbers<[1], [0], [0], [1], [0, 0, 1, 1], [], []>} : vector<8x32xbf16>, vector<32x64xbf16>, vector<8x64xf32> -> vector<8x64xf32>
    %123 = vector.broadcast %120 : vector<1x64xf32> to vector<8x64xf32>
    %124 = arith.addf %122, %123 : vector<8x64xf32>
    %125 = vector.extract_strided_slice %124 {offsets = [0, 0], sizes = [8, 32], strides = [1, 1]} : vector<8x64xf32> to vector<8x32xf32>
    %126 = vector.extract_strided_slice %124 {offsets = [0, 32], sizes = [8, 32], strides = [1, 1]} : vector<8x64xf32> to vector<8x32xf32>
    %127 = vector.extract_strided_slice %118 {offsets = [0, 0], sizes = [8, 8], strides = [1, 1]} : vector<8x32xf32> to vector<8x8xf32>
    %128 = vector.extract_strided_slice %125 {offsets = [0, 0], sizes = [8, 8], strides = [1, 1]} : vector<8x32xf32> to vector<8x8xf32>
    %129 = vector.extract_strided_slice %126 {offsets = [0, 0], sizes = [8, 8], strides = [1, 1]} : vector<8x32xf32> to vector<8x8xf32>
    %cst_53 = arith.constant dense<0.000000e+00> : vector<8x8xf32>
    %130 = tpu.matmul %127, %128, %cst_53 {dimension_numbers = #tpu.dot_dimension_numbers<[1], [1], [0], [0], [0, 0, 1, 0], [], []>} : vector<8x8xf32>, vector<8x8xf32>, vector<8x8xf32> -> vector<8x8xf32>
    %cst_54 = arith.constant 0.353553385 : f32
    %131 = vector.broadcast %cst_54 : f32 to vector<8x8xf32>
    %132 = arith.mulf %130, %131 : vector<8x8xf32>
    %cst_55 = arith.constant dense<0xFF800000> : vector<8xf32>
    %133 = vector.multi_reduction <maximumf>, %132, %cst_55 [1] : vector<8x8xf32> to vector<8xf32>
    %134 = vector.shape_cast %133 : vector<8xf32> to vector<8x1xf32>
    %135 = vector.broadcast %134 : vector<8x1xf32> to vector<8x8xf32>
    %136 = arith.subf %132, %135 : vector<8x8xf32>
    %137 = math.exp %136 : vector<8x8xf32>
    %cst_56 = arith.constant dense<0.000000e+00> : vector<8xf32>
    %138 = vector.multi_reduction <add>, %137, %cst_56 [1] : vector<8x8xf32> to vector<8xf32>
    %139 = vector.shape_cast %138 : vector<8xf32> to vector<8x1xf32>
    %140 = tpu.reciprocal %139 {approx = true} : vector<8x1xf32> -> vector<8x1xf32>
    %141 = vector.broadcast %140 : vector<8x1xf32> to vector<8x8xf32>
    %142 = arith.mulf %137, %141 : vector<8x8xf32>
    %cst_57 = arith.constant dense<0.000000e+00> : vector<8x8xf32>
    %143 = tpu.matmul %142, %129, %cst_57 {dimension_numbers = #tpu.dot_dimension_numbers<[1], [0], [0], [1], [0, 0, 1, 1], [], []>} : vector<8x8xf32>, vector<8x8xf32>, vector<8x8xf32> -> vector<8x8xf32>
    %144 = vector.extract_strided_slice %118 {offsets = [0, 8], sizes = [8, 8], strides = [1, 1]} : vector<8x32xf32> to vector<8x8xf32>
    %145 = vector.extract_strided_slice %125 {offsets = [0, 8], sizes = [8, 8], strides = [1, 1]} : vector<8x32xf32> to vector<8x8xf32>
    %146 = vector.extract_strided_slice %126 {offsets = [0, 8], sizes = [8, 8], strides = [1, 1]} : vector<8x32xf32> to vector<8x8xf32>
    %cst_58 = arith.constant dense<0.000000e+00> : vector<8x8xf32>
    %147 = tpu.matmul %144, %145, %cst_58 {dimension_numbers = #tpu.dot_dimension_numbers<[1], [1], [0], [0], [0, 0, 1, 0], [], []>} : vector<8x8xf32>, vector<8x8xf32>, vector<8x8xf32> -> vector<8x8xf32>
    %cst_59 = arith.constant 0.353553385 : f32
    %148 = vector.broadcast %cst_59 : f32 to vector<8x8xf32>
    %149 = arith.mulf %147, %148 : vector<8x8xf32>
    %cst_60 = arith.constant dense<0xFF800000> : vector<8xf32>
    %150 = vector.multi_reduction <maximumf>, %149, %cst_60 [1] : vector<8x8xf32> to vector<8xf32>
    %151 = vector.shape_cast %150 : vector<8xf32> to vector<8x1xf32>
    %152 = vector.broadcast %151 : vector<8x1xf32> to vector<8x8xf32>
    %153 = arith.subf %149, %152 : vector<8x8xf32>
    %154 = math.exp %153 : vector<8x8xf32>
    %cst_61 = arith.constant dense<0.000000e+00> : vector<8xf32>
    %155 = vector.multi_reduction <add>, %154, %cst_61 [1] : vector<8x8xf32> to vector<8xf32>
    %156 = vector.shape_cast %155 : vector<8xf32> to vector<8x1xf32>
    %157 = tpu.reciprocal %156 {approx = true} : vector<8x1xf32> -> vector<8x1xf32>
    %158 = vector.broadcast %157 : vector<8x1xf32> to vector<8x8xf32>
    %159 = arith.mulf %154, %158 : vector<8x8xf32>
    %cst_62 = arith.constant dense<0.000000e+00> : vector<8x8xf32>
    %160 = tpu.matmul %159, %146, %cst_62 {dimension_numbers = #tpu.dot_dimension_numbers<[1], [0], [0], [1], [0, 0, 1, 1], [], []>} : vector<8x8xf32>, vector<8x8xf32>, vector<8x8xf32> -> vector<8x8xf32>
    %161 = vector.extract_strided_slice %118 {offsets = [0, 16], sizes = [8, 8], strides = [1, 1]} : vector<8x32xf32> to vector<8x8xf32>
    %162 = vector.extract_strided_slice %125 {offsets = [0, 16], sizes = [8, 8], strides = [1, 1]} : vector<8x32xf32> to vector<8x8xf32>
    %163 = vector.extract_strided_slice %126 {offsets = [0, 16], sizes = [8, 8], strides = [1, 1]} : vector<8x32xf32> to vector<8x8xf32>
    %cst_63 = arith.constant dense<0.000000e+00> : vector<8x8xf32>
    %164 = tpu.matmul %161, %162, %cst_63 {dimension_numbers = #tpu.dot_dimension_numbers<[1], [1], [0], [0], [0, 0, 1, 0], [], []>} : vector<8x8xf32>, vector<8x8xf32>, vector<8x8xf32> -> vector<8x8xf32>
    %cst_64 = arith.constant 0.353553385 : f32
    %165 = vector.broadcast %cst_64 : f32 to vector<8x8xf32>
    %166 = arith.mulf %164, %165 : vector<8x8xf32>
    %cst_65 = arith.constant dense<0xFF800000> : vector<8xf32>
    %167 = vector.multi_reduction <maximumf>, %166, %cst_65 [1] : vector<8x8xf32> to vector<8xf32>
    %168 = vector.shape_cast %167 : vector<8xf32> to vector<8x1xf32>
    %169 = vector.broadcast %168 : vector<8x1xf32> to vector<8x8xf32>
    %170 = arith.subf %166, %169 : vector<8x8xf32>
    %171 = math.exp %170 : vector<8x8xf32>
    %cst_66 = arith.constant dense<0.000000e+00> : vector<8xf32>
    %172 = vector.multi_reduction <add>, %171, %cst_66 [1] : vector<8x8xf32> to vector<8xf32>
    %173 = vector.shape_cast %172 : vector<8xf32> to vector<8x1xf32>
    %174 = tpu.reciprocal %173 {approx = true} : vector<8x1xf32> -> vector<8x1xf32>
    %175 = vector.broadcast %174 : vector<8x1xf32> to vector<8x8xf32>
    %176 = arith.mulf %171, %175 : vector<8x8xf32>
    %cst_67 = arith.constant dense<0.000000e+00> : vector<8x8xf32>
    %177 = tpu.matmul %176, %163, %cst_67 {dimension_numbers = #tpu.dot_dimension_numbers<[1], [0], [0], [1], [0, 0, 1, 1], [], []>} : vector<8x8xf32>, vector<8x8xf32>, vector<8x8xf32> -> vector<8x8xf32>
    %178 = vector.extract_strided_slice %118 {offsets = [0, 24], sizes = [8, 8], strides = [1, 1]} : vector<8x32xf32> to vector<8x8xf32>
    %179 = vector.extract_strided_slice %125 {offsets = [0, 24], sizes = [8, 8], strides = [1, 1]} : vector<8x32xf32> to vector<8x8xf32>
    %180 = vector.extract_strided_slice %126 {offsets = [0, 24], sizes = [8, 8], strides = [1, 1]} : vector<8x32xf32> to vector<8x8xf32>
    %cst_68 = arith.constant dense<0.000000e+00> : vector<8x8xf32>
    %181 = tpu.matmul %178, %179, %cst_68 {dimension_numbers = #tpu.dot_dimension_numbers<[1], [1], [0], [0], [0, 0, 1, 0], [], []>} : vector<8x8xf32>, vector<8x8xf32>, vector<8x8xf32> -> vector<8x8xf32>
    %cst_69 = arith.constant 0.353553385 : f32
    %182 = vector.broadcast %cst_69 : f32 to vector<8x8xf32>
    %183 = arith.mulf %181, %182 : vector<8x8xf32>
    %cst_70 = arith.constant dense<0xFF800000> : vector<8xf32>
    %184 = vector.multi_reduction <maximumf>, %183, %cst_70 [1] : vector<8x8xf32> to vector<8xf32>
    %185 = vector.shape_cast %184 : vector<8xf32> to vector<8x1xf32>
    %186 = vector.broadcast %185 : vector<8x1xf32> to vector<8x8xf32>
    %187 = arith.subf %183, %186 : vector<8x8xf32>
    %188 = math.exp %187 : vector<8x8xf32>
    %cst_71 = arith.constant dense<0.000000e+00> : vector<8xf32>
    %189 = vector.multi_reduction <add>, %188, %cst_71 [1] : vector<8x8xf32> to vector<8xf32>
    %190 = vector.shape_cast %189 : vector<8xf32> to vector<8x1xf32>
    %191 = tpu.reciprocal %190 {approx = true} : vector<8x1xf32> -> vector<8x1xf32>
    %192 = vector.broadcast %191 : vector<8x1xf32> to vector<8x8xf32>
    %193 = arith.mulf %188, %192 : vector<8x8xf32>
    %cst_72 = arith.constant dense<0.000000e+00> : vector<8x8xf32>
    %194 = tpu.matmul %193, %180, %cst_72 {dimension_numbers = #tpu.dot_dimension_numbers<[1], [0], [0], [1], [0, 0, 1, 1], [], []>} : vector<8x8xf32>, vector<8x8xf32>, vector<8x8xf32> -> vector<8x8xf32>
    %195 = tpu.concatenate %143, %160, %177, %194 in 1 : vector<8x8xf32>, vector<8x8xf32>, vector<8x8xf32>, vector<8x8xf32> -> vector<8x32xf32>
    %c0_73 = arith.constant 0 : index
    %c0_74 = arith.constant 0 : index
    %196 = vector.load %arg13[%c0_73, %c0_74] : memref<32x32xbf16, #tpu.memory_space<vmem>>, vector<32x32xbf16>
    %c0_75 = arith.constant 0 : index
    %c0_76 = arith.constant 0 : index
    %197 = vector.load %arg14[%c0_75, %c0_76] : memref<1x32xf32, #tpu.memory_space<vmem>>, vector<1x32xf32>
    %198 = arith.truncf %195 : vector<8x32xf32> to vector<8x32xbf16>
    %cst_77 = arith.constant dense<0.000000e+00> : vector<8x32xf32>
    %199 = tpu.matmul %198, %196, %cst_77 {dimension_numbers = #tpu.dot_dimension_numbers<[1], [0], [0], [1], [0, 0, 1, 1], [], []>} : vector<8x32xbf16>, vector<32x32xbf16>, vector<8x32xf32> -> vector<8x32xf32>
    %200 = vector.broadcast %197 : vector<1x32xf32> to vector<8x32xf32>
    %201 = arith.addf %199, %200 : vector<8x32xf32>
    %202 = arith.addf %201, %112 : vector<8x32xf32>
    %c0_78 = arith.constant 0 : index
    %c0_79 = arith.constant 0 : index
    %203 = vector.load %arg15[%c0_78, %c0_79] : memref<1x32xf32, #tpu.memory_space<vmem>>, vector<1x32xf32>
    %c0_80 = arith.constant 0 : index
    %c0_81 = arith.constant 0 : index
    %204 = vector.load %arg16[%c0_80, %c0_81] : memref<1x32xf32, #tpu.memory_space<vmem>>, vector<1x32xf32>
    %cst_82 = arith.constant dense<0.000000e+00> : vector<8xf32>
    %205 = vector.multi_reduction <add>, %202, %cst_82 [1] : vector<8x32xf32> to vector<8xf32>
    %206 = vector.shape_cast %205 : vector<8xf32> to vector<8x1xf32>
    %cst_83 = arith.constant 3.200000e+01 : f32
    %207 = vector.broadcast %cst_83 : f32 to vector<8x1xf32>
    %208 = arith.divf %206, %207 : vector<8x1xf32>
    %209 = vector.broadcast %208 : vector<8x1xf32> to vector<8x32xf32>
    %210 = arith.subf %202, %209 : vector<8x32xf32>
    %211 = arith.mulf %210, %210 : vector<8x32xf32>
    %cst_84 = arith.constant dense<0.000000e+00> : vector<8xf32>
    %212 = vector.multi_reduction <add>, %211, %cst_84 [1] : vector<8x32xf32> to vector<8xf32>
    %213 = vector.shape_cast %212 : vector<8xf32> to vector<8x1xf32>
    %cst_85 = arith.constant 3.200000e+01 : f32
    %214 = vector.broadcast %cst_85 : f32 to vector<8x1xf32>
    %215 = arith.divf %213, %214 : vector<8x1xf32>
    %216 = vector.broadcast %208 : vector<8x1xf32> to vector<8x32xf32>
    %217 = arith.subf %202, %216 : vector<8x32xf32>
    %cst_86 = arith.constant 9.99999996E-13 : f32
    %218 = vector.broadcast %cst_86 : f32 to vector<8x1xf32>
    %219 = arith.addf %215, %218 : vector<8x1xf32>
    %220 = math.rsqrt %219 : vector<8x1xf32>
    %221 = vector.broadcast %220 : vector<8x1xf32> to vector<8x32xf32>
    %222 = arith.mulf %217, %221 : vector<8x32xf32>
    %223 = vector.broadcast %203 : vector<1x32xf32> to vector<8x32xf32>
    %224 = arith.mulf %222, %223 : vector<8x32xf32>
    %225 = vector.broadcast %204 : vector<1x32xf32> to vector<8x32xf32>
    %226 = arith.addf %224, %225 : vector<8x32xf32>
    %c0_87 = arith.constant 0 : index
    %c0_88 = arith.constant 0 : index
    %227 = vector.load %arg17[%c0_87, %c0_88] : memref<32x64xbf16, #tpu.memory_space<vmem>>, vector<32x64xbf16>
    %c0_89 = arith.constant 0 : index
    %c0_90 = arith.constant 0 : index
    %228 = vector.load %arg18[%c0_89, %c0_90] : memref<1x64xf32, #tpu.memory_space<vmem>>, vector<1x64xf32>
    %229 = arith.truncf %226 : vector<8x32xf32> to vector<8x32xbf16>
    %cst_91 = arith.constant dense<0.000000e+00> : vector<8x64xf32>
    %230 = tpu.matmul %229, %227, %cst_91 {dimension_numbers = #tpu.dot_dimension_numbers<[1], [0], [0], [1], [0, 0, 1, 1], [], []>} : vector<8x32xbf16>, vector<32x64xbf16>, vector<8x64xf32> -> vector<8x64xf32>
    %231 = vector.broadcast %228 : vector<1x64xf32> to vector<8x64xf32>
    %232 = arith.addf %230, %231 : vector<8x64xf32>
    %cst_92 = arith.constant 5.000000e-01 : f32
    %233 = vector.broadcast %cst_92 : f32 to vector<8x64xf32>
    %234 = arith.mulf %232, %233 : vector<8x64xf32>
    %cst_93 = arith.constant 0.707106769 : f32
    %235 = vector.broadcast %cst_93 : f32 to vector<8x64xf32>
    %236 = arith.mulf %232, %235 : vector<8x64xf32>
    %237 = math.absf %236 : vector<8x64xf32>
    %cst_94 = arith.constant 0.327591091 : f32
    %238 = vector.broadcast %cst_94 : f32 to vector<8x64xf32>
    %239 = arith.mulf %238, %237 : vector<8x64xf32>
    %cst_95 = arith.constant 1.000000e+00 : f32
    %240 = vector.broadcast %cst_95 : f32 to vector<8x64xf32>
    %241 = arith.addf %240, %239 : vector<8x64xf32>
    %cst_96 = arith.constant 1.000000e+00 : f32
    %242 = vector.broadcast %cst_96 : f32 to vector<8x64xf32>
    %243 = arith.divf %242, %241 : vector<8x64xf32>
    %cst_97 = arith.constant 1.06140542 : f32
    %244 = vector.broadcast %cst_97 : f32 to vector<8x64xf32>
    %245 = arith.mulf %244, %243 : vector<8x64xf32>
    %cst_98 = arith.constant -1.45315206 : f32
    %246 = vector.broadcast %cst_98 : f32 to vector<8x64xf32>
    %247 = arith.addf %245, %246 : vector<8x64xf32>
    %248 = arith.mulf %247, %243 : vector<8x64xf32>
    %cst_99 = arith.constant 1.42141378 : f32
    %249 = vector.broadcast %cst_99 : f32 to vector<8x64xf32>
    %250 = arith.addf %248, %249 : vector<8x64xf32>
    %251 = arith.mulf %250, %243 : vector<8x64xf32>
    %cst_100 = arith.constant -0.284496725 : f32
    %252 = vector.broadcast %cst_100 : f32 to vector<8x64xf32>
    %253 = arith.addf %251, %252 : vector<8x64xf32>
    %254 = arith.mulf %253, %243 : vector<8x64xf32>
    %cst_101 = arith.constant 0.254829586 : f32
    %255 = vector.broadcast %cst_101 : f32 to vector<8x64xf32>
    %256 = arith.addf %254, %255 : vector<8x64xf32>
    %257 = arith.mulf %256, %243 : vector<8x64xf32>
    %cst_102 = arith.constant 0.000000e+00 : f32
    %258 = vector.broadcast %cst_102 : f32 to vector<8x64xf32>
    %259 = arith.subf %258, %237 : vector<8x64xf32>
    %260 = arith.mulf %259, %237 : vector<8x64xf32>
    %261 = math.exp %260 : vector<8x64xf32>
    %262 = arith.mulf %257, %261 : vector<8x64xf32>
    %cst_103 = arith.constant 1.000000e+00 : f32
    %263 = vector.broadcast %cst_103 : f32 to vector<8x64xf32>
    %264 = arith.subf %263, %262 : vector<8x64xf32>
    %cst_104 = arith.constant 0.000000e+00 : f32
    %265 = vector.broadcast %cst_104 : f32 to vector<8x64xf32>
    %266 = arith.cmpf oge, %236, %265 : vector<8x64xf32>
    %cst_105 = arith.constant 0.000000e+00 : f32
    %267 = vector.broadcast %cst_105 : f32 to vector<8x64xf32>
    %268 = arith.subf %267, %264 : vector<8x64xf32>
    %269 = arith.select %266, %264, %268 : vector<8x64xi1>, vector<8x64xf32>
    %cst_106 = arith.constant 1.000000e+00 : f32
    %270 = vector.broadcast %cst_106 : f32 to vector<8x64xf32>
    %271 = arith.addf %270, %269 : vector<8x64xf32>
    %272 = arith.mulf %234, %271 : vector<8x64xf32>
    %c0_107 = arith.constant 0 : index
    %c0_108 = arith.constant 0 : index
    %273 = vector.load %arg19[%c0_107, %c0_108] : memref<64x32xbf16, #tpu.memory_space<vmem>>, vector<64x32xbf16>
    %c0_109 = arith.constant 0 : index
    %c0_110 = arith.constant 0 : index
    %274 = vector.load %arg20[%c0_109, %c0_110] : memref<1x32xf32, #tpu.memory_space<vmem>>, vector<1x32xf32>
    %275 = arith.truncf %272 : vector<8x64xf32> to vector<8x64xbf16>
    %cst_111 = arith.constant dense<0.000000e+00> : vector<8x32xf32>
    %276 = tpu.matmul %275, %273, %cst_111 {dimension_numbers = #tpu.dot_dimension_numbers<[1], [0], [0], [1], [0, 0, 1, 1], [], []>} : vector<8x64xbf16>, vector<64x32xbf16>, vector<8x32xf32> -> vector<8x32xf32>
    %277 = vector.broadcast %274 : vector<1x32xf32> to vector<8x32xf32>
    %278 = arith.addf %276, %277 : vector<8x32xf32>
    %279 = arith.addf %278, %226 : vector<8x32xf32>
    %c0_112 = arith.constant 0 : index
    %c0_113 = arith.constant 0 : index
    %280 = vector.load %arg21[%c0_112, %c0_113] : memref<1x32xf32, #tpu.memory_space<vmem>>, vector<1x32xf32>
    %c0_114 = arith.constant 0 : index
    %c0_115 = arith.constant 0 : index
    %281 = vector.load %arg22[%c0_114, %c0_115] : memref<1x32xf32, #tpu.memory_space<vmem>>, vector<1x32xf32>
    %cst_116 = arith.constant dense<0.000000e+00> : vector<8xf32>
    %282 = vector.multi_reduction <add>, %279, %cst_116 [1] : vector<8x32xf32> to vector<8xf32>
    %283 = vector.shape_cast %282 : vector<8xf32> to vector<8x1xf32>
    %cst_117 = arith.constant 3.200000e+01 : f32
    %284 = vector.broadcast %cst_117 : f32 to vector<8x1xf32>
    %285 = arith.divf %283, %284 : vector<8x1xf32>
    %286 = vector.broadcast %285 : vector<8x1xf32> to vector<8x32xf32>
    %287 = arith.subf %279, %286 : vector<8x32xf32>
    %288 = arith.mulf %287, %287 : vector<8x32xf32>
    %cst_118 = arith.constant dense<0.000000e+00> : vector<8xf32>
    %289 = vector.multi_reduction <add>, %288, %cst_118 [1] : vector<8x32xf32> to vector<8xf32>
    %290 = vector.shape_cast %289 : vector<8xf32> to vector<8x1xf32>
    %cst_119 = arith.constant 3.200000e+01 : f32
    %291 = vector.broadcast %cst_119 : f32 to vector<8x1xf32>
    %292 = arith.divf %290, %291 : vector<8x1xf32>
    %293 = vector.broadcast %285 : vector<8x1xf32> to vector<8x32xf32>
    %294 = arith.subf %279, %293 : vector<8x32xf32>
    %cst_120 = arith.constant 9.99999996E-13 : f32
    %295 = vector.broadcast %cst_120 : f32 to vector<8x1xf32>
    %296 = arith.addf %292, %295 : vector<8x1xf32>
    %297 = math.rsqrt %296 : vector<8x1xf32>
    %298 = vector.broadcast %297 : vector<8x1xf32> to vector<8x32xf32>
    %299 = arith.mulf %294, %298 : vector<8x32xf32>
    %300 = vector.broadcast %280 : vector<1x32xf32> to vector<8x32xf32>
    %301 = arith.mulf %299, %300 : vector<8x32xf32>
    %302 = vector.broadcast %281 : vector<1x32xf32> to vector<8x32xf32>
    %303 = arith.addf %301, %302 : vector<8x32xf32>
    %c0_121 = arith.constant 0 : index
    %c0_122 = arith.constant 0 : index
    %c0_123 = arith.constant 0 : index
    %304 = vector.load %arg23[%c0_121, %c0_122, %c0_123] : memref<1x8x32xf32, #tpu.memory_space<vmem>>, vector<1x8x32xf32>
    %305 = vector.shape_cast %304 : vector<1x8x32xf32> to vector<8x32xf32>
    %306 = vector.shape_cast %303 : vector<8x32xf32> to vector<1x8x32xf32>
    tpu.vector_store %arg23[%c0_121, %c0_122, %c0_123], %306 {strides = array<i32>} : memref<1x8x32xf32, #tpu.memory_space<vmem>>, vector<1x8x32xf32>,
    return
  }
  func.func @transform_0(%arg0: i32) -> (i32, i32, i32) {
    %c0_i32 = arith.constant 0 : i32
    %c0_i32_0 = arith.constant 0 : i32
    %c0_i32_1 = arith.constant 0 : i32
    return %arg0, %c0_i32, %c0_i32_0 : i32, i32, i32
  }
  func.func @transform_1(%arg0: i32) -> (i32, i32, i32) {
    %c0_i32 = arith.constant 0 : i32
    %c0_i32_0 = arith.constant 0 : i32
    %c0_i32_1 = arith.constant 0 : i32
    return %arg0, %c0_i32, %c0_i32_0 : i32, i32, i32
  }
  func.func @transform_2(%arg0: i32) -> (i32, i32) {
    %c0_i32 = arith.constant 0 : i32
    %c0_i32_0 = arith.constant 0 : i32
    %c0_i32_1 = arith.constant 0 : i32
    return %c0_i32, %c0_i32_0 : i32, i32
  }
  func.func @transform_3(%arg0: i32) -> (i32, i32) {
    %c0_i32 = arith.constant 0 : i32
    %c0_i32_0 = arith.constant 0 : i32
    %c0_i32_1 = arith.constant 0 : i32
    return %c0_i32, %c0_i32_0 : i32, i32
  }
  func.func @transform_4(%arg0: i32) -> (i32, i32) {
    %c0_i32 = arith.constant 0 : i32
    %c0_i32_0 = arith.constant 0 : i32
    %c0_i32_1 = arith.constant 0 : i32
    return %c0_i32, %c0_i32_0 : i32, i32
  }
  func.func @transform_5(%arg0: i32) -> (i32, i32) {
    %c0_i32 = arith.constant 0 : i32
    %c0_i32_0 = arith.constant 0 : i32
    %c0_i32_1 = arith.constant 0 : i32
    return %c0_i32, %c0_i32_0 : i32, i32
  }
  func.func @transform_6(%arg0: i32) -> (i32, i32) {
    %c0_i32 = arith.constant 0 : i32
    %c0_i32_0 = arith.constant 0 : i32
    %c0_i32_1 = arith.constant 0 : i32
    return %c0_i32, %c0_i32_0 : i32, i32
  }
  func.func @transform_7(%arg0: i32) -> (i32, i32) {
    %c0_i32 = arith.constant 0 : i32
    %c0_i32_0 = arith.constant 0 : i32
    %c0_i32_1 = arith.constant 0 : i32
    return %c0_i32, %c0_i32_0 : i32, i32
  }
  func.func @transform_8(%arg0: i32) -> (i32, i32) {
    %c0_i32 = arith.constant 0 : i32
    %c0_i32_0 = arith.constant 0 : i32
    %c0_i32_1 = arith.constant 0 : i32
    return %c0_i32, %c0_i32_0 : i32, i32
  }
  func.func @transform_9(%arg0: i32) -> (i32, i32) {
    %c0_i32 = arith.constant 0 : i32
    %c0_i32_0 = arith.constant 0 : i32
    %c0_i32_1 = arith.constant 0 : i32
    return %c0_i32, %c0_i32_0 : i32, i32
  }
  func.func @transform_10(%arg0: i32) -> (i32, i32) {
    %c0_i32 = arith.constant 0 : i32
    %c0_i32_0 = arith.constant 0 : i32
    %c0_i32_1 = arith.constant 0 : i32
    return %c0_i32, %c0_i32_0 : i32, i32
  }
  func.func @transform_11(%arg0: i32) -> (i32, i32) {
    %c0_i32 = arith.constant 0 : i32
    %c0_i32_0 = arith.constant 0 : i32
    %c0_i32_1 = arith.constant 0 : i32
    return %c0_i32, %c0_i32_0 : i32, i32
  }
  func.func @transform_12(%arg0: i32) -> (i32, i32) {
    %c0_i32 = arith.constant 0 : i32
    %c0_i32_0 = arith.constant 0 : i32
    %c0_i32_1 = arith.constant 0 : i32
    return %c0_i32, %c0_i32_0 : i32, i32
  }
  func.func @transform_13(%arg0: i32) -> (i32, i32) {
    %c0_i32 = arith.constant 0 : i32
    %c0_i32_0 = arith.constant 0 : i32
    %c0_i32_1 = arith.constant 0 : i32
    return %c0_i32, %c0_i32_0 : i32, i32
  }
  func.func @transform_14(%arg0: i32) -> (i32, i32) {
    %c0_i32 = arith.constant 0 : i32
    %c0_i32_0 = arith.constant 0 : i32
    %c0_i32_1 = arith.constant 0 : i32
    return %c0_i32, %c0_i32_0 : i32, i32
  }
  func.func @transform_15(%arg0: i32) -> (i32, i32) {
    %c0_i32 = arith.constant 0 : i32
    %c0_i32_0 = arith.constant 0 : i32
    %c0_i32_1 = arith.constant 0 : i32
    return %c0_i32, %c0_i32_0 : i32, i32
  }
  func.func @transform_16(%arg0: i32) -> (i32, i32) {
    %c0_i32 = arith.constant 0 : i32
    %c0_i32_0 = arith.constant 0 : i32
    %c0_i32_1 = arith.constant 0 : i32
    return %c0_i32, %c0_i32_0 : i32, i32
  }
  func.func @transform_17(%arg0: i32) -> (i32, i32) {
    %c0_i32 = arith.constant 0 : i32
    %c0_i32_0 = arith.constant 0 : i32
    %c0_i32_1 = arith.constant 0 : i32
    return %c0_i32, %c0_i32_0 : i32, i32
  }
  func.func @transform_18(%arg0: i32) -> (i32, i32) {
    %c0_i32 = arith.constant 0 : i32
    %c0_i32_0 = arith.constant 0 : i32
    %c0_i32_1 = arith.constant 0 : i32
    return %c0_i32, %c0_i32_0 : i32, i32
  }
  func.func @transform_19(%arg0: i32) -> (i32, i32) {
    %c0_i32 = arith.constant 0 : i32
    %c0_i32_0 = arith.constant 0 : i32
    %c0_i32_1 = arith.constant 0 : i32
    return %c0_i32, %c0_i32_0 : i32, i32
  }
  func.func @transform_20(%arg0: i32) -> (i32, i32) {
    %c0_i32 = arith.constant 0 : i32
    %c0_i32_0 = arith.constant 0 : i32
    %c0_i32_1 = arith.constant 0 : i32
    return %c0_i32, %c0_i32_0 : i32, i32
  }
  func.func @transform_21(%arg0: i32) -> (i32, i32) {
    %c0_i32 = arith.constant 0 : i32
    %c0_i32_0 = arith.constant 0 : i32
    %c0_i32_1 = arith.constant 0 : i32
    return %c0_i32, %c0_i32_0 : i32, i32
  }
  func.func @transform_22(%arg0: i32) -> (i32, i32, i32) {
    %c0_i32 = arith.constant 0 : i32
    %c0_i32_0 = arith.constant 0 : i32
    %c0_i32_1 = arith.constant 0 : i32
    return %arg0, %c0_i32, %c0_i32_0 : i32, i32, i32
  }
}

module attributes {stable_mosaic.version = 11 : i64} {
  func.func @_layer_kernel(%arg0: i32, %arg1: memref<1x8x32xf32, #tpu.memory_space<vmem>>, %arg2: memref<1x8x32xf32, #tpu.memory_space<vmem>>, %arg3: memref<32x96xbf16, #tpu.memory_space<vmem>>, %arg4: memref<1x96xf32, #tpu.memory_space<vmem>>, %arg5: memref<32x32xbf16, #tpu.memory_space<vmem>>, %arg6: memref<1x32xf32, #tpu.memory_space<vmem>>, %arg7: memref<1x32xf32, #tpu.memory_space<vmem>>, %arg8: memref<1x32xf32, #tpu.memory_space<vmem>>, %arg9: memref<32x32xbf16, #tpu.memory_space<vmem>>, %arg10: memref<1x32xf32, #tpu.memory_space<vmem>>, %arg11: memref<32x64xbf16, #tpu.memory_space<vmem>>, %arg12: memref<1x64xf32, #tpu.memory_space<vmem>>, %arg13: memref<32x32xbf16, #tpu.memory_space<vmem>>, %arg14: memref<1x32xf32, #tpu.memory_space<vmem>>, %arg15: memref<1x32xf32, #tpu.memory_space<vmem>>, %arg16: memref<1x32xf32, #tpu.memory_space<vmem>>, %arg17: memref<32x64xbf16, #tpu.memory_space<vmem>>, %arg18: memref<1x64xf32, #tpu.memory_space<vmem>>, %arg19: memref<64x32xbf16, #tpu.memory_space<vmem>>, %arg20: memref<1x32xf32, #tpu.memory_space<vmem>>, %arg21: memref<1x32xf32, #tpu.memory_space<vmem>>, %arg22: memref<1x32xf32, #tpu.memory_space<vmem>>, %arg23: memref<1x8x32xf32, #tpu.memory_space<vmem>>) attributes {dimension_semantics = [#tpu.dimension_semantics<parallel>], iteration_bounds = array<i64: 2>, scalar_prefetch = 0 : i64, scratch_operands = 0 : i64, tpu.core_type = #tpu.core_type<tc>, window_params = [{transform_indices = @transform_0, window_bounds = array<i64: 1, 8, 32>}, {transform_indices = @transform_1, window_bounds = array<i64: 1, 8, 32>}, {pipeline_mode = #tpu.pipeline_mode<synchronous>, transform_indices = @transform_2, window_bounds = array<i64: 32, 96>}, {pipeline_mode = #tpu.pipeline_mode<synchronous>, transform_indices = @transform_3, window_bounds = array<i64: 1, 96>}, {pipeline_mode = #tpu.pipeline_mode<synchronous>, transform_indices = @transform_4, window_bounds = array<i64: 32, 32>}, {pipeline_mode = #tpu.pipeline_mode<synchronous>, transform_indices = @transform_5, window_bounds = array<i64: 1, 32>}, {pipeline_mode = #tpu.pipeline_mode<synchronous>, transform_indices = @transform_6, window_bounds = array<i64: 1, 32>}, {pipeline_mode = #tpu.pipeline_mode<synchronous>, transform_indices = @transform_7, window_bounds = array<i64: 1, 32>}, {pipeline_mode = #tpu.pipeline_mode<synchronous>, transform_indices = @transform_8, window_bounds = array<i64: 32, 32>}, {pipeline_mode = #tpu.pipeline_mode<synchronous>, transform_indices = @transform_9, window_bounds = array<i64: 1, 32>}, {pipeline_mode = #tpu.pipeline_mode<synchronous>, transform_indices = @transform_10, window_bounds = array<i64: 32, 64>}, {pipeline_mode = #tpu.pipeline_mode<synchronous>, transform_indices = @transform_11, window_bounds = array<i64: 1, 64>}, {pipeline_mode = #tpu.pipeline_mode<synchronous>, transform_indices = @transform_12, window_bounds = array<i64: 32, 32>}, {pipeline_mode = #tpu.pipeline_mode<synchronous>, transform_indices = @transform_13, window_bounds = array<i64: 1, 32>}, {pipeline_mode = #tpu.pipeline_mode<synchronous>, transform_indices = @transform_14, window_bounds = array<i64: 1, 32>}, {pipeline_mode = #tpu.pipeline_mode<synchronous>, transform_indices = @transform_15, window_bounds = array<i64: 1, 32>}, {pipeline_mode = #tpu.pipeline_mode<synchronous>, transform_indices = @transform_16, window_bounds = array<i64: 32, 64>}, {pipeline_mode = #tpu.pipeline_mode<synchronous>, transform_indices = @transform_17, window_bounds = array<i64: 1, 64>}, {pipeline_mode = #tpu.pipeline_mode<synchronous>, transform_indices = @transform_18, window_bounds = array<i64: 64, 32>}, {pipeline_mode = #tpu.pipeline_mode<synchronous>, transform_indices = @transform_19, window_bounds = array<i64: 1, 32>}, {pipeline_mode = #tpu.pipeline_mode<synchronous>, transform_indices = @transform_20, window_bounds = array<i64: 1, 32>}, {pipeline_mode = #tpu.pipeline_mode<synchronous>, transform_indices = @transform_21, window_bounds = array<i64: 1, 32>}, {transform_indices = @transform_22, window_bounds = array<i64: 1, 8, 32>}]} {
    %c0 = arith.constant 0 : index
    %c0_0 = arith.constant 0 : index
    %c0_1 = arith.constant 0 : index
    %0 = vector.load %arg1[%c0, %c0_0, %c0_1] : memref<1x8x32xf32, #tpu.memory_space<vmem>>, vector<1x8x32xf32>
    %1 = vector.shape_cast %0 : vector<1x8x32xf32> to vector<8x32xf32>
    %c0_2 = arith.constant 0 : index
    %c0_3 = arith.constant 0 : index
    %c0_4 = arith.constant 0 : index
    %2 = vector.load %arg2[%c0_2, %c0_3, %c0_4] : memref<1x8x32xf32, #tpu.memory_space<vmem>>, vector<1x8x32xf32>
    %3 = vector.shape_cast %2 : vector<1x8x32xf32> to vector<8x32xf32>
    %c0_5 = arith.constant 0 : index
    %c0_6 = arith.constant 0 : index
    %4 = vector.load %arg3[%c0_5, %c0_6] : memref<32x96xbf16, #tpu.memory_space<vmem>>, vector<32x96xbf16>
    %c0_7 = arith.constant 0 : index
    %c0_8 = arith.constant 0 : index
    %5 = vector.load %arg4[%c0_7, %c0_8] : memref<1x96xf32, #tpu.memory_space<vmem>>, vector<1x96xf32>
    %6 = arith.truncf %1 : vector<8x32xf32> to vector<8x32xbf16>
    %cst = arith.constant dense<0.000000e+00> : vector<8x96xf32>
    %7 = tpu.matmul %6, %4, %cst {dimension_numbers = #tpu.dot_dimension_numbers<[1], [0], [0], [1], [0, 0, 1, 1], [], []>} : vector<8x32xbf16>, vector<32x96xbf16>, vector<8x96xf32> -> vector<8x96xf32>
    %8 = vector.broadcast %5 : vector<1x96xf32> to vector<8x96xf32>
    %9 = arith.addf %7, %8 : vector<8x96xf32>
    %10 = vector.extract_strided_slice %9 {offsets = [0, 0], sizes = [8, 32], strides = [1, 1]} : vector<8x96xf32> to vector<8x32xf32>
    %11 = vector.extract_strided_slice %9 {offsets = [0, 32], sizes = [8, 32], strides = [1, 1]} : vector<8x96xf32> to vector<8x32xf32>
    %12 = vector.extract_strided_slice %9 {offsets = [0, 64], sizes = [8, 32], strides = [1, 1]} : vector<8x96xf32> to vector<8x32xf32>
    %13 = vector.extract_strided_slice %10 {offsets = [0, 0], sizes = [8, 8], strides = [1, 1]} : vector<8x32xf32> to vector<8x8xf32>
    %14 = vector.extract_strided_slice %11 {offsets = [0, 0], sizes = [8, 8], strides = [1, 1]} : vector<8x32xf32> to vector<8x8xf32>
    %15 = vector.extract_strided_slice %12 {offsets = [0, 0], sizes = [8, 8], strides = [1, 1]} : vector<8x32xf32> to vector<8x8xf32>
    %cst_9 = arith.constant dense<0.000000e+00> : vector<8x8xf32>
    %16 = tpu.matmul %13, %14, %cst_9 {dimension_numbers = #tpu.dot_dimension_numbers<[1], [1], [0], [0], [0, 0, 1, 0], [], []>} : vector<8x8xf32>, vector<8x8xf32>, vector<8x8xf32> -> vector<8x8xf32>
    %cst_10 = arith.constant 0.353553385 : f32
    %17 = vector.broadcast %cst_10 : f32 to vector<8x8xf32>
    %18 = arith.mulf %16, %17 : vector<8x8xf32>
    %cst_11 = arith.constant dense<0xFF800000> : vector<8xf32>
    %19 = vector.multi_reduction <maximumf>, %18, %cst_11 [1] : vector<8x8xf32> to vector<8xf32>
    %20 = vector.shape_cast %19 : vector<8xf32> to vector<8x1xf32>
    %21 = vector.broadcast %20 : vector<8x1xf32> to vector<8x8xf32>
    %22 = arith.subf %18, %21 : vector<8x8xf32>
    %23 = math.exp %22 : vector<8x8xf32>
    %cst_12 = arith.constant dense<0.000000e+00> : vector<8xf32>
    %24 = vector.multi_reduction <add>, %23, %cst_12 [1] : vector<8x8xf32> to vector<8xf32>
    %25 = vector.shape_cast %24 : vector<8xf32> to vector<8x1xf32>
    %26 = tpu.reciprocal %25 {approx = true} : vector<8x1xf32> -> vector<8x1xf32>
    %27 = vector.broadcast %26 : vector<8x1xf32> to vector<8x8xf32>
    %28 = arith.mulf %23, %27 : vector<8x8xf32>
    %cst_13 = arith.constant dense<0.000000e+00> : vector<8x8xf32>
    %29 = tpu.matmul %28, %15, %cst_13 {dimension_numbers = #tpu.dot_dimension_numbers<[1], [0], [0], [1], [0, 0, 1, 1], [], []>} : vector<8x8xf32>, vector<8x8xf32>, vector<8x8xf32> -> vector<8x8xf32>
    %30 = vector.extract_strided_slice %10 {offsets = [0, 8], sizes = [8, 8], strides = [1, 1]} : vector<8x32xf32> to vector<8x8xf32>
    %31 = vector.extract_strided_slice %11 {offsets = [0, 8], sizes = [8, 8], strides = [1, 1]} : vector<8x32xf32> to vector<8x8xf32>
    %32 = vector.extract_strided_slice %12 {offsets = [0, 8], sizes = [8, 8], strides = [1, 1]} : vector<8x32xf32> to vector<8x8xf32>
    %cst_14 = arith.constant dense<0.000000e+00> : vector<8x8xf32>
    %33 = tpu.matmul %30, %31, %cst_14 {dimension_numbers = #tpu.dot_dimension_numbers<[1], [1], [0], [0], [0, 0, 1, 0], [], []>} : vector<8x8xf32>, vector<8x8xf32>, vector<8x8xf32> -> vector<8x8xf32>
    %cst_15 = arith.constant 0.353553385 : f32
    %34 = vector.broadcast %cst_15 : f32 to vector<8x8xf32>
    %35 = arith.mulf %33, %34 : vector<8x8xf32>
    %cst_16 = arith.constant dense<0xFF800000> : vector<8xf32>
    %36 = vector.multi_reduction <maximumf>, %35, %cst_16 [1] : vector<8x8xf32> to vector<8xf32>
    %37 = vector.shape_cast %36 : vector<8xf32> to vector<8x1xf32>
    %38 = vector.broadcast %37 : vector<8x1xf32> to vector<8x8xf32>
    %39 = arith.subf %35, %38 : vector<8x8xf32>
    %40 = math.exp %39 : vector<8x8xf32>
    %cst_17 = arith.constant dense<0.000000e+00> : vector<8xf32>
    %41 = vector.multi_reduction <add>, %40, %cst_17 [1] : vector<8x8xf32> to vector<8xf32>
    %42 = vector.shape_cast %41 : vector<8xf32> to vector<8x1xf32>
    %43 = tpu.reciprocal %42 {approx = true} : vector<8x1xf32> -> vector<8x1xf32>
    %44 = vector.broadcast %43 : vector<8x1xf32> to vector<8x8xf32>
    %45 = arith.mulf %40, %44 : vector<8x8xf32>
    %cst_18 = arith.constant dense<0.000000e+00> : vector<8x8xf32>
    %46 = tpu.matmul %45, %32, %cst_18 {dimension_numbers = #tpu.dot_dimension_numbers<[1], [0], [0], [1], [0, 0, 1, 1], [], []>} : vector<8x8xf32>, vector<8x8xf32>, vector<8x8xf32> -> vector<8x8xf32>
    %47 = vector.extract_strided_slice %10 {offsets = [0, 16], sizes = [8, 8], strides = [1, 1]} : vector<8x32xf32> to vector<8x8xf32>
    %48 = vector.extract_strided_slice %11 {offsets = [0, 16], sizes = [8, 8], strides = [1, 1]} : vector<8x32xf32> to vector<8x8xf32>
    %49 = vector.extract_strided_slice %12 {offsets = [0, 16], sizes = [8, 8], strides = [1, 1]} : vector<8x32xf32> to vector<8x8xf32>
    %cst_19 = arith.constant dense<0.000000e+00> : vector<8x8xf32>
    %50 = tpu.matmul %47, %48, %cst_19 {dimension_numbers = #tpu.dot_dimension_numbers<[1], [1], [0], [0], [0, 0, 1, 0], [], []>} : vector<8x8xf32>, vector<8x8xf32>, vector<8x8xf32> -> vector<8x8xf32>
    %cst_20 = arith.constant 0.353553385 : f32
    %51 = vector.broadcast %cst_20 : f32 to vector<8x8xf32>
    %52 = arith.mulf %50, %51 : vector<8x8xf32>
    %cst_21 = arith.constant dense<0xFF800000> : vector<8xf32>
    %53 = vector.multi_reduction <maximumf>, %52, %cst_21 [1] : vector<8x8xf32> to vector<8xf32>
    %54 = vector.shape_cast %53 : vector<8xf32> to vector<8x1xf32>
    %55 = vector.broadcast %54 : vector<8x1xf32> to vector<8x8xf32>
    %56 = arith.subf %52, %55 : vector<8x8xf32>
    %57 = math.exp %56 : vector<8x8xf32>
    %cst_22 = arith.constant dense<0.000000e+00> : vector<8xf32>
    %58 = vector.multi_reduction <add>, %57, %cst_22 [1] : vector<8x8xf32> to vector<8xf32>
    %59 = vector.shape_cast %58 : vector<8xf32> to vector<8x1xf32>
    %60 = tpu.reciprocal %59 {approx = true} : vector<8x1xf32> -> vector<8x1xf32>
    %61 = vector.broadcast %60 : vector<8x1xf32> to vector<8x8xf32>
    %62 = arith.mulf %57, %61 : vector<8x8xf32>
    %cst_23 = arith.constant dense<0.000000e+00> : vector<8x8xf32>
    %63 = tpu.matmul %62, %49, %cst_23 {dimension_numbers = #tpu.dot_dimension_numbers<[1], [0], [0], [1], [0, 0, 1, 1], [], []>} : vector<8x8xf32>, vector<8x8xf32>, vector<8x8xf32> -> vector<8x8xf32>
    %64 = vector.extract_strided_slice %10 {offsets = [0, 24], sizes = [8, 8], strides = [1, 1]} : vector<8x32xf32> to vector<8x8xf32>
    %65 = vector.extract_strided_slice %11 {offsets = [0, 24], sizes = [8, 8], strides = [1, 1]} : vector<8x32xf32> to vector<8x8xf32>
    %66 = vector.extract_strided_slice %12 {offsets = [0, 24], sizes = [8, 8], strides = [1, 1]} : vector<8x32xf32> to vector<8x8xf32>
    %cst_24 = arith.constant dense<0.000000e+00> : vector<8x8xf32>
    %67 = tpu.matmul %64, %65, %cst_24 {dimension_numbers = #tpu.dot_dimension_numbers<[1], [1], [0], [0], [0, 0, 1, 0], [], []>} : vector<8x8xf32>, vector<8x8xf32>, vector<8x8xf32> -> vector<8x8xf32>
    %cst_25 = arith.constant 0.353553385 : f32
    %68 = vector.broadcast %cst_25 : f32 to vector<8x8xf32>
    %69 = arith.mulf %67, %68 : vector<8x8xf32>
    %cst_26 = arith.constant dense<0xFF800000> : vector<8xf32>
    %70 = vector.multi_reduction <maximumf>, %69, %cst_26 [1] : vector<8x8xf32> to vector<8xf32>
    %71 = vector.shape_cast %70 : vector<8xf32> to vector<8x1xf32>
    %72 = vector.broadcast %71 : vector<8x1xf32> to vector<8x8xf32>
    %73 = arith.subf %69, %72 : vector<8x8xf32>
    %74 = math.exp %73 : vector<8x8xf32>
    %cst_27 = arith.constant dense<0.000000e+00> : vector<8xf32>
    %75 = vector.multi_reduction <add>, %74, %cst_27 [1] : vector<8x8xf32> to vector<8xf32>
    %76 = vector.shape_cast %75 : vector<8xf32> to vector<8x1xf32>
    %77 = tpu.reciprocal %76 {approx = true} : vector<8x1xf32> -> vector<8x1xf32>
    %78 = vector.broadcast %77 : vector<8x1xf32> to vector<8x8xf32>
    %79 = arith.mulf %74, %78 : vector<8x8xf32>
    %cst_28 = arith.constant dense<0.000000e+00> : vector<8x8xf32>
    %80 = tpu.matmul %79, %66, %cst_28 {dimension_numbers = #tpu.dot_dimension_numbers<[1], [0], [0], [1], [0, 0, 1, 1], [], []>} : vector<8x8xf32>, vector<8x8xf32>, vector<8x8xf32> -> vector<8x8xf32>
    %81 = tpu.concatenate %29, %46, %63, %80 in 1 : vector<8x8xf32>, vector<8x8xf32>, vector<8x8xf32>, vector<8x8xf32> -> vector<8x32xf32>
    %c0_29 = arith.constant 0 : index
    %c0_30 = arith.constant 0 : index
    %82 = vector.load %arg5[%c0_29, %c0_30] : memref<32x32xbf16, #tpu.memory_space<vmem>>, vector<32x32xbf16>
    %c0_31 = arith.constant 0 : index
    %c0_32 = arith.constant 0 : index
    %83 = vector.load %arg6[%c0_31, %c0_32] : memref<1x32xf32, #tpu.memory_space<vmem>>, vector<1x32xf32>
    %84 = arith.truncf %81 : vector<8x32xf32> to vector<8x32xbf16>
    %cst_33 = arith.constant dense<0.000000e+00> : vector<8x32xf32>
    %85 = tpu.matmul %84, %82, %cst_33 {dimension_numbers = #tpu.dot_dimension_numbers<[1], [0], [0], [1], [0, 0, 1, 1], [], []>} : vector<8x32xbf16>, vector<32x32xbf16>, vector<8x32xf32> -> vector<8x32xf32>
    %86 = vector.broadcast %83 : vector<1x32xf32> to vector<8x32xf32>
    %87 = arith.addf %85, %86 : vector<8x32xf32>
    %88 = arith.addf %87, %1 : vector<8x32xf32>
    %c0_34 = arith.constant 0 : index
    %c0_35 = arith.constant 0 : index
    %89 = vector.load %arg7[%c0_34, %c0_35] : memref<1x32xf32, #tpu.memory_space<vmem>>, vector<1x32xf32>
    %c0_36 = arith.constant 0 : index
    %c0_37 = arith.constant 0 : index
    %90 = vector.load %arg8[%c0_36, %c0_37] : memref<1x32xf32, #tpu.memory_space<vmem>>, vector<1x32xf32>
    %cst_38 = arith.constant dense<0.000000e+00> : vector<8xf32>
    %91 = vector.multi_reduction <add>, %88, %cst_38 [1] : vector<8x32xf32> to vector<8xf32>
    %92 = vector.shape_cast %91 : vector<8xf32> to vector<8x1xf32>
    %cst_39 = arith.constant 3.200000e+01 : f32
    %93 = vector.broadcast %cst_39 : f32 to vector<8x1xf32>
    %94 = arith.divf %92, %93 : vector<8x1xf32>
    %95 = vector.broadcast %94 : vector<8x1xf32> to vector<8x32xf32>
    %96 = arith.subf %88, %95 : vector<8x32xf32>
    %97 = arith.mulf %96, %96 : vector<8x32xf32>
    %cst_40 = arith.constant dense<0.000000e+00> : vector<8xf32>
    %98 = vector.multi_reduction <add>, %97, %cst_40 [1] : vector<8x32xf32> to vector<8xf32>
    %99 = vector.shape_cast %98 : vector<8xf32> to vector<8x1xf32>
    %cst_41 = arith.constant 3.200000e+01 : f32
    %100 = vector.broadcast %cst_41 : f32 to vector<8x1xf32>
    %101 = arith.divf %99, %100 : vector<8x1xf32>
    %102 = vector.broadcast %94 : vector<8x1xf32> to vector<8x32xf32>
    %103 = arith.subf %88, %102 : vector<8x32xf32>
    %cst_42 = arith.constant 9.99999996E-13 : f32
    %104 = vector.broadcast %cst_42 : f32 to vector<8x1xf32>
    %105 = arith.addf %101, %104 : vector<8x1xf32>
    %106 = math.rsqrt %105 : vector<8x1xf32>
    %107 = vector.broadcast %106 : vector<8x1xf32> to vector<8x32xf32>
    %108 = arith.mulf %103, %107 : vector<8x32xf32>
    %109 = vector.broadcast %89 : vector<1x32xf32> to vector<8x32xf32>
    %110 = arith.mulf %108, %109 : vector<8x32xf32>
    %111 = vector.broadcast %90 : vector<1x32xf32> to vector<8x32xf32>
    %112 = arith.addf %110, %111 : vector<8x32xf32>
    %c0_43 = arith.constant 0 : index
    %c0_44 = arith.constant 0 : index
    %113 = vector.load %arg9[%c0_43, %c0_44] : memref<32x32xbf16, #tpu.memory_space<vmem>>, vector<32x32xbf16>
    %c0_45 = arith.constant 0 : index
    %c0_46 = arith.constant 0 : index
    %114 = vector.load %arg10[%c0_45, %c0_46] : memref<1x32xf32, #tpu.memory_space<vmem>>, vector<1x32xf32>
    %115 = arith.truncf %112 : vector<8x32xf32> to vector<8x32xbf16>
    %cst_47 = arith.constant dense<0.000000e+00> : vector<8x32xf32>
    %116 = tpu.matmul %115, %113, %cst_47 {dimension_numbers = #tpu.dot_dimension_numbers<[1], [0], [0], [1], [0, 0, 1, 1], [], []>} : vector<8x32xbf16>, vector<32x32xbf16>, vector<8x32xf32> -> vector<8x32xf32>
    %117 = vector.broadcast %114 : vector<1x32xf32> to vector<8x32xf32>
    %118 = arith.addf %116, %117 : vector<8x32xf32>
    %c0_48 = arith.constant 0 : index
    %c0_49 = arith.constant 0 : index
    %119 = vector.load %arg11[%c0_48, %c0_49] : memref<32x64xbf16, #tpu.memory_space<vmem>>, vector<32x64xbf16>
    %c0_50 = arith.constant 0 : index
    %c0_51 = arith.constant 0 : index
    %120 = vector.load %arg12[%c0_50, %c0_51] : memref<1x64xf32, #tpu.memory_space<vmem>>, vector<1x64xf32>
    %121 = arith.truncf %3 : vector<8x32xf32> to vector<8x32xbf16>
    %cst_52 = arith.constant dense<0.000000e+00> : vector<8x64xf32>
    %122 = tpu.matmul %121, %119, %cst_52 {dimension_numbers = #tpu.dot_dimension_numbers<[1], [0], [0], [1], [0, 0, 1, 1], [], []>} : vector<8x32xbf16>, vector<32x64xbf16>, vector<8x64xf32> -> vector<8x64xf32>
    %123 = vector.broadcast %120 : vector<1x64xf32> to vector<8x64xf32>
    %124 = arith.addf %122, %123 : vector<8x64xf32>
    %125 = vector.extract_strided_slice %124 {offsets = [0, 0], sizes = [8, 32], strides = [1, 1]} : vector<8x64xf32> to vector<8x32xf32>
    %126 = vector.extract_strided_slice %124 {offsets = [0, 32], sizes = [8, 32], strides = [1, 1]} : vector<8x64xf32> to vector<8x32xf32>
    %127 = vector.extract_strided_slice %118 {offsets = [0, 0], sizes = [8, 8], strides = [1, 1]} : vector<8x32xf32> to vector<8x8xf32>
    %128 = vector.extract_strided_slice %125 {offsets = [0, 0], sizes = [8, 8], strides = [1, 1]} : vector<8x32xf32> to vector<8x8xf32>
    %129 = vector.extract_strided_slice %126 {offsets = [0, 0], sizes = [8, 8], strides = [1, 1]} : vector<8x32xf32> to vector<8x8xf32>
    %cst_53 = arith.constant dense<0.000000e+00> : vector<8x8xf32>
    %130 = tpu.matmul %127, %128, %cst_53 {dimension_numbers = #tpu.dot_dimension_numbers<[1], [1], [0], [0], [0, 0, 1, 0], [], []>} : vector<8x8xf32>, vector<8x8xf32>, vector<8x8xf32> -> vector<8x8xf32>
    %cst_54 = arith.constant 0.353553385 : f32
    %131 = vector.broadcast %cst_54 : f32 to vector<8x8xf32>
    %132 = arith.mulf %130, %131 : vector<8x8xf32>
    %cst_55 = arith.constant dense<0xFF800000> : vector<8xf32>
    %133 = vector.multi_reduction <maximumf>, %132, %cst_55 [1] : vector<8x8xf32> to vector<8xf32>
    %134 = vector.shape_cast %133 : vector<8xf32> to vector<8x1xf32>
    %135 = vector.broadcast %134 : vector<8x1xf32> to vector<8x8xf32>
    %136 = arith.subf %132, %135 : vector<8x8xf32>
    %137 = math.exp %136 : vector<8x8xf32>
    %cst_56 = arith.constant dense<0.000000e+00> : vector<8xf32>
    %138 = vector.multi_reduction <add>, %137, %cst_56 [1] : vector<8x8xf32> to vector<8xf32>
    %139 = vector.shape_cast %138 : vector<8xf32> to vector<8x1xf32>
    %140 = tpu.reciprocal %139 {approx = true} : vector<8x1xf32> -> vector<8x1xf32>
    %141 = vector.broadcast %140 : vector<8x1xf32> to vector<8x8xf32>
    %142 = arith.mulf %137, %141 : vector<8x8xf32>
    %cst_57 = arith.constant dense<0.000000e+00> : vector<8x8xf32>
    %143 = tpu.matmul %142, %129, %cst_57 {dimension_numbers = #tpu.dot_dimension_numbers<[1], [0], [0], [1], [0, 0, 1, 1], [], []>} : vector<8x8xf32>, vector<8x8xf32>, vector<8x8xf32> -> vector<8x8xf32>
    %144 = vector.extract_strided_slice %118 {offsets = [0, 8], sizes = [8, 8], strides = [1, 1]} : vector<8x32xf32> to vector<8x8xf32>
    %145 = vector.extract_strided_slice %125 {offsets = [0, 8], sizes = [8, 8], strides = [1, 1]} : vector<8x32xf32> to vector<8x8xf32>
    %146 = vector.extract_strided_slice %126 {offsets = [0, 8], sizes = [8, 8], strides = [1, 1]} : vector<8x32xf32> to vector<8x8xf32>
    %cst_58 = arith.constant dense<0.000000e+00> : vector<8x8xf32>
    %147 = tpu.matmul %144, %145, %cst_58 {dimension_numbers = #tpu.dot_dimension_numbers<[1], [1], [0], [0], [0, 0, 1, 0], [], []>} : vector<8x8xf32>, vector<8x8xf32>, vector<8x8xf32> -> vector<8x8xf32>
    %cst_59 = arith.constant 0.353553385 : f32
    %148 = vector.broadcast %cst_59 : f32 to vector<8x8xf32>
    %149 = arith.mulf %147, %148 : vector<8x8xf32>
    %cst_60 = arith.constant dense<0xFF800000> : vector<8xf32>
    %150 = vector.multi_reduction <maximumf>, %149, %cst_60 [1] : vector<8x8xf32> to vector<8xf32>
    %151 = vector.shape_cast %150 : vector<8xf32> to vector<8x1xf32>
    %152 = vector.broadcast %151 : vector<8x1xf32> to vector<8x8xf32>
    %153 = arith.subf %149, %152 : vector<8x8xf32>
    %154 = math.exp %153 : vector<8x8xf32>
    %cst_61 = arith.constant dense<0.000000e+00> : vector<8xf32>
    %155 = vector.multi_reduction <add>, %154, %cst_61 [1] : vector<8x8xf32> to vector<8xf32>
    %156 = vector.shape_cast %155 : vector<8xf32> to vector<8x1xf32>
    %157 = tpu.reciprocal %156 {approx = true} : vector<8x1xf32> -> vector<8x1xf32>
    %158 = vector.broadcast %157 : vector<8x1xf32> to vector<8x8xf32>
    %159 = arith.mulf %154, %158 : vector<8x8xf32>
    %cst_62 = arith.constant dense<0.000000e+00> : vector<8x8xf32>
    %160 = tpu.matmul %159, %146, %cst_62 {dimension_numbers = #tpu.dot_dimension_numbers<[1], [0], [0], [1], [0, 0, 1, 1], [], []>} : vector<8x8xf32>, vector<8x8xf32>, vector<8x8xf32> -> vector<8x8xf32>
    %161 = vector.extract_strided_slice %118 {offsets = [0, 16], sizes = [8, 8], strides = [1, 1]} : vector<8x32xf32> to vector<8x8xf32>
    %162 = vector.extract_strided_slice %125 {offsets = [0, 16], sizes = [8, 8], strides = [1, 1]} : vector<8x32xf32> to vector<8x8xf32>
    %163 = vector.extract_strided_slice %126 {offsets = [0, 16], sizes = [8, 8], strides = [1, 1]} : vector<8x32xf32> to vector<8x8xf32>
    %cst_63 = arith.constant dense<0.000000e+00> : vector<8x8xf32>
    %164 = tpu.matmul %161, %162, %cst_63 {dimension_numbers = #tpu.dot_dimension_numbers<[1], [1], [0], [0], [0, 0, 1, 0], [], []>} : vector<8x8xf32>, vector<8x8xf32>, vector<8x8xf32> -> vector<8x8xf32>
    %cst_64 = arith.constant 0.353553385 : f32
    %165 = vector.broadcast %cst_64 : f32 to vector<8x8xf32>
    %166 = arith.mulf %164, %165 : vector<8x8xf32>
    %cst_65 = arith.constant dense<0xFF800000> : vector<8xf32>
    %167 = vector.multi_reduction <maximumf>, %166, %cst_65 [1] : vector<8x8xf32> to vector<8xf32>
    %168 = vector.shape_cast %167 : vector<8xf32> to vector<8x1xf32>
    %169 = vector.broadcast %168 : vector<8x1xf32> to vector<8x8xf32>
    %170 = arith.subf %166, %169 : vector<8x8xf32>
    %171 = math.exp %170 : vector<8x8xf32>
    %cst_66 = arith.constant dense<0.000000e+00> : vector<8xf32>
    %172 = vector.multi_reduction <add>, %171, %cst_66 [1] : vector<8x8xf32> to vector<8xf32>
    %173 = vector.shape_cast %172 : vector<8xf32> to vector<8x1xf32>
    %174 = tpu.reciprocal %173 {approx = true} : vector<8x1xf32> -> vector<8x1xf32>
    %175 = vector.broadcast %174 : vector<8x1xf32> to vector<8x8xf32>
    %176 = arith.mulf %171, %175 : vector<8x8xf32>
    %cst_67 = arith.constant dense<0.000000e+00> : vector<8x8xf32>
    %177 = tpu.matmul %176, %163, %cst_67 {dimension_numbers = #tpu.dot_dimension_numbers<[1], [0], [0], [1], [0, 0, 1, 1], [], []>} : vector<8x8xf32>, vector<8x8xf32>, vector<8x8xf32> -> vector<8x8xf32>
    %178 = vector.extract_strided_slice %118 {offsets = [0, 24], sizes = [8, 8], strides = [1, 1]} : vector<8x32xf32> to vector<8x8xf32>
    %179 = vector.extract_strided_slice %125 {offsets = [0, 24], sizes = [8, 8], strides = [1, 1]} : vector<8x32xf32> to vector<8x8xf32>
    %180 = vector.extract_strided_slice %126 {offsets = [0, 24], sizes = [8, 8], strides = [1, 1]} : vector<8x32xf32> to vector<8x8xf32>
    %cst_68 = arith.constant dense<0.000000e+00> : vector<8x8xf32>
    %181 = tpu.matmul %178, %179, %cst_68 {dimension_numbers = #tpu.dot_dimension_numbers<[1], [1], [0], [0], [0, 0, 1, 0], [], []>} : vector<8x8xf32>, vector<8x8xf32>, vector<8x8xf32> -> vector<8x8xf32>
    %cst_69 = arith.constant 0.353553385 : f32
    %182 = vector.broadcast %cst_69 : f32 to vector<8x8xf32>
    %183 = arith.mulf %181, %182 : vector<8x8xf32>
    %cst_70 = arith.constant dense<0xFF800000> : vector<8xf32>
    %184 = vector.multi_reduction <maximumf>, %183, %cst_70 [1] : vector<8x8xf32> to vector<8xf32>
    %185 = vector.shape_cast %184 : vector<8xf32> to vector<8x1xf32>
    %186 = vector.broadcast %185 : vector<8x1xf32> to vector<8x8xf32>
    %187 = arith.subf %183, %186 : vector<8x8xf32>
    %188 = math.exp %187 : vector<8x8xf32>
    %cst_71 = arith.constant dense<0.000000e+00> : vector<8xf32>
    %189 = vector.multi_reduction <add>, %188, %cst_71 [1] : vector<8x8xf32> to vector<8xf32>
    %190 = vector.shape_cast %189 : vector<8xf32> to vector<8x1xf32>
    %191 = tpu.reciprocal %190 {approx = true} : vector<8x1xf32> -> vector<8x1xf32>
    %192 = vector.broadcast %191 : vector<8x1xf32> to vector<8x8xf32>
    %193 = arith.mulf %188, %192 : vector<8x8xf32>
    %cst_72 = arith.constant dense<0.000000e+00> : vector<8x8xf32>
    %194 = tpu.matmul %193, %180, %cst_72 {dimension_numbers = #tpu.dot_dimension_numbers<[1], [0], [0], [1], [0, 0, 1, 1], [], []>} : vector<8x8xf32>, vector<8x8xf32>, vector<8x8xf32> -> vector<8x8xf32>
    %195 = tpu.concatenate %143, %160, %177, %194 in 1 : vector<8x8xf32>, vector<8x8xf32>, vector<8x8xf32>, vector<8x8xf32> -> vector<8x32xf32>
    %c0_73 = arith.constant 0 : index
    %c0_74 = arith.constant 0 : index
    %196 = vector.load %arg13[%c0_73, %c0_74] : memref<32x32xbf16, #tpu.memory_space<vmem>>, vector<32x32xbf16>
    %c0_75 = arith.constant 0 : index
    %c0_76 = arith.constant 0 : index
    %197 = vector.load %arg14[%c0_75, %c0_76] : memref<1x32xf32, #tpu.memory_space<vmem>>, vector<1x32xf32>
    %198 = arith.truncf %195 : vector<8x32xf32> to vector<8x32xbf16>
    %cst_77 = arith.constant dense<0.000000e+00> : vector<8x32xf32>
    %199 = tpu.matmul %198, %196, %cst_77 {dimension_numbers = #tpu.dot_dimension_numbers<[1], [0], [0], [1], [0, 0, 1, 1], [], []>} : vector<8x32xbf16>, vector<32x32xbf16>, vector<8x32xf32> -> vector<8x32xf32>
    %200 = vector.broadcast %197 : vector<1x32xf32> to vector<8x32xf32>
    %201 = arith.addf %199, %200 : vector<8x32xf32>
    %202 = arith.addf %201, %112 : vector<8x32xf32>
    %c0_78 = arith.constant 0 : index
    %c0_79 = arith.constant 0 : index
    %203 = vector.load %arg15[%c0_78, %c0_79] : memref<1x32xf32, #tpu.memory_space<vmem>>, vector<1x32xf32>
    %c0_80 = arith.constant 0 : index
    %c0_81 = arith.constant 0 : index
    %204 = vector.load %arg16[%c0_80, %c0_81] : memref<1x32xf32, #tpu.memory_space<vmem>>, vector<1x32xf32>
    %cst_82 = arith.constant dense<0.000000e+00> : vector<8xf32>
    %205 = vector.multi_reduction <add>, %202, %cst_82 [1] : vector<8x32xf32> to vector<8xf32>
    %206 = vector.shape_cast %205 : vector<8xf32> to vector<8x1xf32>
    %cst_83 = arith.constant 3.200000e+01 : f32
    %207 = vector.broadcast %cst_83 : f32 to vector<8x1xf32>
    %208 = arith.divf %206, %207 : vector<8x1xf32>
    %209 = vector.broadcast %208 : vector<8x1xf32> to vector<8x32xf32>
    %210 = arith.subf %202, %209 : vector<8x32xf32>
    %211 = arith.mulf %210, %210 : vector<8x32xf32>
    %cst_84 = arith.constant dense<0.000000e+00> : vector<8xf32>
    %212 = vector.multi_reduction <add>, %211, %cst_84 [1] : vector<8x32xf32> to vector<8xf32>
    %213 = vector.shape_cast %212 : vector<8xf32> to vector<8x1xf32>
    %cst_85 = arith.constant 3.200000e+01 : f32
    %214 = vector.broadcast %cst_85 : f32 to vector<8x1xf32>
    %215 = arith.divf %213, %214 : vector<8x1xf32>
    %216 = vector.broadcast %208 : vector<8x1xf32> to vector<8x32xf32>
    %217 = arith.subf %202, %216 : vector<8x32xf32>
    %cst_86 = arith.constant 9.99999996E-13 : f32
    %218 = vector.broadcast %cst_86 : f32 to vector<8x1xf32>
    %219 = arith.addf %215, %218 : vector<8x1xf32>
    %220 = math.rsqrt %219 : vector<8x1xf32>
    %221 = vector.broadcast %220 : vector<8x1xf32> to vector<8x32xf32>
    %222 = arith.mulf %217, %221 : vector<8x32xf32>
    %223 = vector.broadcast %203 : vector<1x32xf32> to vector<8x32xf32>
    %224 = arith.mulf %222, %223 : vector<8x32xf32>
    %225 = vector.broadcast %204 : vector<1x32xf32> to vector<8x32xf32>
    %226 = arith.addf %224, %225 : vector<8x32xf32>
    %c0_87 = arith.constant 0 : index
    %c0_88 = arith.constant 0 : index
    %227 = vector.load %arg17[%c0_87, %c0_88] : memref<32x64xbf16, #tpu.memory_space<vmem>>, vector<32x64xbf16>
    %c0_89 = arith.constant 0 : index
    %c0_90 = arith.constant 0 : index
    %228 = vector.load %arg18[%c0_89, %c0_90] : memref<1x64xf32, #tpu.memory_space<vmem>>, vector<1x64xf32>
    %229 = arith.truncf %226 : vector<8x32xf32> to vector<8x32xbf16>
    %cst_91 = arith.constant dense<0.000000e+00> : vector<8x64xf32>
    %230 = tpu.matmul %229, %227, %cst_91 {dimension_numbers = #tpu.dot_dimension_numbers<[1], [0], [0], [1], [0, 0, 1, 1], [], []>} : vector<8x32xbf16>, vector<32x64xbf16>, vector<8x64xf32> -> vector<8x64xf32>
    %231 = vector.broadcast %228 : vector<1x64xf32> to vector<8x64xf32>
    %232 = arith.addf %230, %231 : vector<8x64xf32>
    %cst_92 = arith.constant 5.000000e-01 : f32
    %233 = vector.broadcast %cst_92 : f32 to vector<8x64xf32>
    %234 = arith.mulf %232, %233 : vector<8x64xf32>
    %cst_93 = arith.constant 0.707106769 : f32
    %235 = vector.broadcast %cst_93 : f32 to vector<8x64xf32>
    %236 = arith.mulf %232, %235 : vector<8x64xf32>
    %237 = math.absf %236 : vector<8x64xf32>
    %cst_94 = arith.constant 0.327591091 : f32
    %238 = vector.broadcast %cst_94 : f32 to vector<8x64xf32>
    %239 = arith.mulf %238, %237 : vector<8x64xf32>
    %cst_95 = arith.constant 1.000000e+00 : f32
    %240 = vector.broadcast %cst_95 : f32 to vector<8x64xf32>
    %241 = arith.addf %240, %239 : vector<8x64xf32>
    %cst_96 = arith.constant 1.000000e+00 : f32
    %242 = vector.broadcast %cst_96 : f32 to vector<8x64xf32>
    %243 = arith.divf %242, %241 : vector<8x64xf32>
    %cst_97 = arith.constant 1.06140542 : f32
    %244 = vector.broadcast %cst_97 : f32 to vector<8x64xf32>
    %245 = arith.mulf %244, %243 : vector<8x64xf32>
    %cst_98 = arith.constant -1.45315206 : f32
    %246 = vector.broadcast %cst_98 : f32 to vector<8x64xf32>
    %247 = arith.addf %245, %246 : vector<8x64xf32>
    %248 = arith.mulf %247, %243 : vector<8x64xf32>
    %cst_99 = arith.constant 1.42141378 : f32
    %249 = vector.broadcast %cst_99 : f32 to vector<8x64xf32>
    %250 = arith.addf %248, %249 : vector<8x64xf32>
    %251 = arith.mulf %250, %243 : vector<8x64xf32>
    %cst_100 = arith.constant -0.284496725 : f32
    %252 = vector.broadcast %cst_100 : f32 to vector<8x64xf32>
    %253 = arith.addf %251, %252 : vector<8x64xf32>
    %254 = arith.mulf %253, %243 : vector<8x64xf32>
    %cst_101 = arith.constant 0.254829586 : f32
    %255 = vector.broadcast %cst_101 : f32 to vector<8x64xf32>
    %256 = arith.addf %254, %255 : vector<8x64xf32>
    %257 = arith.mulf %256, %243 : vector<8x64xf32>
    %cst_102 = arith.constant 0.000000e+00 : f32
    %258 = vector.broadcast %cst_102 : f32 to vector<8x64xf32>
    %259 = arith.subf %258, %237 : vector<8x64xf32>
    %260 = arith.mulf %259, %237 : vector<8x64xf32>
    %261 = math.exp %260 : vector<8x64xf32>
    %262 = arith.mulf %257, %261 : vector<8x64xf32>
    %cst_103 = arith.constant 1.000000e+00 : f32
    %263 = vector.broadcast %cst_103 : f32 to vector<8x64xf32>
    %264 = arith.subf %263, %262 : vector<8x64xf32>
    %cst_104 = arith.constant 0.000000e+00 : f32
    %265 = vector.broadcast %cst_104 : f32 to vector<8x64xf32>
    %266 = arith.cmpf oge, %236, %265 : vector<8x64xf32>
    %cst_105 = arith.constant 0.000000e+00 : f32
    %267 = vector.broadcast %cst_105 : f32 to vector<8x64xf32>
    %268 = arith.subf %267, %264 : vector<8x64xf32>
    %269 = arith.select %266, %264, %268 : vector<8x64xi1>, vector<8x64xf32>
    %cst_106 = arith.constant 1.000000e+00 : f32
    %270 = vector.broadcast %cst_106 : f32 to vector<8x64xf32>
    %271 = arith.addf %270, %269 : vector<8x64xf32>
    %272 = arith.mulf %234, %271 : vector<8x64xf32>
    %c0_107 = arith.constant 0 : index
    %c0_108 = arith.constant 0 : index
    %273 = vector.load %arg19[%c0_107, %c0_108] : memref<64x32xbf16, #tpu.memory_space<vmem>>, vector<64x32xbf16>
    %c0_109 = arith.constant 0 : index
    %c0_110 = arith.constant 0 : index
    %274 = vector.load %arg20[%c0_109, %c0_110] : memref<1x32xf32, #tpu.memory_space<vmem>>, vector<1x32xf32>
    %275 = arith.truncf %272 : vector<8x64xf32> to vector<8x64xbf16>
    %cst_111 = arith.constant dense<0.000000e+00> : vector<8x32xf32>
    %276 = tpu.matmul %275, %273, %cst_111 {dimension_numbers = #tpu.dot_dimension_numbers<[1], [0], [0], [1], [0, 0, 1, 1], [], []>} : vector<8x64xbf16>, vector<64x32xbf16>, vector<8x32xf32> -> vector<8x32xf32>
    %277 = vector.broadcast %274 : vector<1x32xf32> to vector<8x32xf32>
    %278 = arith.addf %276, %277 : vector<8x32xf32>
    %279 = arith.addf %278, %226 : vector<8x32xf32>
    %c0_112 = arith.constant 0 : index
    %c0_113 = arith.constant 0 : index
    %280 = vector.load %arg21[%c0_112, %c0_113] : memref<1x32xf32, #tpu.memory_space<vmem>>, vector<1x32xf32>
    %c0_114 = arith.constant 0 : index
    %c0_115 = arith.constant 0 : index
    %281 = vector.load %arg22[%c0_114, %c0_115] : memref<1x32xf32, #tpu.memory_space<vmem>>, vector<1x32xf32>
    %cst_116 = arith.constant dense<0.000000e+00> : vector<8xf32>
    %282 = vector.multi_reduction <add>, %279, %cst_116 [1] : vector<8x32xf32> to vector<8xf32>
    %283 = vector.shape_cast %282 : vector<8xf32> to vector<8x1xf32>
    %cst_117 = arith.constant 3.200000e+01 : f32
    %284 = vector.broadcast %cst_117 : f32 to vector<8x1xf32>
    %285 = arith.divf %283, %284 : vector<8x1xf32>
    %286 = vector.broadcast %285 : vector<8x1xf32> to vector<8x32xf32>
    %287 = arith.subf %279, %286 : vector<8x32xf32>
    %288 = arith.mulf %287, %287 : vector<8x32xf32>
    %cst_118 = arith.constant dense<0.000000e+00> : vector<8xf32>
    %289 = vector.multi_reduction <add>, %288, %cst_118 [1] : vector<8x32xf32> to vector<8xf32>
    %290 = vector.shape_cast %289 : vector<8xf32> to vector<8x1xf32>
    %cst_119 = arith.constant 3.200000e+01 : f32
    %291 = vector.broadcast %cst_119 : f32 to vector<8x1xf32>
    %292 = arith.divf %290, %291 : vector<8x1xf32>
    %293 = vector.broadcast %285 : vector<8x1xf32> to vector<8x32xf32>
    %294 = arith.subf %279, %293 : vector<8x32xf32>
    %cst_120 = arith.constant 9.99999996E-13 : f32
    %295 = vector.broadcast %cst_120 : f32 to vector<8x1xf32>
    %296 = arith.addf %292, %295 : vector<8x1xf32>
    %297 = math.rsqrt %296 : vector<8x1xf32>
    %298 = vector.broadcast %297 : vector<8x1xf32> to vector<8x32xf32>
    %299 = arith.mulf %294, %298 : vector<8x32xf32>
    %300 = vector.broadcast %280 : vector<1x32xf32> to vector<8x32xf32>
    %301 = arith.mulf %299, %300 : vector<8x32xf32>
    %302 = vector.broadcast %281 : vector<1x32xf32> to vector<8x32xf32>
    %303 = arith.addf %301, %302 : vector<8x32xf32>
    %c0_121 = arith.constant 0 : index
    %c0_122 = arith.constant 0 : index
    %c0_123 = arith.constant 0 : index
    %304 = vector.load %arg23[%c0_121, %c0_122, %c0_123] : memref<1x8x32xf32, #tpu.memory_space<vmem>>, vector<1x8x32xf32>
    %305 = vector.shape_cast %304 : vector<1x8x32xf32> to vector<8x32xf32>
    %306 = vector.shape_cast %303 : vector<8x32xf32> to vector<1x8x32xf32>
    tpu.vector_store %arg23[%c0_121, %c0_122, %c0_123], %306 {strides = array<i32>} : memref<1x8x32xf32, #tpu.memory_space<vmem>>, vector<1x8x32xf32>,
    return
  }
  func.func @transform_0(%arg0: i32) -> (i32, i32, i32) {
    %c0_i32 = arith.constant 0 : i32
    %c0_i32_0 = arith.constant 0 : i32
    %c0_i32_1 = arith.constant 0 : i32
    return %arg0, %c0_i32, %c0_i32_0 : i32, i32, i32
  }
  func.func @transform_1(%arg0: i32) -> (i32, i32, i32) {
    %c0_i32 = arith.constant 0 : i32
    %c0_i32_0 = arith.constant 0 : i32
    %c0_i32_1 = arith.constant 0 : i32
    return %arg0, %c0_i32, %c0_i32_0 : i32, i32, i32
  }
  func.func @transform_2(%arg0: i32) -> (i32, i32) {
    %c0_i32 = arith.constant 0 : i32
    %c0_i32_0 = arith.constant 0 : i32
    %c0_i32_1 = arith.constant 0 : i32
    return %c0_i32, %c0_i32_0 : i32, i32
  }
  func.func @transform_3(%arg0: i32) -> (i32, i32) {
    %c0_i32 = arith.constant 0 : i32
    %c0_i32_0 = arith.constant 0 : i32
    %c0_i32_1 = arith.constant 0 : i32
    return %c0_i32, %c0_i32_0 : i32, i32
  }
  func.func @transform_4(%arg0: i32) -> (i32, i32) {
    %c0_i32 = arith.constant 0 : i32
    %c0_i32_0 = arith.constant 0 : i32
    %c0_i32_1 = arith.constant 0 : i32
    return %c0_i32, %c0_i32_0 : i32, i32
  }
  func.func @transform_5(%arg0: i32) -> (i32, i32) {
    %c0_i32 = arith.constant 0 : i32
    %c0_i32_0 = arith.constant 0 : i32
    %c0_i32_1 = arith.constant 0 : i32
    return %c0_i32, %c0_i32_0 : i32, i32
  }
  func.func @transform_6(%arg0: i32) -> (i32, i32) {
    %c0_i32 = arith.constant 0 : i32
    %c0_i32_0 = arith.constant 0 : i32
    %c0_i32_1 = arith.constant 0 : i32
    return %c0_i32, %c0_i32_0 : i32, i32
  }
  func.func @transform_7(%arg0: i32) -> (i32, i32) {
    %c0_i32 = arith.constant 0 : i32
    %c0_i32_0 = arith.constant 0 : i32
    %c0_i32_1 = arith.constant 0 : i32
    return %c0_i32, %c0_i32_0 : i32, i32
  }
  func.func @transform_8(%arg0: i32) -> (i32, i32) {
    %c0_i32 = arith.constant 0 : i32
    %c0_i32_0 = arith.constant 0 : i32
    %c0_i32_1 = arith.constant 0 : i32
    return %c0_i32, %c0_i32_0 : i32, i32
  }
  func.func @transform_9(%arg0: i32) -> (i32, i32) {
    %c0_i32 = arith.constant 0 : i32
    %c0_i32_0 = arith.constant 0 : i32
    %c0_i32_1 = arith.constant 0 : i32
    return %c0_i32, %c0_i32_0 : i32, i32
  }
  func.func @transform_10(%arg0: i32) -> (i32, i32) {
    %c0_i32 = arith.constant 0 : i32
    %c0_i32_0 = arith.constant 0 : i32
    %c0_i32_1 = arith.constant 0 : i32
    return %c0_i32, %c0_i32_0 : i32, i32
  }
  func.func @transform_11(%arg0: i32) -> (i32, i32) {
    %c0_i32 = arith.constant 0 : i32
    %c0_i32_0 = arith.constant 0 : i32
    %c0_i32_1 = arith.constant 0 : i32
    return %c0_i32, %c0_i32_0 : i32, i32
  }
  func.func @transform_12(%arg0: i32) -> (i32, i32) {
    %c0_i32 = arith.constant 0 : i32
    %c0_i32_0 = arith.constant 0 : i32
    %c0_i32_1 = arith.constant 0 : i32
    return %c0_i32, %c0_i32_0 : i32, i32
  }
  func.func @transform_13(%arg0: i32) -> (i32, i32) {
    %c0_i32 = arith.constant 0 : i32
    %c0_i32_0 = arith.constant 0 : i32
    %c0_i32_1 = arith.constant 0 : i32
    return %c0_i32, %c0_i32_0 : i32, i32
  }
  func.func @transform_14(%arg0: i32) -> (i32, i32) {
    %c0_i32 = arith.constant 0 : i32
    %c0_i32_0 = arith.constant 0 : i32
    %c0_i32_1 = arith.constant 0 : i32
    return %c0_i32, %c0_i32_0 : i32, i32
  }
  func.func @transform_15(%arg0: i32) -> (i32, i32) {
    %c0_i32 = arith.constant 0 : i32
    %c0_i32_0 = arith.constant 0 : i32
    %c0_i32_1 = arith.constant 0 : i32
    return %c0_i32, %c0_i32_0 : i32, i32
  }
  func.func @transform_16(%arg0: i32) -> (i32, i32) {
    %c0_i32 = arith.constant 0 : i32
    %c0_i32_0 = arith.constant 0 : i32
    %c0_i32_1 = arith.constant 0 : i32
    return %c0_i32, %c0_i32_0 : i32, i32
  }
  func.func @transform_17(%arg0: i32) -> (i32, i32) {
    %c0_i32 = arith.constant 0 : i32
    %c0_i32_0 = arith.constant 0 : i32
    %c0_i32_1 = arith.constant 0 : i32
    return %c0_i32, %c0_i32_0 : i32, i32
  }
  func.func @transform_18(%arg0: i32) -> (i32, i32) {
    %c0_i32 = arith.constant 0 : i32
    %c0_i32_0 = arith.constant 0 : i32
    %c0_i32_1 = arith.constant 0 : i32
    return %c0_i32, %c0_i32_0 : i32, i32
  }
  func.func @transform_19(%arg0: i32) -> (i32, i32) {
    %c0_i32 = arith.constant 0 : i32
    %c0_i32_0 = arith.constant 0 : i32
    %c0_i32_1 = arith.constant 0 : i32
    return %c0_i32, %c0_i32_0 : i32, i32
  }
  func.func @transform_20(%arg0: i32) -> (i32, i32) {
    %c0_i32 = arith.constant 0 : i32
    %c0_i32_0 = arith.constant 0 : i32
    %c0_i32_1 = arith.constant 0 : i32
    return %c0_i32, %c0_i32_0 : i32, i32
  }
  func.func @transform_21(%arg0: i32) -> (i32, i32) {
    %c0_i32 = arith.constant 0 : i32
    %c0_i32_0 = arith.constant 0 : i32
    %c0_i32_1 = arith.constant 0 : i32
    return %c0_i32, %c0_i32_0 : i32, i32
  }
  func.func @transform_22(%arg0: i32) -> (i32, i32, i32) {
    %c0_i32 = arith.constant 0 : i32
    %c0_i32_0 = arith.constant 0 : i32
    %c0_i32_1 = arith.constant 0 : i32
    return %arg0, %c0_i32, %c0_i32_0 : i32, i32, i32
  }
}

module attributes {stable_mosaic.version = 11 : i64} {
  func.func @_outfc_kernel(%arg0: i32, %arg1: memref<1x8x32xf32, #tpu.memory_space<vmem>>, %arg2: memref<32x32xbf16, #tpu.memory_space<vmem>>, %arg3: memref<1x32xf32, #tpu.memory_space<vmem>>, %arg4: memref<1x8x32xf32, #tpu.memory_space<vmem>>) attributes {dimension_semantics = [#tpu.dimension_semantics<parallel>], iteration_bounds = array<i64: 2>, scalar_prefetch = 0 : i64, scratch_operands = 0 : i64, tpu.core_type = #tpu.core_type<tc>, window_params = [{transform_indices = @transform_0, window_bounds = array<i64: 1, 8, 32>}, {pipeline_mode = #tpu.pipeline_mode<synchronous>, transform_indices = @transform_1, window_bounds = array<i64: 32, 32>}, {pipeline_mode = #tpu.pipeline_mode<synchronous>, transform_indices = @transform_2, window_bounds = array<i64: 1, 32>}, {transform_indices = @transform_3, window_bounds = array<i64: 1, 8, 32>}]} {
    %c0 = arith.constant 0 : index
    %c0_0 = arith.constant 0 : index
    %c0_1 = arith.constant 0 : index
    %0 = vector.load %arg1[%c0, %c0_0, %c0_1] : memref<1x8x32xf32, #tpu.memory_space<vmem>>, vector<1x8x32xf32>
    %1 = vector.shape_cast %0 : vector<1x8x32xf32> to vector<8x32xf32>
    %c0_2 = arith.constant 0 : index
    %c0_3 = arith.constant 0 : index
    %2 = vector.load %arg2[%c0_2, %c0_3] : memref<32x32xbf16, #tpu.memory_space<vmem>>, vector<32x32xbf16>
    %c0_4 = arith.constant 0 : index
    %c0_5 = arith.constant 0 : index
    %3 = vector.load %arg3[%c0_4, %c0_5] : memref<1x32xf32, #tpu.memory_space<vmem>>, vector<1x32xf32>
    %4 = arith.truncf %1 : vector<8x32xf32> to vector<8x32xbf16>
    %cst = arith.constant dense<0.000000e+00> : vector<8x32xf32>
    %5 = tpu.matmul %4, %2, %cst {dimension_numbers = #tpu.dot_dimension_numbers<[1], [0], [0], [1], [0, 0, 1, 1], [], []>} : vector<8x32xbf16>, vector<32x32xbf16>, vector<8x32xf32> -> vector<8x32xf32>
    %6 = vector.broadcast %3 : vector<1x32xf32> to vector<8x32xf32>
    %7 = arith.addf %5, %6 : vector<8x32xf32>
    %c0_6 = arith.constant 0 : index
    %c0_7 = arith.constant 0 : index
    %c0_8 = arith.constant 0 : index
    %8 = vector.load %arg4[%c0_6, %c0_7, %c0_8] : memref<1x8x32xf32, #tpu.memory_space<vmem>>, vector<1x8x32xf32>
    %9 = vector.shape_cast %8 : vector<1x8x32xf32> to vector<8x32xf32>
    %10 = vector.shape_cast %7 : vector<8x32xf32> to vector<1x8x32xf32>
    tpu.vector_store %arg4[%c0_6, %c0_7, %c0_8], %10 {strides = array<i32>} : memref<1x8x32xf32, #tpu.memory_space<vmem>>, vector<1x8x32xf32>,
    return
  }
  func.func @transform_0(%arg0: i32) -> (i32, i32, i32) {
    %c0_i32 = arith.constant 0 : i32
    %c0_i32_0 = arith.constant 0 : i32
    %c0_i32_1 = arith.constant 0 : i32
    return %arg0, %c0_i32, %c0_i32_0 : i32, i32, i32
  }
  func.func @transform_1(%arg0: i32) -> (i32, i32) {
    %c0_i32 = arith.constant 0 : i32
    %c0_i32_0 = arith.constant 0 : i32
    %c0_i32_1 = arith.constant 0 : i32
    return %c0_i32, %c0_i32_0 : i32, i32
  }
  func.func @transform_2(%arg0: i32) -> (i32, i32) {
    %c0_i32 = arith.constant 0 : i32
    %c0_i32_0 = arith.constant 0 : i32
    %c0_i32_1 = arith.constant 0 : i32
    return %c0_i32, %c0_i32_0 : i32, i32
  }
  func.func @transform_3(%arg0: i32) -> (i32, i32, i32) {
    %c0_i32 = arith.constant 0 : i32
    %c0_i32_0 = arith.constant 0 : i32
    %c0_i32_1 = arith.constant 0 : i32
    return %arg0, %c0_i32, %c0_i32_0 : i32, i32, i32
  }
}

</mosaic_0001>

<bundles_post_ra>
// kernel: _lambda_.4
= control target key start
LH: loop header
LB: loop body
LE: loop exit
PB: predicated region body
PF: predicated region fallthrough
CT: control target
= control target key end

     0   :  { %14 = vsyncpa [#allocation3], 0  ;;  %s1035_s0 = inlined_call_operand.vmem [shape: f32[2,8,16], index: 0, kind: input, shape index: {}]   ;;  %s1036_s1 = inlined_call_operand.vmem [shape: f32[2,8,16], index: 1, kind: input, shape index: {}]   ;;  %s1037_s2 = inlined_call_operand.hbm [shape: bf16[16,32], index: 2, kind: input, shape index: {}]   ;;  %s1038_s3 = inlined_call_operand.hbm [shape: f32[1,32], index: 3, kind: input, shape index: {}]   ;;  %s1039_s4 = inlined_call_operand.hbm [shape: f32[1,8,32], index: 4, kind: input, shape index: {}]   ;;  %s1040_s5 = inlined_call_operand.hbm [shape: f32[1,32], index: 5, kind: input, shape index: {}]   ;;  %s1041_s6 = inlined_call_operand.hbm [shape: f32[1,32], index: 6, kind: input, shape index: {}]   ;;  %s1042_s7 = inlined_call_operand.vmem [shape: f32[2,8,32], index: 7, kind: output, shape index: {0}]   ;;  %s1043_s8 = inlined_call_operand.vmem [shape: f32[2,8,32], index: 8, kind: output, shape index: {1}]  }
   0x1   :  { %15 = vsyncpa [#allocation5], 0 }
   0x2   :  { %16 = vsyncpa [#allocation8], 0  ;;  %s946_s27 = smov 0  }
   0x3 LB: > { %s262_s30 = sshll.u32 %s1038_s3, 4  ;;  %s955_s9 = sadd.s32 4294967295, %s891_s27   ;;  %s891_s27 = sphi %s946_s27, %s22_s27   ;;  %s263_s30 = int_to_ptr.hbm [resolvable:$true] %s262_s30 }
   0x4   : > { %p629_p0 = scmp.ge.s32.totalorder %s891_s27, 1  ;;  %p236_p1 = scmp.lt.s32.totalorder %s891_s27, 3 }
   0x5   : > { %p690_p2 = scmp.eq.s32.totalorder %s955_s9, 0  ;;  %s893_s11 = smov [#allocation4]  }
   0x6   : > { %p960_p3 = pnand %p629_p0, %p236_p1  ;;  %s264_s12 = sshll.u32 %s893_s11, 4  ;;  %s265_s12 = int_to_ptr.vmem [resolvable:$true] %s264_s12 }
   0x7   : > { %s286_s15 = sshll.u32 %s1040_s5, 4  ;;  %s247_s18 = sshll.u32 %s1037_s2, 4  ;;  %s287_s15 = int_to_ptr.hbm [resolvable:$true] %s286_s15  ;;  %s248_s18 = int_to_ptr.hbm [resolvable:$true] %s247_s18 }
   0x8   : > { %p674_p4 = pneg %p960_p3  ;;  %s894_s20 = smov [#allocation7]  }
   0x9   : > { %s288_s21 = sshll.u32 %s894_s20, 4  ;;  %s895_s22 = smov [#allocation2]   ;;  %s289_s21 = int_to_ptr.vmem [resolvable:$true] %s288_s21 }
   0xa   : > { %p974_p5 = pnand %p690_p2, %p674_p4  ;;  %s249_s23 = sshll.u32 %s895_s22, 4  ;;  %s250_s23 = int_to_ptr.vmem [resolvable:$true] %s249_s23 }
   0xb   : > { %s896_s24 = smov 64   ;;  %s897_s25 = smov 4  }
   0xc   : > { %680 = dma.hbm_to_vmem [thread:$0]  (!%p974_p5), %s263_s30, 16, %s265_s12, [#allocation5]  }
   0xd   : > { %686 = dma.hbm_to_vmem [thread:$0]  (!%p974_p5), %s287_s15, 16, %s289_s21, [#allocation8]  }
   0xe   : > { %677 = dma.hbm_to_vmem [thread:$0]  (!%p974_p5), %s248_s18, 128, %s250_s23, [#allocation3], %s896_s24, %s896_s24, %s897_s25  }
   0xf   : > { %s274_s29 = sshll.u32 %s1039_s4, 4  ;;  %s898_s11 = smov [#allocation6]   ;;  %s275_s29 = int_to_ptr.hbm [resolvable:$true] %s274_s29 }
  0x10   : > { %s276_s13 = sshll.u32 %s898_s11, 4  ;;  %s298_s12 = sshll.u32 %s1041_s6, 4  ;;  %s277_s13 = int_to_ptr.vmem [resolvable:$true] %s276_s13  ;;  %s299_s12 = int_to_ptr.hbm [resolvable:$true] %s298_s12 }
  0x11   : > { %683 = dma.hbm_to_vmem [thread:$0]  (!%p974_p5), %s275_s29, 128, %s277_s13, [#allocation5]  }
  0x12   : > { %s899_s15 = smov [#allocation9]   ;;  %327 = sbr.rel (%p960_p3) target bundleno = 298 (0x12a), region = 48 }
  0x13   : > { %s300_s16 = sshll.u32 %s899_s15, 4  ;;  %s301_s16 = int_to_ptr.vmem [resolvable:$true] %s300_s16 }
  0x14   : > { %689 = dma.hbm_to_vmem [thread:$0]  (!%p974_p5), %s299_s12, 16, %s301_s16, [#allocation8]  }
  0x17   : > { %878 = dma.done.wait (%p690_p2), [#allocation3], 128  }
  0x18   : > { %880 = vsyncadd (%p690_p2), [#allocation3], 4294967168 }
  0x19   : > { %882 = dma.done.wait (%p690_p2), [#allocation5], 144  }
  0x1a   : > { %884 = vsyncadd (%p690_p2), [#allocation5], 4294967152 }
  0x1b   : > { %886 = dma.done.wait (%p690_p2), [#allocation8], 32  }
  0x1c   : > { %888 = vsyncadd (%p690_p2), [#allocation8], 4294967264  ;;  %vm438_vm0 = vcmask 261120   ;;  %v440_v0 = vld [vmem:[#allocation6] sm:$0xff]  ;;  %p388_p6 = scmp.lt.s32.totalorder %s955_s9, 1  ;;  %v900_v2 = vmov 32.0  }
  0x1d   : > { %v443_v1 = vsel %vm438_vm0, %v440_v0, 0.0  ;;  %719 = vrcp.f32 %v900_v2  ;;  %v653_v3 = vld [vmem:[#allocation2] sm:$0xff]  ;;  %vm421_vm1 = vcmask 130048   ;;  %v718_v20 = vld [vmem:[#allocation4] ss:$0 sm:$0xff] }
  0x1e   : > { %444 = vadd.xlane.f32.xlu0 %v443_v1  ;;  %s1047_s9 = smov (!%p388_p6, %s955_s9), 1  ;;  %432 = vmatpush.bf16.msra.mxu0 %v653_v3  ;;  %v716_v32 = vld [vmem:[#allocation7] ss:$0 sm:$0xff]  ;;  %v717_v34 = vld [vmem:[#allocation9] ss:$0 sm:$0xff] }
  0x1f   : > { %s1011_s10 = sshll.u32 %s1047_s9, 3 }
  0x20   : > { %s391_s19 = scalar_lea.vmem %s1035_s0, %s1011_s10  ;;  %s395_s22 = scalar_lea.vmem %s1036_s1, %s1011_s10 }
  0x21   : > { %v405_v4 = vld [vmem:[%s391_s19] sm:$0xff]  ;;  %s399_s24 = scalar_lea.vmem %s1042_s7, %s1011_s10  ;;  %s403_s28 = scalar_lea.vmem %s1043_s8, %s1011_s10 }
  0x22   : > { %v406_v5 = vld [vmem:[%s395_s22] sm:$0xff] }
  0x23   : > { %v407_v6 = vadd.f32 %v406_v5, %v405_v4  ;;  %v720_v8 = vpop.eup %719 }
  0x24   : > { %v447_v9 = vmul.f32 32.0, %v720_v8  ;;  %vm451_vm2 = vweird.f32 %v720_v8 }
  0x25   : > { %v411_v7 = vpack.c.bf16 %v407_v6, %v407_v6 }
  0x26   : > { %v448_v10 = vsub.f32 1.0, %v447_v9 }
  0x27   : > { %650 = vmatmul.msk.bf16.vlgmr.msra.gmra.mxu0 %vm421_vm1, %v411_v7 }
  0x28   : > { %v449_v11 = vmul.f32 %v720_v8, %v448_v10 }
  0x2a   : > { %v450_v12 = vadd.f32 %v720_v8, %v449_v11 }
  0x2c   : > { %v452_v13 = vsel %vm451_vm2, %v720_v8, %v450_v12 }
  0x91   : > { %v445_v14 = vpop.xlane.xlu0 %444 }
  0x92   : > { %v453_v15 = vmul.f32 %v452_v13, %v445_v14 }
  0x94   : > { %v454_v16 = vsub.f32 %v440_v0, %v453_v15 }
  0x96   : > { %v455_v17 = vmul.f32 %v454_v16, %v454_v16 }
  0x98   : > { %v456_v18 = vsel %vm438_vm0, %v455_v17, 0.0 }
  0x99   : > { %457 = vadd.xlane.f32.xlu0 %v456_v18 }
  0xa4   : > { %v434_v19 = vpop.f32.mrf.mxu0 }
  0xa5   : > { %v435_v22 = vadd.f32 %v718_v20, %v434_v19 }
  0xa7   : > { %439 = vst.msk [vmem:[%s399_s24] sm:$0xff] %vm438_vm0, %v435_v22 }
  0xac   : > { %v436_v21 = vpop.f32.mrf.mxu0 }
 0x10c   : > { %v458_v23 = vpop.xlane.xlu0 %457 }
 0x10d   : > { %v459_v24 = vmul.f32 %v458_v23, %v452_v13 }
 0x10f   : > { %v460_v25 = vadd.f32 1e-12, %v459_v24 }
 0x111   : > { %721 = vrsqrt.f32 %v460_v25  ;;  %vm467_vm4 = vweird.f32 %v460_v25 }
 0x117   : > { %v722_v26 = vpop.eup %721 }
 0x118   : > { %v462_v27 = vmul.f32 %v722_v26, %v460_v25  ;;  %vm468_vm3 = vweird.f32 %v722_v26 }
 0x119   : > { %vm469_vm5 = vmor %vm467_vm4, %vm468_vm3 }
 0x11a   : > { %v463_v28 = vmul.f32 %v722_v26, %v462_v27 }
 0x11c   : > { %v464_v29 = vmul.f32 0.5, %v463_v28 }
 0x11e   : > { %v465_v30 = vsub.f32 1.5, %v464_v29 }
 0x120   : > { %v466_v31 = vmul.f32 %v722_v26, %v465_v30 }
 0x122   : > { %v470_v33 = vsel %vm469_vm5, %v722_v26, %v466_v31 }
 0x123   : > { %v471_v35 = vmul.f32 %v470_v33, %v454_v16 }
 0x125   : > { %v475_v36 = vmul.f32 %v716_v32, %v471_v35 }
 0x127   : > { %v479_v37 = vadd.f32 %v717_v34, %v475_v36 }
 0x129   : > { %480 = vst.msk [vmem:[%s403_s28] sm:$0xff] %vm438_vm0, %v479_v37 }
 0x12a PF: > { %s22_s27 = sadd.s32 1, %s891_s27  }
 0x12b   : > { %p19_p7 = scmp.ge.s32.totalorder %s22_s27, 4  }
 0x12d   :  { %21 = sbr.rel (!%p19_p7) target bundleno = 3 (0x3), region = 114 }
 0x132   :  { %514 = vsyncpa [#allocation3], 1 }
 0x133   :  { %516 = vsyncpa [#allocation3 + $0x1], 1 }
 0x134   :  { %517 = vsyncpa [#allocation5], 1 }
 0x135   :  { %518 = vsyncpa [#allocation8], 1 }

// kernel: _lambda_.7
= control target key start
LH: loop header
LB: loop body
LE: loop exit
PB: predicated region body
PF: predicated region fallthrough
CT: control target
= control target key end

     0   :  { %8 = vsyncpa [#allocation3], 0  ;;  %s690_s0 = inlined_call_operand.vmem [shape: f32[2,8,32], index: 0, kind: input, shape index: {}]   ;;  %s691_s1 = inlined_call_operand.hbm [shape: bf16[32,32], index: 1, kind: input, shape index: {}]   ;;  %s692_s2 = inlined_call_operand.hbm [shape: f32[1,32], index: 2, kind: input, shape index: {}]   ;;  %s693_s3 = inlined_call_operand.hbm [shape: f32[2,8,32], index: 3, kind: output, shape index: {}]  }
   0x1   :  { %9 = vsyncpa [#allocation6], 0 }
   0x2   :  { %10 = vsyncpa [#allocation4], 0 }
   0x3   :  { %12 = vsyncpa [#allocation4 + $0x1], 0  ;;  %s580_s12 = smov 0   ;;  %s582_s13 = smov 0  }
   0x4   :  { %s584_s14 = smov 0   ;;  %s586_s15 = smov 0  }
   0x5 LB: > { %s601_s16 = sadd.s32 4294967295, %s554_s15   ;;  %s336_s17 = sadd.s32 4294967294, %s554_s15   ;;  %s554_s15 = sphi %s586_s15, %s700_s15   ;;  %s550_s14 = sphi %s584_s14, %s699_s14   ;;  %s546_s13 = sphi %s582_s13, %s698_s13   ;;  %s542_s12 = sphi %s580_s12, %s697_s12  }
   0x6   : > { %s605_s18 = sadd.s32 1, %s554_s15   ;;  %s93_s19 = sadd.s32 1, %s550_s14 }
   0x7   : > { %s90_s20 = ssub.s32 %s554_s15, %s605_s18  ;;  %p103_p0 = scmp.ne.s32.totalorder %s550_s14, %s546_s13 }
   0x8   : > { %p91_p1 = scmp.eq.s32.totalorder %s90_s20, 0  ;;  %p104_p2 = scmp.eq.s32.totalorder %s601_s16, 1 }
   0x9   : > { %p109_p3 = scmp.ne.s32.totalorder %s546_s13, %s542_s12  ;;  %p110_p4 = scmp.eq.s32.totalorder %s336_s17, 1 }
   0xa   : > { %s616_s21 = scalar_select %p91_p1, %s550_s14, %s93_s19  }
   0xb   : > { %p618_p5 = por %p104_p2, %p103_p0  ;;  %p622_p6 = por %p110_p4, %p109_p3 }
   0xc   : > { %p337_p7 = scmp.ge.s32.totalorder %s554_s15, 1  ;;  %p117_p8 = scmp.lt.s32.totalorder %s554_s15, 3 }
   0xd   : > { %p382_p9 = scmp.eq.s32.totalorder %s601_s16, 0  ;;  %s128_s27 = sshll.u32 %s691_s1, 4  ;;  %s129_s27 = int_to_ptr.hbm [resolvable:$true] %s128_s27 }
   0xe   : > { %p629_p10 = pnand %p337_p7, %p117_p8  ;;  %s556_s28 = smov [#allocation2]  }
   0xf   : > { %s130_s29 = sshll.u32 %s556_s28, 4  ;;  %s143_s5 = sshll.u32 %s692_s2, 4  ;;  %s131_s29 = int_to_ptr.vmem [resolvable:$true] %s130_s29  ;;  %s144_s5 = int_to_ptr.hbm [resolvable:$true] %s143_s5 }
  0x10   : > { %p371_p11 = pneg %p629_p10  ;;  %s557_s6 = smov 64  }
  0x11   : > { %s558_s7 = smov 4   ;;  %s559_s8 = smov [#allocation5]  }
  0x12   : > { %p372_p12 = pnand %p382_p9, %p371_p11  ;;  %s145_s9 = sshll.u32 %s559_s8, 4  ;;  %s146_s9 = int_to_ptr.vmem [resolvable:$true] %s145_s9 }
  0x13   : > { %165 = sbr.rel (%p629_p10) target bundleno = 170 (0xaa), region = 32 }
  0x14   : > { %374 = dma.hbm_to_vmem [thread:$0]  (!%p372_p12), %s129_s27, 256, %s131_s29, [#allocation3], %s557_s6, %s557_s6, %s558_s7  }
  0x15   : > { %377 = dma.hbm_to_vmem [thread:$0]  (!%p372_p12), %s144_s5, 16, %s146_s9, [#allocation6]  }
  0x18   : > { %529 = dma.done.wait (%p382_p9), [#allocation3], 256  }
  0x19   : > { %531 = vsyncadd (%p382_p9), [#allocation3], 4294967040 }
  0x1a   : > { %533 = dma.done.wait (%p382_p9), [#allocation6], 16  }
  0x1b   : > { %535 = vsyncadd (%p382_p9), [#allocation6], 4294967280  ;;  %p194_p13 = scmp.lt.s32.totalorder %s601_s16, 1  ;;  %v360_v0 = vld [vmem:[#allocation2 + $0x8] sm:$0xff]  ;;  %v359_v1 = vld [vmem:[#allocation2] sm:$0xff]  ;;  %vm221_vm0 = vcmask 261120  }
  0x1c   : > { %231 = vmatpush.bf16.msra.mxu0 %v360_v0  ;;  %s191_s24 = sand.u32 1, %s546_s13   ;;  %s356_s25 = sshll.u32 %s601_s16, 3  ;;  %v423_v4 = vld [vmem:[#allocation5] ss:$0 sm:$0xff] }
  0x1d   : > { %s195_s10 = scalar_select %p194_p13, %s601_s16, 1 }
  0x1e   : > { %s344_s26 = sshll.u32 %s191_s24, 3  ;;  %s250_s29 = scalar_lea.hbm %s693_s3, %s356_s25 }
  0x1f   : > { %s345_s11 = sshll.u32 %s195_s10, 3  ;;  %s193_s30 = scalar_lea.vmem [#allocation7], %s344_s26 }
  0x20   : > { %s197_s20 = scalar_lea.vmem %s690_s0, %s345_s11  ;;  %232 = vmatpush.bf16.msra.mxu0 %v359_v1  ;;  %s252_s4 = sshll.u32 %s193_s30, 4  ;;  %s253_s4 = int_to_ptr.vmem [resolvable:$true] %s252_s4 }
  0x21   : > { %v199_v2 = vld [vmem:[%s197_s20] sm:$0xff]  ;;  %s254_s5 = sshll.u32 %s250_s29, 4  ;;  %s240_s6 = scalar_lea.sflag [#allocation4], %s191_s24  ;;  %s255_s5 = int_to_ptr.hbm [resolvable:$true] %s254_s5 }
  0x22   : > { %v205_v3 = vpack.c.bf16 %v199_v2, %v199_v2  ;;  %s498_s7 = sshra.s32 %s255_s5, 4  ;;  %s504_s10 = scalar_lea.hbm %s693_s3, 16  ;;  %s499_s7 = int_to_ptr.hbm [resolvable:$true] %s498_s7 }
  0x23   : > { %s500_s8 = scalar_lea.hbm %s499_s7, 8  ;;  %p505_p3 = scmp.lt.s32.totalorder %s499_s7, %s693_s3 }
  0x24   : > { %354 = vmatmul.msk.bf16.vlgmr.msra.gmra.mxu0 %vm221_vm0, %v205_v3  ;;  %p501_p0 = scmp.ne.s32.totalorder %s499_s7, %s500_s8  ;;  %p506_p4 = scmp.lt.s32.totalorder %s504_s10, %s500_s8 }
  0x26   : > { %p502_p1 = pnand %p501_p0, %p618_p5  ;;  %p507_p7 = por %p506_p4, %p505_p3 }
  0x28   : > { %p503_p2 = pneg %p502_p1 }
  0x2a   : > { %p508_p8 = pnand %p507_p7, %p503_p2 }
  0xa1   : > { %v234_v5 = vpop.f32.mrf.mxu0 }
  0xa2   : > { %v235_v6 = vadd.f32 %v423_v4, %v234_v5 }
  0xa4   : > { %238 = vst.msk [vmem:[%s193_s30] sm:$0xff] %vm221_vm0, %v235_v6 }
  0xa5   : > { %511 = shalt.err (!%p508_p8)
}
  0xa6   : > { %369 = dma.vmem_to_hbm [thread:$0]  (%p618_p5), %s253_s4, 128, %s255_s5, %s240_s6  }
  0xa9   : > { %v236_v7 = vpop.f32.mrf.mxu0 }
  0xaa PF: > { %p386_p9 = scmp.ge.s32.totalorder %s554_s15, 2  ;;  %s266_s19 = sand.u32 1, %s542_s12  }
  0xab   : > { %s267_s20 = scalar_lea.sflag [#allocation4], %s266_s19 }
  0xac   : > { %p379_p10 = pnand %p386_p9, %p622_p6 }
  0xae   : > { %p380_p11 = pneg %p379_p10 }
  0xb0   : > { %537 = dma.done.wait (%p380_p11), %s267_s20, 128  }
  0xb1   : > { %539 = vsyncadd (%p380_p11), %s267_s20, 4294967168  ;;  %p15_p12 = scmp.ge.s32.totalorder %s605_s18, 4   ;;  %s697_s12 = smov %s546_s13 }
  0xb2   : > { %s698_s13 = smov %s550_s14  ;;  %s699_s14 = smov %s616_s21 }
  0xb3   : > { %s700_s15 = smov %s605_s18  ;;  %17 = sbr.rel (!%p15_p12) target bundleno = 5 (0x5), region = 76 }
  0xb8   :  { %273 = vsyncpa [#allocation3], 1 }
  0xb9   :  { %275 = vsyncpa [#allocation3 + $0x1], 1 }
  0xba   :  { %276 = vsyncpa [#allocation6], 1 }
  0xbb   :  { %277 = vsyncpa [#allocation4], 1 }
  0xbc   :  { %279 = vsyncpa [#allocation4 + $0x1], 1 }

// kernel: _lambda_.6
= control target key start
LH: loop header
LB: loop body
LE: loop exit
PB: predicated region body
PF: predicated region fallthrough
CT: control target
= control target key end

     0   :  { %s3522_s0 = inlined_call_operand.vmem [shape: f32[2,8,32], index: 0, kind: input, shape index: {}]   ;;  %s3523_s1 = inlined_call_operand.vmem [shape: f32[2,8,32], index: 1, kind: input, shape index: {}]   ;;  %s3524_s2 = inlined_call_operand.vmem [shape: bf16[32,96], index: 2, kind: input, shape index: {}]   ;;  %s3525_s3 = inlined_call_operand.hbm [shape: f32[1,96], index: 3, kind: input, shape index: {}]   ;;  %s3526_s4 = inlined_call_operand.vmem [shape: bf16[32,32], index: 4, kind: input, shape index: {}]   ;;  %s3527_s5 = inlined_call_operand.hbm [shape: f32[1,32], index: 5, kind: input, shape index: {}]   ;;  %s3528_s6 = inlined_call_operand.hbm [shape: f32[1,32], index: 6, kind: input, shape index: {}]   ;;  %s3529_s7 = inlined_call_operand.hbm [shape: f32[1,32], index: 7, kind: input, shape index: {}]   ;;  %s3530_s8 = inlined_call_operand.vmem [shape: bf16[32,32], index: 8, kind: input, shape index: {}]   ;;  %s3531_s9 = inlined_call_operand.hbm [shape: f32[1,32], index: 9, kind: input, shape index: {}]   ;;  %s3532_s10 = inlined_call_operand.hbm [shape: bf16[32,64], index: 10, kind: input, shape index: {}]   ;;  %s3533_s11 = inlined_call_operand.hbm [shape: f32[1,64], index: 11, kind: input, shape index: {}]   ;;  %s3534_s12 = inlined_call_operand.hbm [shape: bf16[32,32], index: 12, kind: input, shape index: {}]   ;;  %s3535_s13 = inlined_call_operand.hbm [shape: f32[1,32], index: 13, kind: input, shape index: {}]   ;;  %s3536_s14 = inlined_call_operand.hbm [shape: f32[1,32], index: 14, kind: input, shape index: {}]   ;;  %s3537_s15 = inlined_call_operand.hbm [shape: f32[1,32], index: 15, kind: input, shape index: {}]   ;;  %s3538_s16 = inlined_call_operand.hbm [shape: bf16[32,64], index: 16, kind: input, shape index: {}]   ;;  %s3539_s17 = inlined_call_operand.hbm [shape: f32[1,64], index: 17, kind: input, shape index: {}]   ;;  %s3540_s18 = inlined_call_operand.vmem [shape: bf16[64,32], index: 18, kind: input, shape index: {}]   ;;  %s3541_s19 = inlined_call_operand.hbm [shape: f32[1,32], index: 19, kind: input, shape index: {}]   ;;  %s3542_s20 = inlined_call_operand.hbm [shape: f32[1,32], index: 20, kind: input, shape index: {}]   ;;  %s3543_s21 = inlined_call_operand.hbm [shape: f32[1,32], index: 21, kind: input, shape index: {}]   ;;  %s3544_s22 = inlined_call_operand.vmem [shape: f32[2,8,32], index: 22, kind: output, shape index: {}]  }
   0x1   :  { %3548 = sst [smem:[#allocation37_spill]] %s3522_s0 }
   0x2   :  { %3549 = sst [smem:[#allocation38_spill]] %s3523_s1 }
   0x3   :  { %3550 = sst [smem:[#allocation39_spill]] %s3524_s2 }
   0x4   :  { %3551 = sst [smem:[#allocation40_spill]] %s3525_s3 }
   0x5   :  { %3552 = sst [smem:[#allocation41_spill]] %s3526_s4 }
   0x6   :  { %3553 = sst [smem:[#allocation42_spill]] %s3527_s5 }
   0x7   :  { %3554 = sst [smem:[#allocation43_spill]] %s3528_s6 }
   0x8   :  { %3555 = sst [smem:[#allocation44_spill]] %s3529_s7 }
   0x9   :  { %3556 = sst [smem:[#allocation45_spill]] %s3532_s10 }
   0xa   :  { %3557 = sst [smem:[#allocation46_spill]] %s3534_s12 }
   0xb   :  { %3558 = sst [smem:[#allocation47_spill]] %s3536_s14 }
   0xc   :  { %3559 = sst [smem:[#allocation48_spill]] %s3544_s22 }
   0xd   :  { %27 = vsyncpa [#allocation3], 0 }
   0xe   :  { %28 = vsyncpa [#allocation5], 0 }
   0xf   :  { %29 = vsyncpa [#allocation8], 0 }
  0x10   :  { %30 = vsyncpa [#allocation11], 0 }
  0x11   :  { %31 = vsyncpa [#allocation14], 0 }
  0x12   :  { %32 = vsyncpa [#allocation17], 0 }
  0x13   :  { %33 = vsyncpa [#allocation20], 0 }
  0x14   :  { %34 = vsyncpa [#allocation23], 0 }
  0x15   :  { %35 = vsyncpa [#allocation26], 0  ;;  %s3208_s3 = smov 0  }
  0x16 LB: > { %3560 = sst [smem:[#allocation36_spill]] %s3058_s3  ;;  %s3217_s0 = sadd.s32 4294967295, %s3058_s3   ;;  %s3058_s3 = sphi %s3208_s3, %s41_s3  }
  0x17   : > { %s3561_s30 = sld [smem:[#allocation42_spill]]  ;;  %p2142_p0 = scmp.ge.s32.totalorder %s3058_s3, 1 }
  0x18   : > { %p544_p1 = scmp.lt.s32.totalorder %s3058_s3, 3  ;;  %p2406_p2 = scmp.eq.s32.totalorder %s3217_s0, 0 }
  0x19   : > { %s3060_s1 = smov [#allocation4]   ;;  %s3563_s7 = sld [smem:[#allocation44_spill]] }
  0x1a   : > { %p3222_p3 = pnand %p2142_p0, %p544_p1  ;;  %s576_s5 = sshll.u32 %s3060_s1, 4  ;;  %s577_s5 = int_to_ptr.vmem [resolvable:$true] %s576_s5 }
  0x1b   : > { %s3564_s10 = sld [smem:[#allocation45_spill]]  ;;  %s3061_s29 = smov [#allocation7]  }
  0x1c   : > { %p2357_p4 = pneg %p3222_p3  ;;  %s3062_s1 = smov [#allocation10]  }
  0x1d   : > { %s574_s4 = sshll.u32 %s3561_s30, 4  ;;  %s600_s30 = sshll.u32 %s3061_s29, 4  ;;  %s575_s4 = int_to_ptr.hbm [resolvable:$true] %s574_s4  ;;  %s601_s30 = int_to_ptr.vmem [resolvable:$true] %s600_s30 }
  0x1e   : > { %p3236_p5 = pnand %p2406_p2, %p2357_p4  ;;  %s626_s24 = sshll.u32 %s3062_s1, 4  ;;  %s627_s24 = int_to_ptr.vmem [resolvable:$true] %s626_s24 }
  0x1f   : > { %s598_s25 = sshll.u32 %s3563_s7, 4  ;;  %s3063_s6 = smov 64   ;;  %s599_s25 = int_to_ptr.hbm [resolvable:$true] %s598_s25 }
  0x20   : > { %2363 = dma.hbm_to_vmem [thread:$0]  (!%p3236_p5), %s575_s4, 16, %s577_s5, [#allocation5]  }
  0x21   : > { %s624_s27 = sshll.u32 %s3564_s10, 4  ;;  %s3064_s26 = smov 4   ;;  %s625_s27 = int_to_ptr.hbm [resolvable:$true] %s624_s27 }
  0x22   : > { %2369 = dma.hbm_to_vmem [thread:$0]  (!%p3236_p5), %s599_s25, 16, %s601_s30, [#allocation8]  }
  0x23   : > { %2375 = dma.hbm_to_vmem [thread:$0]  (!%p3236_p5), %s625_s27, 256, %s627_s24, [#allocation11], %s3063_s6, %s3063_s6, %s3064_s26  }
  0x24   : > { %s3566_s12 = sld [smem:[#allocation46_spill]]  ;;  %s3065_s29 = smov [#allocation13]  }
  0x25   : > { %s652_s3 = sshll.u32 %s3065_s29, 4  ;;  %s3567_s14 = sld [smem:[#allocation47_spill]]  ;;  %s653_s3 = int_to_ptr.vmem [resolvable:$true] %s652_s3 }
  0x26   : > { %s3066_s30 = smov [#allocation16]   ;;  %s700_s7 = sshll.u32 %s3538_s16, 4  ;;  %s701_s7 = int_to_ptr.hbm [resolvable:$true] %s700_s7 }
  0x27   : > { %s679_s1 = sshll.u32 %s3066_s30, 4  ;;  %s730_s29 = sshll.u32 %s3541_s19, 4  ;;  %s680_s1 = int_to_ptr.vmem [resolvable:$true] %s679_s1  ;;  %s731_s29 = int_to_ptr.hbm [resolvable:$true] %s730_s29 }
  0x28   : > { %s3067_s4 = smov [#allocation19]   ;;  %s3568_s27 = sld [smem:[#allocation40_spill]] }
  0x29   : > { %s702_s5 = sshll.u32 %s3067_s4, 4  ;;  %s3569_s24 = sld [smem:[#allocation43_spill]]  ;;  %s703_s5 = int_to_ptr.vmem [resolvable:$true] %s702_s5 }
  0x2a   : > { %s650_s10 = sshll.u32 %s3566_s12, 4  ;;  %s3069_s4 = smov [#allocation2]   ;;  %s651_s10 = int_to_ptr.hbm [resolvable:$true] %s650_s10 }
  0x2b   : > { %s677_s25 = sshll.u32 %s3567_s14, 4  ;;  %s561_s14 = sshll.u32 %s3069_s4, 4  ;;  %s678_s25 = int_to_ptr.hbm [resolvable:$true] %s677_s25  ;;  %s562_s14 = int_to_ptr.vmem [resolvable:$true] %s561_s14 }
  0x2c   : > { %2381 = dma.hbm_to_vmem [thread:$0]  (!%p3236_p5), %s651_s10, 256, %s653_s3, [#allocation14], %s3063_s6, %s3063_s6, %s3064_s26  }
  0x2d   : > { %2387 = dma.hbm_to_vmem [thread:$0]  (!%p3236_p5), %s678_s25, 16, %s680_s1, [#allocation17]  }
  0x2e   : > { %2393 = dma.hbm_to_vmem [thread:$0]  (!%p3236_p5), %s701_s7, 256, %s703_s5, [#allocation20], %s3063_s6, %s3063_s6, %s3064_s26  }
  0x2f   : > { %s3068_s10 = smov [#allocation22]   ;;  %s559_s12 = sshll.u32 %s3568_s27, 4  ;;  %s560_s12 = int_to_ptr.hbm [resolvable:$true] %s559_s12 }
  0x30   : > { %s732_s3 = sshll.u32 %s3068_s10, 4  ;;  %s586_s2 = sshll.u32 %s3569_s24, 4  ;;  %s733_s3 = int_to_ptr.vmem [resolvable:$true] %s732_s3  ;;  %s587_s2 = int_to_ptr.hbm [resolvable:$true] %s586_s2 }
  0x31   : > { %2399 = dma.hbm_to_vmem [thread:$0]  (!%p3236_p5), %s731_s29, 16, %s733_s3, [#allocation23]  }
  0x32   : > { %2360 = dma.hbm_to_vmem [thread:$0]  (!%p3236_p5), %s560_s12, 16, %s562_s14, [#allocation3]  }
  0x33   : > { %s3070_s6 = smov [#allocation6]   ;;  %s613_s10 = sshll.u32 %s3531_s9, 4  ;;  %s614_s10 = int_to_ptr.hbm [resolvable:$true] %s613_s10 }
  0x34   : > { %s588_s26 = sshll.u32 %s3070_s6, 4  ;;  %s639_s22 = sshll.u32 %s3533_s11, 4  ;;  %s589_s26 = int_to_ptr.vmem [resolvable:$true] %s588_s26  ;;  %s640_s22 = int_to_ptr.hbm [resolvable:$true] %s639_s22 }
  0x35   : > { %2366 = dma.hbm_to_vmem [thread:$0]  (!%p3236_p5), %s587_s2, 16, %s589_s26, [#allocation5]  }
  0x36   : > { %s3071_s30 = smov [#allocation9]   ;;  %s3072_s12 = smov [#allocation12]  }
  0x37   : > { %s615_s27 = sshll.u32 %s3071_s30, 4  ;;  %s641_s14 = sshll.u32 %s3072_s12, 4  ;;  %s616_s27 = int_to_ptr.vmem [resolvable:$true] %s615_s27  ;;  %s642_s14 = int_to_ptr.vmem [resolvable:$true] %s641_s14 }
  0x38   : > { %2372 = dma.hbm_to_vmem [thread:$0]  (!%p3236_p5), %s614_s10, 16, %s616_s27, [#allocation8]  }
  0x39   : > { %s665_s24 = sshll.u32 %s3535_s13, 4  ;;  %s689_s6 = sshll.u32 %s3537_s15, 4  ;;  %s666_s24 = int_to_ptr.hbm [resolvable:$true] %s665_s24  ;;  %s690_s6 = int_to_ptr.hbm [resolvable:$true] %s689_s6 }
  0x3a   : > { %2378 = dma.hbm_to_vmem [thread:$0]  (!%p3236_p5), %s640_s22, 16, %s642_s14, [#allocation11]  }
  0x3b   : > { %s3073_s26 = smov [#allocation15]   ;;  %s3074_s5 = smov [#allocation18]  }
  0x3c   : > { %s667_s7 = sshll.u32 %s3073_s26, 4  ;;  %s691_s10 = sshll.u32 %s3074_s5, 4  ;;  %s668_s7 = int_to_ptr.vmem [resolvable:$true] %s667_s7  ;;  %s692_s10 = int_to_ptr.vmem [resolvable:$true] %s691_s10 }
  0x3d   : > { %2384 = dma.hbm_to_vmem [thread:$0]  (!%p3236_p5), %s666_s24, 16, %s668_s7, [#allocation14]  }
  0x3e   : > { %s715_s30 = sshll.u32 %s3539_s17, 4  ;;  %s742_s12 = sshll.u32 %s3542_s20, 4  ;;  %s716_s30 = int_to_ptr.hbm [resolvable:$true] %s715_s30  ;;  %s743_s12 = int_to_ptr.hbm [resolvable:$true] %s742_s12 }
  0x3f   : > { %2390 = dma.hbm_to_vmem [thread:$0]  (!%p3236_p5), %s690_s6, 16, %s692_s10, [#allocation17]  }
  0x40   : > { %s3075_s14 = smov [#allocation21]   ;;  %s3076_s1 = smov [#allocation24]  }
  0x41   : > { %s717_s25 = sshll.u32 %s3075_s14, 4  ;;  %s744_s24 = sshll.u32 %s3076_s1, 4  ;;  %s718_s25 = int_to_ptr.vmem [resolvable:$true] %s717_s25  ;;  %s745_s24 = int_to_ptr.vmem [resolvable:$true] %s744_s24 }
  0x42   : > { %2396 = dma.hbm_to_vmem [thread:$0]  (!%p3236_p5), %s716_s30, 16, %s718_s25, [#allocation20]  }
  0x43   : > { %s754_s26 = sshll.u32 %s3543_s21, 4  ;;  %s3077_s6 = smov [#allocation25]   ;;  %s755_s26 = int_to_ptr.hbm [resolvable:$true] %s754_s26 }
  0x44   : > { %2402 = dma.hbm_to_vmem [thread:$0]  (!%p3236_p5), %s743_s12, 16, %s745_s24, [#allocation23]  }
  0x45   : > { %s756_s7 = sshll.u32 %s3077_s6, 4  ;;  %783 = sbr.rel (%p3222_p3) target bundleno = 3696 (0xe70), region = 108  ;;  %s757_s7 = int_to_ptr.vmem [resolvable:$true] %s756_s7 }
  0x46   : > { %2405 = dma.hbm_to_vmem [thread:$0]  (!%p3236_p5), %s755_s26, 16, %s757_s7, [#allocation26]  }
  0x4a   : > { %3021 = dma.done.wait (%p2406_p2), [#allocation3], 16  }
  0x4b   : > { %3023 = vsyncadd (%p2406_p2), [#allocation3], 4294967280 }
  0x4c   : > { %3025 = dma.done.wait (%p2406_p2), [#allocation5], 32  }
  0x4d   : > { %3027 = vsyncadd (%p2406_p2), [#allocation5], 4294967264 }
  0x4e   : > { %3029 = dma.done.wait (%p2406_p2), [#allocation8], 32  }
  0x4f   : > { %3031 = vsyncadd (%p2406_p2), [#allocation8], 4294967264 }
  0x50   : > { %3033 = dma.done.wait (%p2406_p2), [#allocation11], 272  }
  0x51   : > { %3035 = vsyncadd (%p2406_p2), [#allocation11], 4294967024 }
  0x52   : > { %3037 = dma.done.wait (%p2406_p2), [#allocation14], 272  }
  0x53   : > { %3039 = vsyncadd (%p2406_p2), [#allocation14], 4294967024 }
  0x54   : > { %3041 = dma.done.wait (%p2406_p2), [#allocation17], 32  }
  0x55   : > { %3043 = vsyncadd (%p2406_p2), [#allocation17], 4294967264 }
  0x56   : > { %3045 = dma.done.wait (%p2406_p2), [#allocation20], 272  }
  0x57   : > { %3047 = vsyncadd (%p2406_p2), [#allocation20], 4294967024 }
  0x58   : > { %3049 = dma.done.wait (%p2406_p2), [#allocation23], 32  }
  0x59   : > { %3051 = vsyncadd (%p2406_p2), [#allocation23], 4294967264 }
  0x5a   : > { %3053 = dma.done.wait (%p2406_p2), [#allocation26], 16  }
  0x5b   : > { %3055 = vsyncadd (%p2406_p2), [#allocation26], 4294967280  ;;  %p923_p6 = scmp.lt.s32.totalorder %s3217_s0, 1  ;;  %s3570_s10 = sld [smem:[#allocation37_spill]]  ;;  %vm959_vm0 = vcmask 261120   ;;  %vm979_vm1 = vcmask 64512  }
  0x5c   : > { %s3571_s22 = sld [smem:[#allocation39_spill]]  ;;  %v2479_v4 = vld [vmem:[#allocation2] ss:$0 sm:$0xff]  ;;  %s3079_s14 = smov 120   ;;  %vm1253_vm2 = vcmask 130048   ;;  %vm1255_vm3 = vcmask 195584  }
  0x5d   : > { %s3577_s0 = smov (!%p923_p6, %s3217_s0), 1  ;;  %s3080_s25 = smov 96  }
  0x5e   : > { %s3351_s23 = sshll.u32 %s3577_s0, 3  ;;  %s3078_s0 = smov 64  }
  0x5f   : > { %s3081_s1 = smov 56   ;;  %s3082_s24 = smov 88  }
  0x60   : > { %s3083_s2 = smov 72   ;;  %s3084_s4 = smov 80  }
  0x61   : > { %s926_s29 = scalar_lea.vmem %s3570_s10, %s3351_s23  ;;  %s3085_s26 = smov 112  }
  0x62   : > { %v2278_v0 = vld [vmem:[%s3571_s22 + $0x8] sm:$0xff]  ;;  %v2277_v1 = vld [vmem:[%s3571_s22] sm:$0xff]  ;;  %s3086_s6 = smov 104   ;;  %s3087_s7 = smov 40  }
  0x63   : > { %v3363_v2 = vld [vmem:[%s926_s29] sm:$0xff]  ;;  %969 = vmatpush.bf16.msra.mxu0 %v2278_v0  ;;  %s3088_s28 = smov 8   ;;  %s3089_s5 = smov 48  }
  0x64   : > { %v943_v3 = vpack.c.bf16 %v3363_v2, %v3363_v2  ;;  %s3090_s10 = smov 24   ;;  %s3091_s29 = smov 16  }
  0x65   : > { %s3572_s27 = sld [smem:[#allocation41_spill]] }
  0x67   : > { %970 = vmatpush.bf16.msra.mxu0 %v2277_v1 }
  0x6a   : > { %2188 = vmatmul.msk.bf16.vlgmr.msra.gmra.mxu0 %vm959_vm0, %v943_v3 }
  0xe7   : > { %v972_v5 = vpop.f32.mrf.mxu0 }
  0xe8   : > { %v3368_v6 = vadd.f32 %v2479_v4, %v972_v5  ;;  %v2280_v4 = vld [vmem:[%s3572_s27 + $0x8] sm:$0xff]  ;;  %v2279_v5 = vld [vmem:[%s3572_s27] sm:$0xff] }
  0xea   : > { %1016 = vrot.lane.b32.xlu2 %v3368_v6, %s3078_s0  ;;  %1042 = vrot.lane.b32.xlu1 %v3368_v6, %s3079_s14 }
  0xeb   : > { %977 = vrot.lane.b32.xlu0 %v3368_v6, %s3080_s25 }
  0xef   : > { %v974_v7 = vpop.f32.mrf.mxu0 }
  0xf2   : > { %1082 = vrot.lane.b32.xlu2 %v3368_v6, %s3081_s1 }
  0xf3   : > { %1044 = vrot.lane.b32.xlu0 %v3368_v6, %s3082_s24 }
 0x144   : > { %v1017_v8 = vpop.permute.xlu2 %1016 }
 0x145   : > { %1037 = vmatpush.msra.mxu2 %v1017_v8 }
 0x14c   : > { %v1083_v9 = vpop.permute.xlu2 %1082 }
 0x14d   : > { %1103 = vmatpush.msrb.mxu2 %v1083_v9 }
 0x15c   : > { %v1043_v12 = vpop.permute.xlu1 %1042 }
 0x15d   : > { %v978_v10 = vpop.permute.xlu0 %977 }
 0x15e   : > { %2189 = vmatpush.xpose.msk.msra.mxu1 %vm979_vm1, %v978_v10 }
 0x161   : > { %2190 = vmatmul.msk.f32.vlgmr.msra.gmra.mxu1 %vm979_vm1, %v3368_v6 }
 0x165   : > { %v1045_v11 = vpop.permute.xlu0 %1044 }
 0x166   : > { %2192 = vmatpush.xpose.msk.msrb.mxu0 %vm979_vm1, %v1045_v11 }
 0x169   : > { %2193 = vmatmul.msk.f32.vlgmr.msrb.gmra.mxu0 %vm979_vm1, %v1043_v12 }
 0x1de   : > { %v1001_v13 = vpop.f32.mrf.mxu1 }
 0x1df   : > { %v1004_v14 = vmul.f32 0.35355338, %v1001_v13  ;;  %v2480_v13 = vld [vmem:[#allocation4] ss:$0 sm:$0xff] }
 0x1e1   : > { %v1005_v15 = vsel %vm979_vm1, %v1004_v14, -inf }
 0x1e2   : > { %1006 = vmax.xlane.f32.xlu1 %v1005_v15 }
 0x1e6   : > { %v1067_v16 = vpop.f32.mrf.mxu0 }
 0x1e7   : > { %v1070_v17 = vmul.f32 0.35355338, %v1067_v16 }
 0x1e9   : > { %v1071_v18 = vsel %vm979_vm1, %v1070_v17, -inf }
 0x1ea   : > { %1072 = vmax.xlane.f32.xlu2 %v1071_v18 }
 0x1fb   : > { %1176 = vrot.lane.b32.xlu1 %v3368_v6, %s3083_s2 }
 0x202   : > { %1110 = vrot.lane.b32.xlu2 %v3368_v6, %s3084_s4 }
 0x255   : > { %v1007_v19 = vpop.xlane.xlu1 %1006 }
 0x256   : > { %v1008_v20 = vsub.f32 %v1004_v14, %v1007_v19  ;;  %v3092_v19 = vmov 32.0  }
 0x258   : > { %v1009_v21 = vmul.f32 1.442695, %v1008_v20  ;;  %v2284_v20 = vld [vmem:[#allocation10 + $0x8] sm:$0xff] }
 0x25a   : > { %2492 = vpow2.f32 %v1009_v21 }
 0x25d   : > { %v1073_v22 = vpop.xlane.xlu2 %1072 }
 0x25e   : > { %v1074_v23 = vsub.f32 %v1070_v17, %v1073_v22  ;;  %v2283_v22 = vld [vmem:[#allocation10] sm:$0xff] }
 0x260   : > { %v2493_v24 = vpop.eup %2492  ;;  %v1075_v25 = vmul.f32 1.442695, %v1074_v23 }
 0x261   : > { %v1011_v26 = vsel %vm979_vm1, %v2493_v24, 0.0 }
 0x262   : > { %2494 = vpow2.f32 %v1075_v25  ;;  %1012 = vadd.xlane.f32.xlu2 %v1011_v26 }
 0x265   : > { %v1111_v27 = vpop.permute.xlu2 %1110 }
 0x266   : > { %2195 = vmatpush.xpose.msk.msrb.mxu1 %vm979_vm1, %v1111_v27 }
 0x268   : > { %v2495_v28 = vpop.eup %2494 }
 0x269   : > { %v1077_v29 = vsel %vm979_vm1, %v2495_v28, 0.0 }
 0x26a   : > { %1078 = vadd.xlane.f32.xlu0 %v1077_v29 }
 0x26d   : > { %v1177_v35 = vpop.permute.xlu1 %1176 }
 0x27a   : > { %1108 = vrot.lane.b32.xlu2 %v3368_v6, %s3085_s26 }
 0x27e   : > { %1174 = vrot.lane.b32.xlu0 %v3368_v6, %s3086_s6 }
 0x2d5   : > { %v1013_v30 = vpop.xlane.xlu2 %1012 }
 0x2d6   : > { %2496 = vrcp.f32 %v1013_v30 }
 0x2dc   : > { %v2497_v31 = vpop.eup %2496 }
 0x2dd   : > { %v1079_v32 = vpop.xlane.xlu0 %1078  ;;  %v1109_v33 = vpop.permute.xlu2 %1108  ;;  %v1015_v34 = vmul.f32 %v2497_v31, %v2493_v24 }
 0x2de   : > { %2498 = vrcp.f32 %v1079_v32  ;;  %2196 = vmatmul.msk.f32.vlgmr.msrb.gmra.mxu1 %vm979_vm1, %v1109_v33 }
 0x2df   : > { %2191 = vmatmul.msk.f32.vlgmr.msra.gmra.mxu2 %vm979_vm1, %v1015_v34  ;;  %v2282_v34 = vld [vmem:[%s3530_s8 + $0x8] sm:$0xff] }
 0x2e0   : > { %2198 = vmatpush.xpose.msk.msra.mxu2 %vm979_vm1, %v1177_v35  ;;  %1364 = vmatpush.bf16.msra.mxu0 %v2282_v34  ;;  %v2281_v35 = vld [vmem:[%s3530_s8] sm:$0xff] }
 0x2e4   : > { %v2499_v36 = vpop.eup %2498  ;;  %1365 = vmatpush.bf16.msra.mxu0 %v2281_v35 }
 0x2e5   : > { %v1081_v37 = vmul.f32 %v2499_v36, %v2495_v28  ;;  %v2483_v36 = vld [vmem:[#allocation12] ss:$0 sm:$0xff] }
 0x2e7   : > { %2194 = vmatmul.msk.f32.vlgmr.msrb.gmra.mxu2 %vm979_vm1, %v1081_v37 }
 0x2e8   : > { %1401 = vmatpush.bf16.msrb.mxu2 %v2284_v20 }
 0x2ec   : > { %1402 = vmatpush.bf16.msrb.mxu2 %v2283_v22 }
 0x2f0   : > { %v1175_v38 = vpop.permute.xlu0 %1174 }
 0x2f1   : > { %2199 = vmatmul.msk.f32.vlgmr.msra.gmra.mxu2 %vm979_vm1, %v1175_v38 }
 0x35b   : > { %v1133_v39 = vpop.f32.mrf.mxu1 }
 0x35c   : > { %v1136_v40 = vmul.f32 0.35355338, %v1133_v39 }
 0x35e   : > { %v1137_v41 = vsel %vm979_vm1, %v1136_v40, -inf }
 0x35f   : > { %1138 = vmax.xlane.f32.xlu2 %v1137_v41 }
 0x362   : > { %v1039_v42 = vpop.f32.mrf.mxu2 }
 0x36a   : > { %v1105_v43 = vpop.f32.mrf.mxu2 }
 0x374   : > { %v1199_v44 = vpop.f32.mrf.mxu2 }
 0x375   : > { %v1202_v45 = vmul.f32 0.35355338, %v1199_v44 }
 0x377   : > { %v1203_v46 = vsel %vm979_vm1, %v1202_v45, -inf }
 0x378   : > { %1204 = vmax.xlane.f32.xlu1 %v1203_v46 }
 0x391   : > { %1214 = vrot.lane.b32.xlu1 %v3368_v6, %s3087_s7  ;;  %s3574_s7 = sld [smem:[#allocation48_spill]] }
 0x3d2   : > { %v1139_v47 = vpop.xlane.xlu2 %1138 }
 0x3d3   : > { %v1140_v48 = vsub.f32 %v1136_v40, %v1139_v47 }
 0x3d5   : > { %v1141_v49 = vmul.f32 1.442695, %v1140_v48 }
 0x3d7   : > { %2500 = vpow2.f32 %v1141_v49  ;;  %v2481_v49 = vld [vmem:[#allocation6] ss:$0 sm:$0xff] }
 0x3dd   : > { %v2501_v50 = vpop.eup %2500 }
 0x3de   : > { %v1143_v51 = vsel %vm979_vm1, %v2501_v50, 0.0 }
 0x3df   : > { %1144 = vadd.xlane.f32.xlu0 %v1143_v51  ;;  %v2482_v51 = vld [vmem:[#allocation7] ss:$0 sm:$0xff] }
 0x3eb   : > { %v1205_v52 = vpop.xlane.xlu1 %1204 }
 0x3ec   : > { %v1206_v53 = vsub.f32 %v1202_v45, %v1205_v52 }
 0x3ee   : > { %v1207_v54 = vmul.f32 1.442695, %v1206_v53 }
 0x3f0   : > { %2502 = vpow2.f32 %v1207_v54 }
 0x3f3   : > { %1241 = vrot.lane.b32.xlu0 %v1105_v43, %s3088_s28 }
 0x3f6   : > { %v2503_v55 = vpop.eup %2502 }
 0x3f7   : > { %v1209_v56 = vsel %vm979_vm1, %v2503_v55, 0.0 }
 0x3f8   : > { %1210 = vadd.xlane.f32.xlu2 %v1209_v56 }
 0x403   : > { %v1215_v57 = vpop.permute.xlu1 %1214 }
 0x404   : > { %1235 = vmatpush.msra.mxu1 %v1215_v57 }
 0x410   : > { %1148 = vrot.lane.b32.xlu2 %v3368_v6, %s3089_s5  ;;  %s3573_s5 = sld [smem:[#allocation38_spill]] }
 0x416   : > { %s930_s3 = scalar_lea.vmem %s3573_s5, %s3351_s23  ;;  %s934_s5 = scalar_lea.vmem %s3574_s7, %s3351_s23 }
 0x417   : > { %v937_v21 = vld [vmem:[%s930_s3] sm:$0xff] }
 0x418   : > { %v1376_v24 = vpack.c.bf16 %v937_v21, %v937_v21 }
 0x41a   : > { %2227 = vmatmul.msk.bf16.vlgmr.msrb.gmra.mxu2 %vm959_vm0, %v1376_v24 }
 0x452   : > { %v1145_v58 = vpop.xlane.xlu0 %1144 }
 0x453   : > { %2504 = vrcp.f32 %v1145_v58 }
 0x459   : > { %v2505_v60 = vpop.eup %2504 }
 0x45a   : > { %v1147_v0 = vmul.f32 %v2505_v60, %v2501_v50 }
 0x465   : > { %v1242_v6 = vpop.permute.xlu0 %1241 }
 0x466   : > { %v1252_v8 = vsel %vm979_vm1, %v1039_v42, %v1242_v6 }
 0x46b   : > { %v1211_v59 = vpop.xlane.xlu2 %1210 }
 0x46c   : > { %2506 = vrcp.f32 %v1211_v59  ;;  %v2484_v59 = vld [vmem:[#allocation9] ss:$0 sm:$0xff] }
 0x46d   : > { %2508 = vrcp.f32 %v3092_v19 }
 0x472   : > { %v2507_v61 = vpop.eup %2506 }
 0x473   : > { %v1213_v62 = vmul.f32 %v2507_v61, %v2503_v55  ;;  %v1149_v63 = vpop.permute.xlu2 %1148  ;;  %v2509_v23 = vpop.eup %2508 }
 0x474   : > { %1169 = vmatpush.msra.mxu3 %v1149_v63  ;;  %v1301_v25 = vmul.f32 32.0, %v2509_v23  ;;  %vm1305_vm4 = vweird.f32 %v2509_v23 }
 0x475   : > { %2197 = vmatmul.msk.f32.vlgmr.msra.gmra.mxu3 %vm979_vm1, %v1147_v0  ;;  %2200 = vmatmul.msk.f32.vlgmr.msra.gmra.mxu1 %vm979_vm1, %v1213_v62 }
 0x476   : > { %1287 = vmatpush.bf16.msrb.mxu3 %v2280_v4 }
 0x47a   : > { %1288 = vmatpush.bf16.msrb.mxu3 %v2279_v5 }
 0x49d   : > { %v1404_v37 = vpop.f32.mrf.mxu2 }
 0x49e   : > { %v3440_v40 = vadd.f32 %v2483_v36, %v1404_v37 }
 0x4a0   : > { %2228 = vmatpush.xpose.msk.msrb.mxu1 %vm979_vm1, %v3440_v40 }
 0x4a5   : > { %v1406_v42 = vpop.f32.mrf.mxu2 }
 0x4f2   : > { %v1237_v1 = vpop.f32.mrf.mxu1 }
 0x4f3   : > { %1249 = vrot.lane.b32.xlu0 %v1237_v1, %s3090_s10 }
 0x4f8   : > { %v1171_v3 = vpop.f32.mrf.mxu3 }
 0x4f9   : > { %1245 = vrot.lane.b32.xlu2 %v1171_v3, %s3091_s29 }
 0x4fb   : > { %1474 = vrot.lane.b32.xlu0 %v3440_v40, %s3079_s14 }
 0x503   : > { %1540 = vrot.lane.b32.xlu0 %v3440_v40, %s3085_s26 }
 0x50b   : > { %1606 = vrot.lane.b32.xlu0 %v3440_v40, %s3086_s6 }
 0x553   : > { %v1246_v7 = vpop.permute.xlu2 %1245 }
 0x554   : > { %v1254_v9 = vsel %vm1253_vm2, %v1252_v8, %v1246_v7 }
 0x565   : > { %v1250_v10 = vpop.permute.xlu0 %1249 }
 0x566   : > { %v1256_v11 = vsel %vm1255_vm3, %v1254_v9, %v1250_v10 }
 0x567   : > { %v1262_v12 = vpack.c.bf16 %v1256_v11, %v1256_v11 }
 0x569   : > { %2209 = vmatmul.msk.bf16.vlgmr.msrb.gmra.mxu3 %vm959_vm0, %v1262_v12 }
 0x56d   : > { %v1475_v56 = vpop.permute.xlu0 %1474 }
 0x56e   : > { %2231 = vmatpush.xpose.msk.msra.mxu3 %vm979_vm1, %v1475_v56  ;;  %v2286_v56 = vld [vmem:[#allocation13 + $0x8] sm:$0xff] }
 0x575   : > { %v1541_v57 = vpop.permute.xlu0 %1540 }
 0x576   : > { %2234 = vmatpush.xpose.msk.msra.mxu2 %vm979_vm1, %v1541_v57  ;;  %v2285_v57 = vld [vmem:[#allocation13] sm:$0xff] }
 0x57a   : > { %1715 = vmatpush.bf16.msrb.mxu2 %v2286_v56 }
 0x57d   : > { %v1607_v58 = vpop.permute.xlu0 %1606 }
 0x57e   : > { %2237 = vmatpush.xpose.msk.msrb.mxu3 %vm979_vm1, %v1607_v58  ;;  %1716 = vmatpush.bf16.msrb.mxu2 %v2285_v57 }
 0x5ec   : > { %v1290_v14 = vpop.f32.mrf.mxu3 }
 0x5ed   : > { %v1291_v15 = vadd.f32 %v2480_v13, %v1290_v14 }
 0x5ef   : > { %v1294_v16 = vadd.f32 %v1291_v15, %v3363_v2  ;;  %v1302_v2 = vsub.f32 1.0, %v1301_v25 }
 0x5f1   : > { %v1297_v17 = vsel %vm959_vm0, %v1294_v16, 0.0  ;;  %v1303_v26 = vmul.f32 %v2509_v23, %v1302_v2 }
 0x5f2   : > { %1298 = vadd.xlane.f32.xlu1 %v1297_v17 }
 0x5f3   : > { %v1304_v27 = vadd.f32 %v2509_v23, %v1303_v26 }
 0x5f4   : > { %v1292_v18 = vpop.f32.mrf.mxu3 }
 0x5f5   : > { %v3429_v28 = vsel %vm1305_vm4, %v2509_v23, %v1304_v27 }
 0x665   : > { %v1299_v29 = vpop.xlane.xlu1 %1298 }
 0x666   : > { %v1307_v30 = vmul.f32 %v3429_v28, %v1299_v29 }
 0x668   : > { %v1308_v31 = vsub.f32 %v1294_v16, %v1307_v30 }
 0x66a   : > { %v1309_v32 = vmul.f32 %v1308_v31, %v1308_v31 }
 0x66c   : > { %v1310_v33 = vsel %vm959_vm0, %v1309_v32, 0.0 }
 0x66d   : > { %1311 = vadd.xlane.f32.xlu2 %v1310_v33 }
 0x6e0   : > { %v1312_v38 = vpop.xlane.xlu2 %1311 }
 0x6e1   : > { %v1313_v39 = vmul.f32 %v1312_v38, %v3429_v28 }
 0x6e3   : > { %v1314_v41 = vadd.f32 1e-12, %v1313_v39 }
 0x6e5   : > { %2510 = vrsqrt.f32 %v1314_v41  ;;  %vm1321_vm6 = vweird.f32 %v1314_v41 }
 0x6eb   : > { %v2511_v43 = vpop.eup %2510 }
 0x6ec   : > { %v1316_v44 = vmul.f32 %v2511_v43, %v1314_v41  ;;  %vm1322_vm5 = vweird.f32 %v2511_v43 }
 0x6ed   : > { %vm1323_vm7 = vmor %vm1321_vm6, %vm1322_vm5 }
 0x6ee   : > { %v1317_v45 = vmul.f32 %v2511_v43, %v1316_v44 }
 0x6f0   : > { %v1318_v46 = vmul.f32 0.5, %v1317_v45 }
 0x6f2   : > { %v1319_v47 = vsub.f32 1.5, %v1318_v46 }
 0x6f4   : > { %v1320_v48 = vmul.f32 %v2511_v43, %v1319_v47 }
 0x6f6   : > { %v1324_v50 = vsel %vm1323_vm7, %v2511_v43, %v1320_v48 }
 0x6f7   : > { %v1325_v52 = vmul.f32 %v1324_v50, %v1308_v31 }
 0x6f9   : > { %v1329_v53 = vmul.f32 %v2481_v49, %v1325_v52 }
 0x6fb   : > { %v3450_v54 = vadd.f32 %v2482_v51, %v1329_v53 }
 0x6fd   : > { %v1339_v55 = vpack.c.bf16 %v3450_v54, %v3450_v54 }
 0x6ff   : > { %2218 = vmatmul.msk.bf16.vlgmr.msra.gmra.mxu0 %vm959_vm0, %v1339_v55 }
 0x77c   : > { %v1367_v60 = vpop.f32.mrf.mxu0 }
 0x77d   : > { %v1368_v61 = vadd.f32 %v2484_v59, %v1367_v60 }
 0x77f   : > { %1604 = vrot.lane.b32.xlu1 %v1368_v61, %s3086_s6  ;;  %1472 = vrot.lane.b32.xlu0 %v1368_v61, %s3079_s14 }
 0x780   : > { %2229 = vmatmul.msk.f32.vlgmr.msrb.gmra.mxu1 %vm979_vm1, %v1368_v61 }
 0x784   : > { %v1369_v62 = vpop.f32.mrf.mxu0 }
 0x787   : > { %1538 = vrot.lane.b32.xlu0 %v1368_v61, %s3085_s26 }
 0x7f1   : > { %v1473_v63 = vpop.permute.xlu0 %1472  ;;  %v1605_v0 = vpop.permute.xlu1 %1604 }
 0x7f2   : > { %2232 = vmatmul.msk.f32.vlgmr.msra.gmra.mxu3 %vm979_vm1, %v1473_v63 }
 0x7f9   : > { %v1539_v1 = vpop.permute.xlu0 %1538 }
 0x7fa   : > { %2235 = vmatmul.msk.f32.vlgmr.msra.gmra.mxu2 %vm979_vm1, %v1539_v1  ;;  %2238 = vmatmul.msk.f32.vlgmr.msrb.gmra.mxu3 %vm979_vm1, %v1605_v0  ;;  %v2485_v1 = vld [vmem:[#allocation15] ss:$0 sm:$0xff] }
 0x7fd   : > { %v1431_v3 = vpop.f32.mrf.mxu1 }
 0x7fe   : > { %v1434_v4 = vmul.f32 0.35355338, %v1431_v3 }
 0x800   : > { %v1435_v5 = vsel %vm979_vm1, %v1434_v4, -inf }
 0x801   : > { %1436 = vmax.xlane.f32.xlu2 %v1435_v5 }
 0x874   : > { %v1437_v6 = vpop.xlane.xlu2 %1436 }
 0x875   : > { %v1438_v7 = vsub.f32 %v1434_v4, %v1437_v6  ;;  %v1497_v8 = vpop.f32.mrf.mxu3 }
 0x876   : > { %v1500_v9 = vmul.f32 0.35355338, %v1497_v8 }
 0x877   : > { %v1439_v10 = vmul.f32 1.442695, %v1438_v7 }
 0x878   : > { %v1501_v11 = vsel %vm979_vm1, %v1500_v9, -inf }
 0x879   : > { %2512 = vpow2.f32 %v1439_v10  ;;  %1502 = vmax.xlane.f32.xlu0 %v1501_v11 }
 0x87d   : > { %v1563_v12 = vpop.f32.mrf.mxu2  ;;  %v1629_v17 = vpop.f32.mrf.mxu3 }
 0x87e   : > { %v1566_v13 = vmul.f32 0.35355338, %v1563_v12  ;;  %v1632_v18 = vmul.f32 0.35355338, %v1629_v17 }
 0x87f   : > { %v2513_v14 = vpop.eup %2512 }
 0x880   : > { %v1441_v15 = vsel %vm979_vm1, %v2513_v14, 0.0  ;;  %v1567_v16 = vsel %vm979_vm1, %v1566_v13, -inf  ;;  %v1633_v19 = vsel %vm979_vm1, %v1632_v18, -inf }
 0x881   : > { %1442 = vadd.xlane.f32.xlu1 %v1441_v15  ;;  %1568 = vmax.xlane.f32.xlu2 %v1567_v16 }
 0x889   : > { %1634 = vmax.xlane.f32.xlu2 %v1633_v19 }
 0x89a   : > { %1644 = vrot.lane.b32.xlu1 %v3440_v40, %s3083_s2 }
 0x8a1   : > { %1446 = vrot.lane.b32.xlu2 %v3440_v40, %s3080_s25 }
 0x8ec   : > { %v1503_v20 = vpop.xlane.xlu0 %1502 }
 0x8ed   : > { %v1504_v21 = vsub.f32 %v1500_v9, %v1503_v20 }
 0x8ef   : > { %v1505_v22 = vmul.f32 1.442695, %v1504_v21 }
 0x8f1   : > { %2514 = vpow2.f32 %v1505_v22 }
 0x8f4   : > { %v1569_v23 = vpop.xlane.xlu2 %1568  ;;  %v1443_v26 = vpop.xlane.xlu1 %1442 }
 0x8f5   : > { %v1570_v24 = vsub.f32 %v1566_v13, %v1569_v23  ;;  %v2288_v13 = vld [vmem:[#allocation19 + $0x8] sm:$0xff]  ;;  %v2486_v23 = vld [vmem:[#allocation16] ss:$0 sm:$0xff] }
 0x8f7   : > { %v2515_v25 = vpop.eup %2514  ;;  %v1571_v2 = vmul.f32 1.442695, %v1570_v24 }
 0x8f8   : > { %v1507_v27 = vsel %vm979_vm1, %v2515_v25, 0.0 }
 0x8f9   : > { %2516 = vpow2.f32 %v1571_v2  ;;  %1508 = vadd.xlane.f32.xlu2 %v1507_v27 }
 0x8fa   : > { %2518 = vrcp.f32 %v1443_v26 }
 0x8fc   : > { %v1635_v29 = vpop.xlane.xlu2 %1634 }
 0x8fd   : > { %v1636_v30 = vsub.f32 %v1632_v18, %v1635_v29 }
 0x8ff   : > { %v2517_v31 = vpop.eup %2516  ;;  %v1637_v32 = vmul.f32 1.442695, %v1636_v30  ;;  %v2488_v30 = vld [vmem:[#allocation21] ss:$0 sm:$0xff] }
 0x900   : > { %v1573_v33 = vsel %vm979_vm1, %v2517_v31, 0.0  ;;  %v2519_v34 = vpop.eup %2518 }
 0x901   : > { %2520 = vpow2.f32 %v1637_v32  ;;  %1574 = vadd.xlane.f32.xlu2 %v1573_v33  ;;  %v1445_v35 = vmul.f32 %v2519_v34, %v2513_v14  ;;  %v2287_v14 = vld [vmem:[#allocation19] sm:$0xff] }
 0x904   : > { %v1447_v36 = vpop.permute.xlu2 %1446 }
 0x905   : > { %1467 = vmatpush.msra.mxu1 %v1447_v36 }
 0x906   : > { %2230 = vmatmul.msk.f32.vlgmr.msra.gmra.mxu1 %vm979_vm1, %v1445_v35 }
 0x907   : > { %v2521_v37 = vpop.eup %2520 }
 0x908   : > { %v1639_v38 = vsel %vm979_vm1, %v2521_v37, 0.0 }
 0x909   : > { %1640 = vadd.xlane.f32.xlu0 %v1639_v38  ;;  %v2292_v38 = vld [vmem:[%s3540_s18 + $0x18] sm:$0xff] }
 0x90a   : > { %1877 = vmatpush.bf16.msra.mxu3 %v2292_v38 }
 0x90c   : > { %v1645_v49 = vpop.permute.xlu1 %1644 }
 0x919   : > { %1578 = vrot.lane.b32.xlu2 %v3440_v40, %s3084_s4 }
 0x91d   : > { %1512 = vrot.lane.b32.xlu0 %v3440_v40, %s3082_s24 }
 0x96c   : > { %v1509_v39 = vpop.xlane.xlu2 %1508 }
 0x974   : > { %v1575_v41 = vpop.xlane.xlu2 %1574 }
 0x975   : > { %2522 = vrcp.f32 %v1575_v41 }
 0x976   : > { %2524 = vrcp.f32 %v1509_v39  ;;  %v2291_v39 = vld [vmem:[%s3540_s18 + $0x10] sm:$0xff] }
 0x977   : > { %1878 = vmatpush.bf16.msra.mxu3 %v2291_v39 }
 0x97b   : > { %v2523_v42 = vpop.eup %2522 }
 0x97c   : > { %v1577_v43 = vmul.f32 %v2523_v42, %v2517_v31  ;;  %v1579_v44 = vpop.permute.xlu2 %1578  ;;  %v1641_v45 = vpop.xlane.xlu0 %1640 }
 0x97d   : > { %1599 = vmatpush.msrb.mxu1 %v1579_v44  ;;  %v2525_v46 = vpop.eup %2524  ;;  %2526 = vrcp.f32 %v1641_v45 }
 0x97e   : > { %2236 = vmatmul.msk.f32.vlgmr.msrb.gmra.mxu1 %vm979_vm1, %v1577_v43  ;;  %v1511_v47 = vmul.f32 %v2525_v46, %v2515_v25  ;;  %v2487_v25 = vld [vmem:[#allocation18] ss:$0 sm:$0xff]  ;;  %v2290_v43 = vld [vmem:[%s3540_s18 + $0x8] sm:$0xff] }
 0x97f   : > { %1785 = vmatpush.bf16.msra.mxu1 %v2288_v13  ;;  %1879 = vmatpush.bf16.msra.mxu3 %v2290_v43 }
 0x983   : > { %v2527_v40 = vpop.eup %2526  ;;  %v1469_v51 = vpop.f32.mrf.mxu1  ;;  %1786 = vmatpush.bf16.msra.mxu1 %v2287_v14 }
 0x984   : > { %v1643_v50 = vmul.f32 %v2527_v40, %v2521_v37 }
 0x98f   : > { %v1513_v48 = vpop.permute.xlu0 %1512 }
 0x990   : > { %1533 = vmatpush.msrb.mxu0 %v1513_v48  ;;  %v2289_v48 = vld [vmem:[%s3540_s18] sm:$0xff] }
 0x991   : > { %2233 = vmatmul.msk.f32.vlgmr.msrb.gmra.mxu0 %vm979_vm1, %v1511_v47  ;;  %1880 = vmatpush.bf16.msra.mxu3 %v2289_v48 }
 0x992   : > { %1665 = vmatpush.msra.mxu0 %v1645_v49 }
 0x999   : > { %2239 = vmatmul.msk.f32.vlgmr.msra.gmra.mxu0 %vm979_vm1, %v1643_v50 }
 0x9fb   : > { %v1601_v52 = vpop.f32.mrf.mxu1 }
 0x9fc   : > { %1675 = vrot.lane.b32.xlu2 %v1601_v52, %s3091_s29 }
 0xa0e   : > { %v1535_v53 = vpop.f32.mrf.mxu0 }
 0xa0f   : > { %1671 = vrot.lane.b32.xlu0 %v1535_v53, %s3088_s28 }
 0xa16   : > { %v1667_v55 = vpop.f32.mrf.mxu0 }
 0xa17   : > { %1679 = vrot.lane.b32.xlu0 %v1667_v55, %s3090_s10 }
 0xa56   : > { %v1676_v60 = vpop.permute.xlu2 %1675 }
 0xa81   : > { %v1672_v58 = vpop.permute.xlu0 %1671 }
 0xa82   : > { %v1682_v59 = vsel %vm979_vm1, %v1469_v51, %v1672_v58  ;;  %vm1869_vm1 = vcmask 523264  }
 0xa83   : > { %v1683_v62 = vsel %vm1253_vm2, %v1682_v59, %v1676_v60 }
 0xa89   : > { %v1680_v61 = vpop.permute.xlu0 %1679 }
 0xa8a   : > { %v1684_v63 = vsel %vm1255_vm3, %v1683_v62, %v1680_v61 }
 0xa8b   : > { %v1690_v0 = vpack.c.bf16 %v1684_v63, %v1684_v63 }
 0xa8d   : > { %2248 = vmatmul.msk.bf16.vlgmr.msrb.gmra.mxu2 %vm959_vm0, %v1690_v0 }
 0xb10   : > { %v1718_v3 = vpop.f32.mrf.mxu2 }
 0xb11   : > { %v1719_v4 = vadd.f32 %v2485_v1, %v1718_v3 }
 0xb13   : > { %v1722_v5 = vadd.f32 %v1719_v4, %v3450_v54 }
 0xb15   : > { %v1725_v6 = vsel %vm959_vm0, %v1722_v5, 0.0 }
 0xb16   : > { %1726 = vadd.xlane.f32.xlu2 %v1725_v6 }
 0xb18   : > { %v1720_v7 = vpop.f32.mrf.mxu2 }
 0xb89   : > { %v1727_v8 = vpop.xlane.xlu2 %1726 }
 0xb8a   : > { %v1728_v9 = vmul.f32 %v1727_v8, %v3429_v28 }
 0xb8c   : > { %v1729_v10 = vsub.f32 %v1722_v5, %v1728_v9 }
 0xb8e   : > { %v1730_v11 = vmul.f32 %v1729_v10, %v1729_v10 }
 0xb90   : > { %v1731_v12 = vsel %vm959_vm0, %v1730_v11, 0.0  ;;  %v2489_v11 = vld [vmem:[#allocation22] ss:$0 sm:$0xff] }
 0xb91   : > { %1732 = vadd.xlane.f32.xlu0 %v1731_v12 }
 0xc04   : > { %v1733_v15 = vpop.xlane.xlu0 %1732 }
 0xc05   : > { %v1734_v16 = vmul.f32 %v1733_v15, %v3429_v28 }
 0xc07   : > { %v1735_v54 = vadd.f32 1e-12, %v1734_v16 }
 0xc09   : > { %2528 = vrsqrt.f32 %v1735_v54  ;;  %vm1742_vm9 = vweird.f32 %v1735_v54 }
 0xc0f   : > { %v2529_v17 = vpop.eup %2528 }
 0xc10   : > { %v1737_v18 = vmul.f32 %v2529_v17, %v1735_v54  ;;  %vm1743_vm8 = vweird.f32 %v2529_v17 }
 0xc11   : > { %vm1744_vm10 = vmor %vm1742_vm9, %vm1743_vm8 }
 0xc12   : > { %v1738_v19 = vmul.f32 %v2529_v17, %v1737_v18 }
 0xc14   : > { %v1739_v20 = vmul.f32 0.5, %v1738_v19 }
 0xc16   : > { %v1740_v21 = vsub.f32 1.5, %v1739_v20 }
 0xc18   : > { %v1741_v22 = vmul.f32 %v2529_v17, %v1740_v21 }
 0xc1a   : > { %v1745_v24 = vsel %vm1744_vm10, %v2529_v17, %v1741_v22 }
 0xc1b   : > { %v1746_v2 = vmul.f32 %v1745_v24, %v1729_v10 }
 0xc1d   : > { %v1750_v26 = vmul.f32 %v2486_v23, %v1746_v2 }
 0xc1f   : > { %v1754_v27 = vadd.f32 %v2487_v25, %v1750_v26 }
 0xc21   : > { %v1760_v29 = vpack.c.bf16 %v1754_v27, %v1754_v27 }
 0xc23   : > { %2257 = vmatmul.msk.bf16.vlgmr.msra.gmra.mxu1 %vm959_vm0, %v1760_v29 }
 0xca0   : > { %v1788_v31 = vpop.f32.mrf.mxu1 }
 0xca1   : > { %v1789_v32 = vadd.f32 %v2488_v30, %v1788_v31  ;;  %v2490_v30 = vld [vmem:[#allocation24] ss:$0 sm:$0xff] }
 0xca3   : > { %v1793_v33 = vmul.f32 0.70710677, %v1789_v32  ;;  %v1792_v7 = vmul.f32 0.5, %v1789_v32  ;;  %v2491_v32 = vld [vmem:[#allocation25] ss:$0 sm:$0xff] }
 0xca5   : > { %v1794_v34 = vand.u32 2147483647, %v1793_v33  ;;  %vm1827_vm15 = vcmp.ge.f32.partialorder %v1793_v33, 0.0 }
 0xca7   : > { %v1795_v35 = vmul.f32 0.3275911, %v1794_v34  ;;  %v1821_v52 = vsub.f32 0.0, %v1794_v34 }
 0xca8   : > { %v1790_v36 = vpop.f32.mrf.mxu1 }
 0xca9   : > { %v1796_v37 = vadd.f32 1.0, %v1795_v35  ;;  %v1822_v56 = vmul.f32 %v1821_v52, %v1794_v34 }
 0xcab   : > { %2530 = vrcp.f32 %v1796_v37  ;;  %v1808_v45 = vand.u32 2147483648, %v1796_v37  ;;  %v1806_v47 = vand.u32 2147483647, %v1796_v37  ;;  %vm1802_vm12 = vweird.f32 %v1796_v37 }
 0xcac   : > { %v1823_v59 = vmul.f32 1.442695, %v1822_v56 }
 0xcad   : > { %v1809_v40 = vor.u32 1.1754944e-38, %v1808_v45  ;;  %vm1807_vm14 = vcmp.eq.f32.partialorder %v1806_v47, 8.507059e+37 }
 0xcae   : > { %2532 = vpow2.f32 %v1823_v59 }
 0xcb1   : > { %v2531_v41 = vpop.eup %2530 }
 0xcb2   : > { %v1798_v42 = vmul.f32 %v2531_v41, %v1796_v37  ;;  %vm1803_vm11 = vweird.f32 %v2531_v41 }
 0xcb3   : > { %vm1804_vm13 = vmor %vm1802_vm12, %vm1803_vm11 }
 0xcb4   : > { %v1799_v44 = vsub.f32 1.0, %v1798_v42  ;;  %v2533_v1 = vpop.eup %2532 }
 0xcb6   : > { %v1800_v46 = vmul.f32 %v2531_v41, %v1799_v44 }
 0xcb8   : > { %v1801_v49 = vadd.f32 %v2531_v41, %v1800_v46 }
 0xcba   : > { %v1805_v50 = vsel %vm1804_vm13, %v2531_v41, %v1801_v49 }
 0xcbb   : > { %v1810_v51 = vsel %vm1807_vm14, %v1809_v40, %v1805_v50 }
 0xcbc   : > { %v1812_v53 = vmul.f32 1.0614054, %v1810_v51 }
 0xcbe   : > { %v1813_v55 = vadd.f32 -1.4531521, %v1812_v53 }
 0xcc0   : > { %v1814_v57 = vmul.f32 %v1813_v55, %v1810_v51 }
 0xcc2   : > { %v1815_v58 = vadd.f32 1.4214138, %v1814_v57 }
 0xcc4   : > { %v1816_v60 = vmul.f32 %v1815_v58, %v1810_v51 }
 0xcc6   : > { %v1817_v61 = vadd.f32 -0.28449672, %v1816_v60 }
 0xcc8   : > { %v1818_v62 = vmul.f32 %v1817_v61, %v1810_v51 }
 0xcca   : > { %v1819_v63 = vadd.f32 0.2548296, %v1818_v62 }
 0xccc   : > { %v1820_v0 = vmul.f32 %v1819_v63, %v1810_v51 }
 0xcce   : > { %v1825_v3 = vmul.f32 %v2533_v1, %v1820_v0 }
 0xcd0   : > { %v1826_v4 = vsub.f32 1.0, %v1825_v3 }
 0xcd2   : > { %v1828_v5 = vsub.f32 0.0, %v1826_v4 }
 0xcd4   : > { %v1829_v6 = vsel %vm1827_vm15, %v1826_v4, %v1828_v5 }
 0xcd5   : > { %v1830_v8 = vadd.f32 1.0, %v1829_v6 }
 0xcd7   : > { %v1831_v9 = vmul.f32 %v1830_v8, %v1792_v7 }
 0xcd9   : > { %v1841_v10 = vpack.c.bf16 %v1831_v9, %v1831_v9 }
 0xcdb   : > { %2274 = vmatmul.msk.bf16.vlgmr.msra.gmra.mxu3 %vm1869_vm1, %v1841_v10 }
 0xd5e   : > { %v1882_v12 = vpop.f32.mrf.mxu3 }
 0xd5f   : > { %v1883_v13 = vadd.f32 %v2489_v11, %v1882_v12 }
 0xd61   : > { %v1886_v14 = vadd.f32 %v1883_v13, %v1754_v27 }
 0xd63   : > { %v1889_v15 = vsel %vm959_vm0, %v1886_v14, 0.0 }
 0xd64   : > { %1890 = vadd.xlane.f32.xlu1 %v1889_v15 }
 0xd66   : > { %v1884_v16 = vpop.f32.mrf.mxu3 }
 0xdd7   : > { %v1891_v54 = vpop.xlane.xlu1 %1890 }
 0xdd8   : > { %v1892_v17 = vmul.f32 %v1891_v54, %v3429_v28 }
 0xdda   : > { %v1893_v18 = vsub.f32 %v1886_v14, %v1892_v17 }
 0xddc   : > { %v1894_v19 = vmul.f32 %v1893_v18, %v1893_v18 }
 0xdde   : > { %v1895_v20 = vsel %vm959_vm0, %v1894_v19, 0.0 }
 0xddf   : > { %1896 = vadd.xlane.f32.xlu2 %v1895_v20 }
 0xe52   : > { %v1897_v21 = vpop.xlane.xlu2 %1896 }
 0xe53   : > { %v1898_v22 = vmul.f32 %v1897_v21, %v3429_v28 }
 0xe55   : > { %v1899_v23 = vadd.f32 1e-12, %v1898_v22 }
 0xe57   : > { %2534 = vrsqrt.f32 %v1899_v23  ;;  %vm1906_vm3 = vweird.f32 %v1899_v23 }
 0xe5d   : > { %v2535_v24 = vpop.eup %2534 }
 0xe5e   : > { %v1901_v25 = vmul.f32 %v2535_v24, %v1899_v23  ;;  %vm1907_vm2 = vweird.f32 %v2535_v24 }
 0xe5f   : > { %vm1908_vm4 = vmor %vm1906_vm3, %vm1907_vm2 }
 0xe60   : > { %v1902_v2 = vmul.f32 %v2535_v24, %v1901_v25 }
 0xe62   : > { %v1903_v26 = vmul.f32 0.5, %v1902_v2 }
 0xe64   : > { %v1904_v27 = vsub.f32 1.5, %v1903_v26 }
 0xe66   : > { %v1905_v29 = vmul.f32 %v2535_v24, %v1904_v27 }
 0xe68   : > { %v1909_v31 = vsel %vm1908_vm4, %v2535_v24, %v1905_v29 }
 0xe69   : > { %v1910_v33 = vmul.f32 %v1909_v31, %v1893_v18 }
 0xe6b   : > { %v1914_v34 = vmul.f32 %v2490_v30, %v1910_v33 }
 0xe6d   : > { %v1918_v28 = vadd.f32 %v2491_v32, %v1914_v34 }
 0xe6f   : > { %1919 = vst.msk [vmem:[%s934_s5] sm:$0xff] %vm959_vm0, %v1918_v28 }
 0xe70 PF: > { %s3575_s3 = sld [smem:[#allocation36_spill]] }
 0xe76   : > { %s41_s3 = sadd.s32 1, %s3575_s3  }
 0xe77   : > { %p38_p7 = scmp.ge.s32.totalorder %s41_s3, 4  }
 0xe79   :  { %40 = sbr.rel (!%p38_p7) target bundleno = 22 (0x16), region = 206 }
 0xe7e   :  { %1939 = vsyncpa [#allocation3], 1 }
 0xe7f   :  { %1941 = vsyncpa [#allocation3 + $0x1], 1 }
 0xe80   :  { %1942 = vsyncpa [#allocation5], 1 }
 0xe81   :  { %1943 = vsyncpa [#allocation8], 1 }
 0xe82   :  { %1944 = vsyncpa [#allocation11], 1 }
 0xe83   :  { %1945 = vsyncpa [#allocation14], 1 }
 0xe84   :  { %1946 = vsyncpa [#allocation17], 1 }
 0xe85   :  { %1947 = vsyncpa [#allocation20], 1 }
 0xe86   :  { %1948 = vsyncpa [#allocation23], 1 }
 0xe87   :  { %1949 = vsyncpa [#allocation26], 1 }

// kernel: _lambda_.5
= control target key start
LH: loop header
LB: loop body
LE: loop exit
PB: predicated region body
PF: predicated region fallthrough
CT: control target
= control target key end

     0   :  { %s3601_s0 = inlined_call_operand.vmem [shape: f32[2,8,32], index: 0, kind: input, shape index: {}]   ;;  %s3602_s1 = inlined_call_operand.vmem [shape: f32[2,8,32], index: 1, kind: input, shape index: {}]   ;;  %s3603_s2 = inlined_call_operand.vmem [shape: bf16[32,96], index: 2, kind: input, shape index: {}]   ;;  %s3604_s3 = inlined_call_operand.hbm [shape: f32[1,96], index: 3, kind: input, shape index: {}]   ;;  %s3605_s4 = inlined_call_operand.vmem [shape: bf16[32,32], index: 4, kind: input, shape index: {}]   ;;  %s3606_s5 = inlined_call_operand.hbm [shape: f32[1,32], index: 5, kind: input, shape index: {}]   ;;  %s3607_s6 = inlined_call_operand.hbm [shape: f32[1,32], index: 6, kind: input, shape index: {}]   ;;  %s3608_s7 = inlined_call_operand.hbm [shape: f32[1,32], index: 7, kind: input, shape index: {}]   ;;  %s3609_s8 = inlined_call_operand.hbm [shape: bf16[32,32], index: 8, kind: input, shape index: {}]   ;;  %s3610_s9 = inlined_call_operand.hbm [shape: f32[1,32], index: 9, kind: input, shape index: {}]   ;;  %s3611_s10 = inlined_call_operand.hbm [shape: bf16[32,64], index: 10, kind: input, shape index: {}]   ;;  %s3612_s11 = inlined_call_operand.hbm [shape: f32[1,64], index: 11, kind: input, shape index: {}]   ;;  %s3613_s12 = inlined_call_operand.hbm [shape: bf16[32,32], index: 12, kind: input, shape index: {}]   ;;  %s3614_s13 = inlined_call_operand.hbm [shape: f32[1,32], index: 13, kind: input, shape index: {}]   ;;  %s3615_s14 = inlined_call_operand.hbm [shape: f32[1,32], index: 14, kind: input, shape index: {}]   ;;  %s3616_s15 = inlined_call_operand.hbm [shape: f32[1,32], index: 15, kind: input, shape index: {}]   ;;  %s3617_s16 = inlined_call_operand.hbm [shape: bf16[32,64], index: 16, kind: input, shape index: {}]   ;;  %s3618_s17 = inlined_call_operand.hbm [shape: f32[1,64], index: 17, kind: input, shape index: {}]   ;;  %s3619_s18 = inlined_call_operand.vmem [shape: bf16[64,32], index: 18, kind: input, shape index: {}]   ;;  %s3620_s19 = inlined_call_operand.hbm [shape: f32[1,32], index: 19, kind: input, shape index: {}]   ;;  %s3621_s20 = inlined_call_operand.hbm [shape: f32[1,32], index: 20, kind: input, shape index: {}]   ;;  %s3622_s21 = inlined_call_operand.hbm [shape: f32[1,32], index: 21, kind: input, shape index: {}]   ;;  %s3623_s22 = inlined_call_operand.vmem [shape: f32[2,8,32], index: 22, kind: output, shape index: {}]  }
   0x1   :  { %3627 = sst [smem:[#allocation38_spill]] %s3601_s0 }
   0x2   :  { %3628 = sst [smem:[#allocation39_spill]] %s3602_s1 }
   0x3   :  { %3629 = sst [smem:[#allocation40_spill]] %s3603_s2 }
   0x4   :  { %3630 = sst [smem:[#allocation41_spill]] %s3604_s3 }
   0x5   :  { %3631 = sst [smem:[#allocation42_spill]] %s3605_s4 }
   0x6   :  { %3632 = sst [smem:[#allocation43_spill]] %s3606_s5 }
   0x7   :  { %3633 = sst [smem:[#allocation44_spill]] %s3607_s6 }
   0x8   :  { %3634 = sst [smem:[#allocation45_spill]] %s3608_s7 }
   0x9   :  { %3635 = sst [smem:[#allocation46_spill]] %s3610_s9 }
   0xa   :  { %3636 = sst [smem:[#allocation47_spill]] %s3612_s11 }
   0xb   :  { %27 = vsyncpa [#allocation3], 0 }
   0xc   :  { %28 = vsyncpa [#allocation5], 0 }
   0xd   :  { %29 = vsyncpa [#allocation8], 0 }
   0xe   :  { %30 = vsyncpa [#allocation11], 0 }
   0xf   :  { %31 = vsyncpa [#allocation14], 0 }
  0x10   :  { %32 = vsyncpa [#allocation17], 0 }
  0x11   :  { %33 = vsyncpa [#allocation20], 0 }
  0x12   :  { %34 = vsyncpa [#allocation23], 0 }
  0x13   :  { %35 = vsyncpa [#allocation26], 0  ;;  %s3276_s3 = smov 0  }
  0x14 LB: > { %3637 = sst [smem:[#allocation37_spill]] %s3125_s3  ;;  %s3285_s0 = sadd.s32 4294967295, %s3125_s3   ;;  %s3125_s3 = sphi %s3276_s3, %s41_s3  }
  0x15   : > { %s3638_s30 = sld [smem:[#allocation43_spill]]  ;;  %p2167_p0 = scmp.ge.s32.totalorder %s3125_s3, 1 }
  0x16   : > { %p544_p1 = scmp.lt.s32.totalorder %s3125_s3, 3  ;;  %p2440_p2 = scmp.eq.s32.totalorder %s3285_s0, 0 }
  0x17   : > { %s3127_s1 = smov [#allocation4]   ;;  %s3640_s7 = sld [smem:[#allocation45_spill]] }
  0x18   : > { %p3290_p3 = pnand %p2167_p0, %p544_p1  ;;  %s576_s5 = sshll.u32 %s3127_s1, 4  ;;  %s577_s5 = int_to_ptr.vmem [resolvable:$true] %s576_s5 }
  0x19   : > { %s3641_s9 = sld [smem:[#allocation46_spill]]  ;;  %s3128_s29 = smov [#allocation7]  }
  0x1a   : > { %p2388_p4 = pneg %p3290_p3  ;;  %s3129_s1 = smov [#allocation10]  }
  0x1b   : > { %s574_s4 = sshll.u32 %s3638_s30, 4  ;;  %s600_s30 = sshll.u32 %s3128_s29, 4  ;;  %s575_s4 = int_to_ptr.hbm [resolvable:$true] %s574_s4  ;;  %s601_s30 = int_to_ptr.vmem [resolvable:$true] %s600_s30 }
  0x1c   : > { %p3304_p5 = pnand %p2440_p2, %p2388_p4  ;;  %s626_s24 = sshll.u32 %s3129_s1, 4  ;;  %s627_s24 = int_to_ptr.vmem [resolvable:$true] %s626_s24 }
  0x1d   : > { %s598_s25 = sshll.u32 %s3640_s7, 4  ;;  %s3643_s11 = sld [smem:[#allocation47_spill]]  ;;  %s599_s25 = int_to_ptr.hbm [resolvable:$true] %s598_s25 }
  0x1e   : > { %2394 = dma.hbm_to_vmem [thread:$0]  (!%p3304_p5), %s575_s4, 16, %s577_s5, [#allocation5]  }
  0x1f   : > { %s624_s27 = sshll.u32 %s3641_s9, 4  ;;  %s676_s9 = sshll.u32 %s3614_s13, 4  ;;  %s625_s27 = int_to_ptr.hbm [resolvable:$true] %s624_s27  ;;  %s677_s9 = int_to_ptr.hbm [resolvable:$true] %s676_s9 }
  0x20   : > { %2400 = dma.hbm_to_vmem [thread:$0]  (!%p3304_p5), %s599_s25, 16, %s601_s30, [#allocation8]  }
  0x21   : > { %2406 = dma.hbm_to_vmem [thread:$0]  (!%p3304_p5), %s625_s27, 16, %s627_s24, [#allocation11]  }
  0x22   : > { %s3130_s3 = smov [#allocation13]   ;;  %s3131_s5 = smov [#allocation16]  }
  0x23   : > { %s650_s2 = sshll.u32 %s3643_s11, 4  ;;  %s652_s4 = sshll.u32 %s3130_s3, 4  ;;  %s651_s2 = int_to_ptr.hbm [resolvable:$true] %s650_s2  ;;  %s653_s4 = int_to_ptr.vmem [resolvable:$true] %s652_s4 }
  0x24   : > { %2412 = dma.hbm_to_vmem [thread:$0]  (!%p3304_p5), %s651_s2, 16, %s653_s4, [#allocation14]  }
  0x25   : > { %s678_s25 = sshll.u32 %s3131_s5, 4  ;;  %s700_s6 = sshll.u32 %s3616_s15, 4  ;;  %s679_s25 = int_to_ptr.vmem [resolvable:$true] %s678_s25  ;;  %s701_s6 = int_to_ptr.hbm [resolvable:$true] %s700_s6 }
  0x26   : > { %2418 = dma.hbm_to_vmem [thread:$0]  (!%p3304_p5), %s677_s9, 16, %s679_s25, [#allocation17]  }
  0x27   : > { %s726_s24 = sshll.u32 %s3618_s17, 4  ;;  %s3132_s3 = smov [#allocation19]   ;;  %s727_s24 = int_to_ptr.hbm [resolvable:$true] %s726_s24 }
  0x28   : > { %s702_s26 = sshll.u32 %s3132_s3, 4  ;;  %s3133_s2 = smov [#allocation22]   ;;  %s703_s26 = int_to_ptr.vmem [resolvable:$true] %s702_s26 }
  0x29   : > { %2424 = dma.hbm_to_vmem [thread:$0]  (!%p3304_p5), %s701_s6, 16, %s703_s26, [#allocation20]  }
  0x2a   : > { %s728_s29 = sshll.u32 %s3133_s2, 4  ;;  %s753_s30 = sshll.u32 %s3621_s20, 4  ;;  %s729_s29 = int_to_ptr.vmem [resolvable:$true] %s728_s29  ;;  %s754_s30 = int_to_ptr.hbm [resolvable:$true] %s753_s30 }
  0x2b   : > { %2430 = dma.hbm_to_vmem [thread:$0]  (!%p3304_p5), %s727_s24, 16, %s729_s29, [#allocation23]  }
  0x2c   : > { %s3644_s1 = sld [smem:[#allocation41_spill]]  ;;  %s3134_s27 = smov [#allocation25]  }
  0x2d   : > { %s755_s3 = sshll.u32 %s3134_s27, 4  ;;  %s3135_s6 = smov [#allocation2]   ;;  %s756_s3 = int_to_ptr.vmem [resolvable:$true] %s755_s3 }
  0x2e   : > { %2436 = dma.hbm_to_vmem [thread:$0]  (!%p3304_p5), %s754_s30, 16, %s756_s3, [#allocation26]  }
  0x2f   : > { %s561_s26 = sshll.u32 %s3135_s6, 4  ;;  %s3645_s5 = sld [smem:[#allocation44_spill]]  ;;  %s562_s26 = int_to_ptr.vmem [resolvable:$true] %s561_s26 }
  0x30   : > { %s609_s9 = sshll.u32 %s3609_s8, 4  ;;  %s3136_s25 = smov [#allocation6]   ;;  %s610_s9 = int_to_ptr.hbm [resolvable:$true] %s609_s9 }
  0x31   : > { %s3137_s30 = smov [#allocation9]   ;;  %s3138_s3 = smov 64  }
  0x32   : > { %s559_s7 = sshll.u32 %s3644_s1, 4  ;;  %s588_s1 = sshll.u32 %s3136_s25, 4  ;;  %s560_s7 = int_to_ptr.hbm [resolvable:$true] %s559_s7  ;;  %s589_s1 = int_to_ptr.vmem [resolvable:$true] %s588_s1 }
  0x33   : > { %2391 = dma.hbm_to_vmem [thread:$0]  (!%p3304_p5), %s560_s7, 16, %s562_s26, [#allocation3]  }
  0x34   : > { %s611_s27 = sshll.u32 %s3137_s30, 4  ;;  %s3139_s6 = smov 4   ;;  %s612_s27 = int_to_ptr.vmem [resolvable:$true] %s611_s27 }
  0x35   : > { %s586_s11 = sshll.u32 %s3645_s5, 4  ;;  %s635_s2 = sshll.u32 %s3611_s10, 4  ;;  %s587_s11 = int_to_ptr.hbm [resolvable:$true] %s586_s11  ;;  %s636_s2 = int_to_ptr.hbm [resolvable:$true] %s635_s2 }
  0x36   : > { %2397 = dma.hbm_to_vmem [thread:$0]  (!%p3304_p5), %s587_s11, 16, %s589_s1, [#allocation5]  }
  0x37   : > { %2403 = dma.hbm_to_vmem [thread:$0]  (!%p3304_p5), %s610_s9, 256, %s612_s27, [#allocation8], %s3138_s3, %s3138_s3, %s3139_s6  }
  0x38   : > { %s3140_s4 = smov [#allocation12]   ;;  %s661_s29 = sshll.u32 %s3613_s12, 4  ;;  %s662_s29 = int_to_ptr.hbm [resolvable:$true] %s661_s29 }
  0x39   : > { %s637_s5 = sshll.u32 %s3140_s4, 4  ;;  %s3141_s9 = smov [#allocation15]   ;;  %s638_s5 = int_to_ptr.vmem [resolvable:$true] %s637_s5 }
  0x3a   : > { %2409 = dma.hbm_to_vmem [thread:$0]  (!%p3304_p5), %s636_s2, 256, %s638_s5, [#allocation11], %s3138_s3, %s3138_s3, %s3139_s6  }
  0x3b   : > { %s663_s25 = sshll.u32 %s3141_s9, 4  ;;  %s688_s27 = sshll.u32 %s3615_s14, 4  ;;  %s664_s25 = int_to_ptr.vmem [resolvable:$true] %s663_s25  ;;  %s689_s27 = int_to_ptr.hbm [resolvable:$true] %s688_s27 }
  0x3c   : > { %2415 = dma.hbm_to_vmem [thread:$0]  (!%p3304_p5), %s662_s29, 256, %s664_s25, [#allocation14], %s3138_s3, %s3138_s3, %s3139_s6  }
  0x3d   : > { %s711_s4 = sshll.u32 %s3617_s16, 4  ;;  %s3142_s2 = smov [#allocation18]   ;;  %s712_s4 = int_to_ptr.hbm [resolvable:$true] %s711_s4 }
  0x3e   : > { %s690_s5 = sshll.u32 %s3142_s2, 4  ;;  %s3143_s11 = smov [#allocation21]   ;;  %s691_s5 = int_to_ptr.vmem [resolvable:$true] %s690_s5 }
  0x3f   : > { %2421 = dma.hbm_to_vmem [thread:$0]  (!%p3304_p5), %s689_s27, 16, %s691_s5, [#allocation17]  }
  0x40   : > { %s713_s24 = sshll.u32 %s3143_s11, 4  ;;  %s741_s30 = sshll.u32 %s3620_s19, 4  ;;  %s714_s24 = int_to_ptr.vmem [resolvable:$true] %s713_s24  ;;  %s742_s30 = int_to_ptr.hbm [resolvable:$true] %s741_s30 }
  0x41   : > { %2427 = dma.hbm_to_vmem [thread:$0]  (!%p3304_p5), %s712_s4, 256, %s714_s24, [#allocation20], %s3138_s3, %s3138_s3, %s3139_s6  }
  0x42   : > { %s765_s7 = sshll.u32 %s3622_s21, 4  ;;  %s3144_s26 = smov [#allocation24]   ;;  %s766_s7 = int_to_ptr.hbm [resolvable:$true] %s765_s7 }
  0x43   : > { %s743_s27 = sshll.u32 %s3144_s26, 4  ;;  %s3145_s2 = smov [#allocation27]   ;;  %s744_s27 = int_to_ptr.vmem [resolvable:$true] %s743_s27 }
  0x44   : > { %2433 = dma.hbm_to_vmem [thread:$0]  (!%p3304_p5), %s742_s30, 16, %s744_s27, [#allocation23]  }
  0x45   : > { %s767_s5 = sshll.u32 %s3145_s2, 4  ;;  %794 = sbr.rel (%p3290_p3) target bundleno = 3696 (0xe70), region = 108  ;;  %s768_s5 = int_to_ptr.vmem [resolvable:$true] %s767_s5 }
  0x46   : > { %2439 = dma.hbm_to_vmem [thread:$0]  (!%p3304_p5), %s766_s7, 16, %s768_s5, [#allocation26]  }
  0x4a   : > { %3088 = dma.done.wait (%p2440_p2), [#allocation3], 16  }
  0x4b   : > { %3090 = vsyncadd (%p2440_p2), [#allocation3], 4294967280 }
  0x4c   : > { %3092 = dma.done.wait (%p2440_p2), [#allocation5], 32  }
  0x4d   : > { %3094 = vsyncadd (%p2440_p2), [#allocation5], 4294967264 }
  0x4e   : > { %3096 = dma.done.wait (%p2440_p2), [#allocation8], 272  }
  0x4f   : > { %3098 = vsyncadd (%p2440_p2), [#allocation8], 4294967024 }
  0x50   : > { %3100 = dma.done.wait (%p2440_p2), [#allocation11], 272  }
  0x51   : > { %3102 = vsyncadd (%p2440_p2), [#allocation11], 4294967024 }
  0x52   : > { %3104 = dma.done.wait (%p2440_p2), [#allocation14], 272  }
  0x53   : > { %3106 = vsyncadd (%p2440_p2), [#allocation14], 4294967024 }
  0x54   : > { %3108 = dma.done.wait (%p2440_p2), [#allocation17], 32  }
  0x55   : > { %3110 = vsyncadd (%p2440_p2), [#allocation17], 4294967264 }
  0x56   : > { %3112 = dma.done.wait (%p2440_p2), [#allocation20], 272  }
  0x57   : > { %3114 = vsyncadd (%p2440_p2), [#allocation20], 4294967024 }
  0x58   : > { %3116 = dma.done.wait (%p2440_p2), [#allocation23], 32  }
  0x59   : > { %3118 = vsyncadd (%p2440_p2), [#allocation23], 4294967264 }
  0x5a   : > { %3120 = dma.done.wait (%p2440_p2), [#allocation26], 32  }
  0x5b   : > { %3122 = vsyncadd (%p2440_p2), [#allocation26], 4294967264  ;;  %p939_p6 = scmp.lt.s32.totalorder %s3285_s0, 1  ;;  %s3646_s6 = sld [smem:[#allocation38_spill]]  ;;  %vm975_vm0 = vcmask 261120   ;;  %vm995_vm1 = vcmask 64512  }
  0x5c   : > { %s3647_s9 = sld [smem:[#allocation40_spill]]  ;;  %v2516_v4 = vld [vmem:[#allocation2] ss:$0 sm:$0xff]  ;;  %s3147_s29 = smov 120   ;;  %vm1269_vm2 = vcmask 130048   ;;  %vm1271_vm3 = vcmask 195584  }
  0x5d   : > { %s3652_s0 = smov (!%p939_p6, %s3285_s0), 1  ;;  %s3148_s25 = smov 96  }
  0x5e   : > { %s3436_s23 = sshll.u32 %s3652_s0, 3  ;;  %s3146_s0 = smov 64  }
  0x5f   : > { %s3149_s7 = smov 56   ;;  %s3150_s26 = smov 88  }
  0x60   : > { %s3151_s27 = smov 72   ;;  %s3152_s2 = smov 80  }
  0x61   : > { %s942_s4 = scalar_lea.vmem %s3646_s6, %s3436_s23  ;;  %s3153_s5 = smov 112  }
  0x62   : > { %v2305_v0 = vld [vmem:[%s3647_s9 + $0x8] sm:$0xff]  ;;  %v2304_v1 = vld [vmem:[%s3647_s9] sm:$0xff]  ;;  %s3154_s28 = smov 104   ;;  %s3155_s3 = smov 40  }
  0x63   : > { %v3448_v2 = vld [vmem:[%s942_s4] sm:$0xff]  ;;  %985 = vmatpush.bf16.msra.mxu0 %v2305_v0  ;;  %s3156_s6 = smov 8   ;;  %s3157_s4 = smov 48  }
  0x64   : > { %v959_v3 = vpack.c.bf16 %v3448_v2, %v3448_v2  ;;  %s3158_s11 = smov 24   ;;  %s3159_s24 = smov 16  }
  0x65   : > { %s3649_s30 = sld [smem:[#allocation39_spill]] }
  0x67   : > { %986 = vmatpush.bf16.msra.mxu0 %v2304_v1 }
  0x6a   : > { %2215 = vmatmul.msk.bf16.vlgmr.msra.gmra.mxu0 %vm975_vm0, %v959_v3 }
  0xe7   : > { %v988_v5 = vpop.f32.mrf.mxu0 }
  0xe8   : > { %v3453_v6 = vadd.f32 %v2516_v4, %v988_v5 }
  0xea   : > { %1032 = vrot.lane.b32.xlu2 %v3453_v6, %s3146_s0  ;;  %1058 = vrot.lane.b32.xlu1 %v3453_v6, %s3147_s29  ;;  %s3648_s0 = sld [smem:[#allocation42_spill]] }
  0xeb   : > { %993 = vrot.lane.b32.xlu0 %v3453_v6, %s3148_s25 }
  0xef   : > { %v990_v7 = vpop.f32.mrf.mxu0 }
  0xf0   : > { %v2307_v4 = vld [vmem:[%s3648_s0 + $0x8] sm:$0xff]  ;;  %v2306_v5 = vld [vmem:[%s3648_s0] sm:$0xff] }
  0xf2   : > { %1098 = vrot.lane.b32.xlu2 %v3453_v6, %s3149_s7  ;;  %s946_s7 = scalar_lea.vmem %s3649_s30, %s3436_s23 }
  0xf3   : > { %1060 = vrot.lane.b32.xlu0 %v3453_v6, %s3150_s26 }
 0x144   : > { %v1033_v8 = vpop.permute.xlu2 %1032 }
 0x145   : > { %1053 = vmatpush.msra.mxu2 %v1033_v8 }
 0x14c   : > { %v1099_v9 = vpop.permute.xlu2 %1098 }
 0x14d   : > { %1119 = vmatpush.msrb.mxu2 %v1099_v9 }
 0x15c   : > { %v1059_v12 = vpop.permute.xlu1 %1058 }
 0x15d   : > { %v994_v10 = vpop.permute.xlu0 %993 }
 0x15e   : > { %2216 = vmatpush.xpose.msk.msra.mxu1 %vm995_vm1, %v994_v10 }
 0x161   : > { %2217 = vmatmul.msk.f32.vlgmr.msra.gmra.mxu1 %vm995_vm1, %v3453_v6 }
 0x165   : > { %v1061_v11 = vpop.permute.xlu0 %1060 }
 0x166   : > { %2219 = vmatpush.xpose.msk.msrb.mxu0 %vm995_vm1, %v1061_v11 }
 0x169   : > { %2220 = vmatmul.msk.f32.vlgmr.msrb.gmra.mxu0 %vm995_vm1, %v1059_v12 }
 0x1de   : > { %v1017_v13 = vpop.f32.mrf.mxu1 }
 0x1df   : > { %v1020_v14 = vmul.f32 0.35355338, %v1017_v13  ;;  %v2517_v13 = vld [vmem:[#allocation4] ss:$0 sm:$0xff] }
 0x1e1   : > { %v1021_v15 = vsel %vm995_vm1, %v1020_v14, -inf }
 0x1e2   : > { %1022 = vmax.xlane.f32.xlu1 %v1021_v15 }
 0x1e6   : > { %v1083_v16 = vpop.f32.mrf.mxu0 }
 0x1e7   : > { %v1086_v17 = vmul.f32 0.35355338, %v1083_v16 }
 0x1e9   : > { %v1087_v18 = vsel %vm995_vm1, %v1086_v17, -inf }
 0x1ea   : > { %1088 = vmax.xlane.f32.xlu2 %v1087_v18 }
 0x1fb   : > { %1192 = vrot.lane.b32.xlu1 %v3453_v6, %s3151_s27 }
 0x202   : > { %1126 = vrot.lane.b32.xlu2 %v3453_v6, %s3152_s2 }
 0x255   : > { %v1023_v19 = vpop.xlane.xlu1 %1022 }
 0x256   : > { %v1024_v20 = vsub.f32 %v1020_v14, %v1023_v19  ;;  %v3160_v19 = vmov 32.0  }
 0x258   : > { %v1025_v21 = vmul.f32 1.442695, %v1024_v20  ;;  %v2311_v20 = vld [vmem:[#allocation12 + $0x8] sm:$0xff] }
 0x25a   : > { %2529 = vpow2.f32 %v1025_v21  ;;  %v953_v21 = vld [vmem:[%s946_s7] sm:$0xff] }
 0x25d   : > { %v1089_v22 = vpop.xlane.xlu2 %1088 }
 0x25e   : > { %v1090_v23 = vsub.f32 %v1086_v17, %v1089_v22  ;;  %v2310_v22 = vld [vmem:[#allocation12] sm:$0xff] }
 0x260   : > { %v2530_v24 = vpop.eup %2529  ;;  %v1091_v25 = vmul.f32 1.442695, %v1090_v23 }
 0x261   : > { %v1027_v26 = vsel %vm995_vm1, %v2530_v24, 0.0 }
 0x262   : > { %2531 = vpow2.f32 %v1091_v25  ;;  %1028 = vadd.xlane.f32.xlu2 %v1027_v26 }
 0x265   : > { %v1127_v27 = vpop.permute.xlu2 %1126 }
 0x266   : > { %2222 = vmatpush.xpose.msk.msrb.mxu1 %vm995_vm1, %v1127_v27 }
 0x268   : > { %v2532_v28 = vpop.eup %2531 }
 0x269   : > { %v1093_v29 = vsel %vm995_vm1, %v2532_v28, 0.0 }
 0x26a   : > { %1094 = vadd.xlane.f32.xlu0 %v1093_v29 }
 0x26d   : > { %v1193_v35 = vpop.permute.xlu1 %1192 }
 0x27a   : > { %1124 = vrot.lane.b32.xlu2 %v3453_v6, %s3153_s5 }
 0x27e   : > { %1190 = vrot.lane.b32.xlu0 %v3453_v6, %s3154_s28 }
 0x2d5   : > { %v1029_v30 = vpop.xlane.xlu2 %1028 }
 0x2d6   : > { %2533 = vrcp.f32 %v1029_v30 }
 0x2dc   : > { %v2534_v31 = vpop.eup %2533 }
 0x2dd   : > { %v1095_v32 = vpop.xlane.xlu0 %1094  ;;  %v1125_v33 = vpop.permute.xlu2 %1124  ;;  %v1031_v34 = vmul.f32 %v2534_v31, %v2530_v24  ;;  %v1392_v24 = vpack.c.bf16 %v953_v21, %v953_v21 }
 0x2de   : > { %2535 = vrcp.f32 %v1095_v32  ;;  %2223 = vmatmul.msk.f32.vlgmr.msrb.gmra.mxu1 %vm995_vm1, %v1125_v33 }
 0x2df   : > { %2218 = vmatmul.msk.f32.vlgmr.msra.gmra.mxu2 %vm995_vm1, %v1031_v34  ;;  %v2309_v34 = vld [vmem:[#allocation9 + $0x8] sm:$0xff] }
 0x2e0   : > { %2225 = vmatpush.xpose.msk.msra.mxu2 %vm995_vm1, %v1193_v35  ;;  %1380 = vmatpush.bf16.msra.mxu0 %v2309_v34  ;;  %v2308_v35 = vld [vmem:[#allocation9] sm:$0xff] }
 0x2e4   : > { %v2536_v36 = vpop.eup %2535  ;;  %1381 = vmatpush.bf16.msra.mxu0 %v2308_v35 }
 0x2e5   : > { %v1097_v37 = vmul.f32 %v2536_v36, %v2532_v28  ;;  %v2520_v36 = vld [vmem:[#allocation13] ss:$0 sm:$0xff] }
 0x2e7   : > { %2221 = vmatmul.msk.f32.vlgmr.msrb.gmra.mxu2 %vm995_vm1, %v1097_v37 }
 0x2e8   : > { %1417 = vmatpush.bf16.msrb.mxu2 %v2311_v20 }
 0x2ec   : > { %1418 = vmatpush.bf16.msrb.mxu2 %v2310_v22 }
 0x2f0   : > { %v1191_v38 = vpop.permute.xlu0 %1190 }
 0x2f1   : > { %2226 = vmatmul.msk.f32.vlgmr.msra.gmra.mxu2 %vm995_vm1, %v1191_v38 }
 0x2f9   : > { %2254 = vmatmul.msk.bf16.vlgmr.msrb.gmra.mxu2 %vm975_vm0, %v1392_v24 }
 0x35b   : > { %v1149_v39 = vpop.f32.mrf.mxu1 }
 0x35c   : > { %v1152_v40 = vmul.f32 0.35355338, %v1149_v39 }
 0x35e   : > { %v1153_v41 = vsel %vm995_vm1, %v1152_v40, -inf }
 0x35f   : > { %1154 = vmax.xlane.f32.xlu2 %v1153_v41 }
 0x362   : > { %v1055_v42 = vpop.f32.mrf.mxu2 }
 0x36a   : > { %v1121_v43 = vpop.f32.mrf.mxu2 }
 0x374   : > { %v1215_v44 = vpop.f32.mrf.mxu2 }
 0x375   : > { %v1218_v45 = vmul.f32 0.35355338, %v1215_v44 }
 0x377   : > { %v1219_v46 = vsel %vm995_vm1, %v1218_v45, -inf }
 0x378   : > { %1220 = vmax.xlane.f32.xlu1 %v1219_v46 }
 0x37c   : > { %v1420_v37 = vpop.f32.mrf.mxu2 }
 0x391   : > { %1230 = vrot.lane.b32.xlu1 %v3453_v6, %s3155_s3  ;;  %s950_s3 = scalar_lea.vmem %s3623_s22, %s3436_s23 }
 0x3d2   : > { %v1155_v47 = vpop.xlane.xlu2 %1154 }
 0x3d3   : > { %v1156_v48 = vsub.f32 %v1152_v40, %v1155_v47  ;;  %v3519_v40 = vadd.f32 %v2520_v36, %v1420_v37 }
 0x3d5   : > { %v1157_v49 = vmul.f32 1.442695, %v1156_v48 }
 0x3d7   : > { %2537 = vpow2.f32 %v1157_v49  ;;  %v2518_v49 = vld [vmem:[#allocation6] ss:$0 sm:$0xff] }
 0x3dd   : > { %v2538_v50 = vpop.eup %2537 }
 0x3de   : > { %v1159_v51 = vsel %vm995_vm1, %v2538_v50, 0.0 }
 0x3df   : > { %1160 = vadd.xlane.f32.xlu0 %v1159_v51  ;;  %v2519_v51 = vld [vmem:[#allocation7] ss:$0 sm:$0xff] }
 0x3eb   : > { %v1221_v52 = vpop.xlane.xlu1 %1220 }
 0x3ec   : > { %v1222_v53 = vsub.f32 %v1218_v45, %v1221_v52 }
 0x3ee   : > { %v1223_v54 = vmul.f32 1.442695, %v1222_v53 }
 0x3f0   : > { %2539 = vpow2.f32 %v1223_v54 }
 0x3f3   : > { %1257 = vrot.lane.b32.xlu0 %v1121_v43, %s3156_s6 }
 0x3f6   : > { %v2540_v55 = vpop.eup %2539 }
 0x3f7   : > { %v1225_v56 = vsel %vm995_vm1, %v2540_v55, 0.0 }
 0x3f8   : > { %1226 = vadd.xlane.f32.xlu2 %v1225_v56 }
 0x403   : > { %v1231_v57 = vpop.permute.xlu1 %1230 }
 0x404   : > { %1251 = vmatpush.msra.mxu1 %v1231_v57 }
 0x406   : > { %2255 = vmatpush.xpose.msk.msrb.mxu1 %vm995_vm1, %v3519_v40 }
 0x410   : > { %1164 = vrot.lane.b32.xlu2 %v3453_v6, %s3157_s4 }
 0x452   : > { %v1161_v58 = vpop.xlane.xlu0 %1160 }
 0x453   : > { %2541 = vrcp.f32 %v1161_v58 }
 0x459   : > { %v2542_v60 = vpop.eup %2541 }
 0x45a   : > { %v1163_v0 = vmul.f32 %v2542_v60, %v2538_v50 }
 0x465   : > { %v1258_v6 = vpop.permute.xlu0 %1257 }
 0x466   : > { %v1268_v8 = vsel %vm995_vm1, %v1055_v42, %v1258_v6  ;;  %v1422_v42 = vpop.f32.mrf.mxu2 }
 0x46b   : > { %v1227_v59 = vpop.xlane.xlu2 %1226 }
 0x46c   : > { %2543 = vrcp.f32 %v1227_v59  ;;  %v2521_v59 = vld [vmem:[#allocation10] ss:$0 sm:$0xff] }
 0x46d   : > { %2545 = vrcp.f32 %v3160_v19 }
 0x472   : > { %v2544_v61 = vpop.eup %2543 }
 0x473   : > { %v1229_v62 = vmul.f32 %v2544_v61, %v2540_v55  ;;  %v1165_v63 = vpop.permute.xlu2 %1164  ;;  %v2546_v23 = vpop.eup %2545 }
 0x474   : > { %1185 = vmatpush.msra.mxu3 %v1165_v63  ;;  %v1317_v25 = vmul.f32 32.0, %v2546_v23  ;;  %vm1321_vm4 = vweird.f32 %v2546_v23 }
 0x475   : > { %2224 = vmatmul.msk.f32.vlgmr.msra.gmra.mxu3 %vm995_vm1, %v1163_v0  ;;  %2227 = vmatmul.msk.f32.vlgmr.msra.gmra.mxu1 %vm995_vm1, %v1229_v62 }
 0x476   : > { %1303 = vmatpush.bf16.msrb.mxu3 %v2307_v4 }
 0x47a   : > { %1304 = vmatpush.bf16.msrb.mxu3 %v2306_v5 }
 0x4f2   : > { %v1253_v1 = vpop.f32.mrf.mxu1 }
 0x4f3   : > { %1265 = vrot.lane.b32.xlu0 %v1253_v1, %s3158_s11 }
 0x4f8   : > { %v1187_v3 = vpop.f32.mrf.mxu3 }
 0x4f9   : > { %1261 = vrot.lane.b32.xlu2 %v1187_v3, %s3159_s24 }
 0x4fb   : > { %1490 = vrot.lane.b32.xlu0 %v3519_v40, %s3147_s29 }
 0x503   : > { %1556 = vrot.lane.b32.xlu0 %v3519_v40, %s3153_s5 }
 0x50b   : > { %1622 = vrot.lane.b32.xlu0 %v3519_v40, %s3154_s28 }
 0x553   : > { %v1262_v7 = vpop.permute.xlu2 %1261 }
 0x554   : > { %v1270_v9 = vsel %vm1269_vm2, %v1268_v8, %v1262_v7 }
 0x565   : > { %v1266_v10 = vpop.permute.xlu0 %1265 }
 0x566   : > { %v1272_v11 = vsel %vm1271_vm3, %v1270_v9, %v1266_v10 }
 0x567   : > { %v1278_v12 = vpack.c.bf16 %v1272_v11, %v1272_v11 }
 0x569   : > { %2236 = vmatmul.msk.bf16.vlgmr.msrb.gmra.mxu3 %vm975_vm0, %v1278_v12 }
 0x56d   : > { %v1491_v56 = vpop.permute.xlu0 %1490 }
 0x56e   : > { %2258 = vmatpush.xpose.msk.msra.mxu3 %vm995_vm1, %v1491_v56  ;;  %v2313_v56 = vld [vmem:[#allocation15 + $0x8] sm:$0xff] }
 0x575   : > { %v1557_v57 = vpop.permute.xlu0 %1556 }
 0x576   : > { %2261 = vmatpush.xpose.msk.msra.mxu2 %vm995_vm1, %v1557_v57  ;;  %v2312_v57 = vld [vmem:[#allocation15] sm:$0xff] }
 0x57a   : > { %1731 = vmatpush.bf16.msrb.mxu2 %v2313_v56 }
 0x57d   : > { %v1623_v58 = vpop.permute.xlu0 %1622 }
 0x57e   : > { %2264 = vmatpush.xpose.msk.msrb.mxu3 %vm995_vm1, %v1623_v58  ;;  %1732 = vmatpush.bf16.msrb.mxu2 %v2312_v57 }
 0x5ec   : > { %v1306_v14 = vpop.f32.mrf.mxu3 }
 0x5ed   : > { %v1307_v15 = vadd.f32 %v2517_v13, %v1306_v14 }
 0x5ef   : > { %v1310_v16 = vadd.f32 %v1307_v15, %v3448_v2  ;;  %v1318_v2 = vsub.f32 1.0, %v1317_v25 }
 0x5f1   : > { %v1313_v17 = vsel %vm975_vm0, %v1310_v16, 0.0  ;;  %v1319_v26 = vmul.f32 %v2546_v23, %v1318_v2 }
 0x5f2   : > { %1314 = vadd.xlane.f32.xlu1 %v1313_v17 }
 0x5f3   : > { %v1320_v27 = vadd.f32 %v2546_v23, %v1319_v26 }
 0x5f4   : > { %v1308_v18 = vpop.f32.mrf.mxu3 }
 0x5f5   : > { %v3514_v28 = vsel %vm1321_vm4, %v2546_v23, %v1320_v27 }
 0x665   : > { %v1315_v29 = vpop.xlane.xlu1 %1314 }
 0x666   : > { %v1323_v30 = vmul.f32 %v3514_v28, %v1315_v29 }
 0x668   : > { %v1324_v31 = vsub.f32 %v1310_v16, %v1323_v30 }
 0x66a   : > { %v1325_v32 = vmul.f32 %v1324_v31, %v1324_v31 }
 0x66c   : > { %v1326_v33 = vsel %vm975_vm0, %v1325_v32, 0.0 }
 0x66d   : > { %1327 = vadd.xlane.f32.xlu2 %v1326_v33 }
 0x6e0   : > { %v1328_v38 = vpop.xlane.xlu2 %1327 }
 0x6e1   : > { %v1329_v39 = vmul.f32 %v1328_v38, %v3514_v28 }
 0x6e3   : > { %v1330_v41 = vadd.f32 1e-12, %v1329_v39 }
 0x6e5   : > { %2547 = vrsqrt.f32 %v1330_v41  ;;  %vm1337_vm6 = vweird.f32 %v1330_v41 }
 0x6eb   : > { %v2548_v43 = vpop.eup %2547 }
 0x6ec   : > { %v1332_v44 = vmul.f32 %v2548_v43, %v1330_v41  ;;  %vm1338_vm5 = vweird.f32 %v2548_v43 }
 0x6ed   : > { %vm1339_vm7 = vmor %vm1337_vm6, %vm1338_vm5 }
 0x6ee   : > { %v1333_v45 = vmul.f32 %v2548_v43, %v1332_v44 }
 0x6f0   : > { %v1334_v46 = vmul.f32 0.5, %v1333_v45 }
 0x6f2   : > { %v1335_v47 = vsub.f32 1.5, %v1334_v46 }
 0x6f4   : > { %v1336_v48 = vmul.f32 %v2548_v43, %v1335_v47 }
 0x6f6   : > { %v1340_v50 = vsel %vm1339_vm7, %v2548_v43, %v1336_v48 }
 0x6f7   : > { %v1341_v52 = vmul.f32 %v1340_v50, %v1324_v31 }
 0x6f9   : > { %v1345_v53 = vmul.f32 %v2518_v49, %v1341_v52 }
 0x6fb   : > { %v3529_v54 = vadd.f32 %v2519_v51, %v1345_v53 }
 0x6fd   : > { %v1355_v55 = vpack.c.bf16 %v3529_v54, %v3529_v54 }
 0x6ff   : > { %2245 = vmatmul.msk.bf16.vlgmr.msra.gmra.mxu0 %vm975_vm0, %v1355_v55 }
 0x77c   : > { %v1383_v60 = vpop.f32.mrf.mxu0 }
 0x77d   : > { %v1384_v61 = vadd.f32 %v2521_v59, %v1383_v60 }
 0x77f   : > { %1620 = vrot.lane.b32.xlu1 %v1384_v61, %s3154_s28  ;;  %1488 = vrot.lane.b32.xlu0 %v1384_v61, %s3147_s29 }
 0x780   : > { %2256 = vmatmul.msk.f32.vlgmr.msrb.gmra.mxu1 %vm995_vm1, %v1384_v61 }
 0x784   : > { %v1385_v62 = vpop.f32.mrf.mxu0 }
 0x787   : > { %1554 = vrot.lane.b32.xlu0 %v1384_v61, %s3153_s5 }
 0x7f1   : > { %v1489_v63 = vpop.permute.xlu0 %1488  ;;  %v1621_v0 = vpop.permute.xlu1 %1620 }
 0x7f2   : > { %2259 = vmatmul.msk.f32.vlgmr.msra.gmra.mxu3 %vm995_vm1, %v1489_v63 }
 0x7f9   : > { %v1555_v1 = vpop.permute.xlu0 %1554 }
 0x7fa   : > { %2262 = vmatmul.msk.f32.vlgmr.msra.gmra.mxu2 %vm995_vm1, %v1555_v1  ;;  %2265 = vmatmul.msk.f32.vlgmr.msrb.gmra.mxu3 %vm995_vm1, %v1621_v0  ;;  %v2522_v1 = vld [vmem:[#allocation16] ss:$0 sm:$0xff] }
 0x7fd   : > { %v1447_v3 = vpop.f32.mrf.mxu1 }
 0x7fe   : > { %v1450_v4 = vmul.f32 0.35355338, %v1447_v3 }
 0x800   : > { %v1451_v5 = vsel %vm995_vm1, %v1450_v4, -inf }
 0x801   : > { %1452 = vmax.xlane.f32.xlu2 %v1451_v5 }
 0x874   : > { %v1453_v6 = vpop.xlane.xlu2 %1452 }
 0x875   : > { %v1454_v7 = vsub.f32 %v1450_v4, %v1453_v6  ;;  %v1513_v8 = vpop.f32.mrf.mxu3 }
 0x876   : > { %v1516_v9 = vmul.f32 0.35355338, %v1513_v8 }
 0x877   : > { %v1455_v10 = vmul.f32 1.442695, %v1454_v7 }
 0x878   : > { %v1517_v11 = vsel %vm995_vm1, %v1516_v9, -inf }
 0x879   : > { %2549 = vpow2.f32 %v1455_v10  ;;  %1518 = vmax.xlane.f32.xlu0 %v1517_v11 }
 0x87d   : > { %v1579_v12 = vpop.f32.mrf.mxu2  ;;  %v1645_v17 = vpop.f32.mrf.mxu3 }
 0x87e   : > { %v1582_v13 = vmul.f32 0.35355338, %v1579_v12  ;;  %v1648_v18 = vmul.f32 0.35355338, %v1645_v17 }
 0x87f   : > { %v2550_v14 = vpop.eup %2549 }
 0x880   : > { %v1457_v15 = vsel %vm995_vm1, %v2550_v14, 0.0  ;;  %v1583_v16 = vsel %vm995_vm1, %v1582_v13, -inf  ;;  %v1649_v19 = vsel %vm995_vm1, %v1648_v18, -inf }
 0x881   : > { %1458 = vadd.xlane.f32.xlu1 %v1457_v15  ;;  %1584 = vmax.xlane.f32.xlu2 %v1583_v16 }
 0x889   : > { %1650 = vmax.xlane.f32.xlu2 %v1649_v19 }
 0x89a   : > { %1660 = vrot.lane.b32.xlu1 %v3519_v40, %s3151_s27 }
 0x8a1   : > { %1462 = vrot.lane.b32.xlu2 %v3519_v40, %s3148_s25 }
 0x8ec   : > { %v1519_v20 = vpop.xlane.xlu0 %1518 }
 0x8ed   : > { %v1520_v21 = vsub.f32 %v1516_v9, %v1519_v20 }
 0x8ef   : > { %v1521_v22 = vmul.f32 1.442695, %v1520_v21 }
 0x8f1   : > { %2551 = vpow2.f32 %v1521_v22 }
 0x8f4   : > { %v1585_v23 = vpop.xlane.xlu2 %1584  ;;  %v1459_v26 = vpop.xlane.xlu1 %1458 }
 0x8f5   : > { %v1586_v24 = vsub.f32 %v1582_v13, %v1585_v23  ;;  %v2315_v13 = vld [vmem:[#allocation21 + $0x8] sm:$0xff]  ;;  %v2523_v23 = vld [vmem:[#allocation18] ss:$0 sm:$0xff] }
 0x8f7   : > { %v2552_v25 = vpop.eup %2551  ;;  %v1587_v2 = vmul.f32 1.442695, %v1586_v24 }
 0x8f8   : > { %v1523_v27 = vsel %vm995_vm1, %v2552_v25, 0.0 }
 0x8f9   : > { %2553 = vpow2.f32 %v1587_v2  ;;  %1524 = vadd.xlane.f32.xlu2 %v1523_v27 }
 0x8fa   : > { %2555 = vrcp.f32 %v1459_v26 }
 0x8fc   : > { %v1651_v29 = vpop.xlane.xlu2 %1650 }
 0x8fd   : > { %v1652_v30 = vsub.f32 %v1648_v18, %v1651_v29 }
 0x8ff   : > { %v2554_v31 = vpop.eup %2553  ;;  %v1653_v32 = vmul.f32 1.442695, %v1652_v30  ;;  %v2525_v30 = vld [vmem:[#allocation22] ss:$0 sm:$0xff] }
 0x900   : > { %v1589_v33 = vsel %vm995_vm1, %v2554_v31, 0.0  ;;  %v2556_v34 = vpop.eup %2555 }
 0x901   : > { %2557 = vpow2.f32 %v1653_v32  ;;  %1590 = vadd.xlane.f32.xlu2 %v1589_v33  ;;  %v1461_v35 = vmul.f32 %v2556_v34, %v2550_v14  ;;  %v2314_v14 = vld [vmem:[#allocation21] sm:$0xff] }
 0x904   : > { %v1463_v36 = vpop.permute.xlu2 %1462 }
 0x905   : > { %1483 = vmatpush.msra.mxu1 %v1463_v36 }
 0x906   : > { %2257 = vmatmul.msk.f32.vlgmr.msra.gmra.mxu1 %vm995_vm1, %v1461_v35 }
 0x907   : > { %v2558_v37 = vpop.eup %2557 }
 0x908   : > { %v1655_v38 = vsel %vm995_vm1, %v2558_v37, 0.0 }
 0x909   : > { %1656 = vadd.xlane.f32.xlu0 %v1655_v38  ;;  %v2319_v38 = vld [vmem:[%s3619_s18 + $0x18] sm:$0xff] }
 0x90a   : > { %1893 = vmatpush.bf16.msra.mxu3 %v2319_v38 }
 0x90c   : > { %v1661_v49 = vpop.permute.xlu1 %1660 }
 0x919   : > { %1594 = vrot.lane.b32.xlu2 %v3519_v40, %s3152_s2 }
 0x91d   : > { %1528 = vrot.lane.b32.xlu0 %v3519_v40, %s3150_s26 }
 0x96c   : > { %v1525_v39 = vpop.xlane.xlu2 %1524 }
 0x974   : > { %v1591_v41 = vpop.xlane.xlu2 %1590 }
 0x975   : > { %2559 = vrcp.f32 %v1591_v41 }
 0x976   : > { %2561 = vrcp.f32 %v1525_v39  ;;  %v2318_v39 = vld [vmem:[%s3619_s18 + $0x10] sm:$0xff] }
 0x977   : > { %1894 = vmatpush.bf16.msra.mxu3 %v2318_v39 }
 0x97b   : > { %v2560_v42 = vpop.eup %2559 }
 0x97c   : > { %v1593_v43 = vmul.f32 %v2560_v42, %v2554_v31  ;;  %v1595_v44 = vpop.permute.xlu2 %1594  ;;  %v1657_v45 = vpop.xlane.xlu0 %1656 }
 0x97d   : > { %1615 = vmatpush.msrb.mxu1 %v1595_v44  ;;  %v2562_v46 = vpop.eup %2561  ;;  %2563 = vrcp.f32 %v1657_v45 }
 0x97e   : > { %2263 = vmatmul.msk.f32.vlgmr.msrb.gmra.mxu1 %vm995_vm1, %v1593_v43  ;;  %v1527_v47 = vmul.f32 %v2562_v46, %v2552_v25  ;;  %v2524_v25 = vld [vmem:[#allocation19] ss:$0 sm:$0xff]  ;;  %v2317_v43 = vld [vmem:[%s3619_s18 + $0x8] sm:$0xff] }
 0x97f   : > { %1801 = vmatpush.bf16.msra.mxu1 %v2315_v13  ;;  %1895 = vmatpush.bf16.msra.mxu3 %v2317_v43 }
 0x983   : > { %v2564_v40 = vpop.eup %2563  ;;  %v1485_v51 = vpop.f32.mrf.mxu1  ;;  %1802 = vmatpush.bf16.msra.mxu1 %v2314_v14 }
 0x984   : > { %v1659_v50 = vmul.f32 %v2564_v40, %v2558_v37 }
 0x98f   : > { %v1529_v48 = vpop.permute.xlu0 %1528 }
 0x990   : > { %1549 = vmatpush.msrb.mxu0 %v1529_v48  ;;  %v2316_v48 = vld [vmem:[%s3619_s18] sm:$0xff] }
 0x991   : > { %2260 = vmatmul.msk.f32.vlgmr.msrb.gmra.mxu0 %vm995_vm1, %v1527_v47  ;;  %1896 = vmatpush.bf16.msra.mxu3 %v2316_v48 }
 0x992   : > { %1681 = vmatpush.msra.mxu0 %v1661_v49 }
 0x999   : > { %2266 = vmatmul.msk.f32.vlgmr.msra.gmra.mxu0 %vm995_vm1, %v1659_v50 }
 0x9fb   : > { %v1617_v52 = vpop.f32.mrf.mxu1 }
 0x9fc   : > { %1691 = vrot.lane.b32.xlu2 %v1617_v52, %s3159_s24 }
 0xa0e   : > { %v1551_v53 = vpop.f32.mrf.mxu0 }
 0xa0f   : > { %1687 = vrot.lane.b32.xlu0 %v1551_v53, %s3156_s6 }
 0xa16   : > { %v1683_v55 = vpop.f32.mrf.mxu0 }
 0xa17   : > { %1695 = vrot.lane.b32.xlu0 %v1683_v55, %s3158_s11 }
 0xa56   : > { %v1692_v60 = vpop.permute.xlu2 %1691 }
 0xa81   : > { %v1688_v58 = vpop.permute.xlu0 %1687 }
 0xa82   : > { %v1698_v59 = vsel %vm995_vm1, %v1485_v51, %v1688_v58  ;;  %vm1885_vm1 = vcmask 523264  }
 0xa83   : > { %v1699_v62 = vsel %vm1269_vm2, %v1698_v59, %v1692_v60 }
 0xa89   : > { %v1696_v61 = vpop.permute.xlu0 %1695 }
 0xa8a   : > { %v1700_v63 = vsel %vm1271_vm3, %v1699_v62, %v1696_v61 }
 0xa8b   : > { %v1706_v0 = vpack.c.bf16 %v1700_v63, %v1700_v63 }
 0xa8d   : > { %2275 = vmatmul.msk.bf16.vlgmr.msrb.gmra.mxu2 %vm975_vm0, %v1706_v0 }
 0xb10   : > { %v1734_v3 = vpop.f32.mrf.mxu2 }
 0xb11   : > { %v1735_v4 = vadd.f32 %v2522_v1, %v1734_v3 }
 0xb13   : > { %v1738_v5 = vadd.f32 %v1735_v4, %v3529_v54 }
 0xb15   : > { %v1741_v6 = vsel %vm975_vm0, %v1738_v5, 0.0 }
 0xb16   : > { %1742 = vadd.xlane.f32.xlu2 %v1741_v6 }
 0xb18   : > { %v1736_v7 = vpop.f32.mrf.mxu2 }
 0xb89   : > { %v1743_v8 = vpop.xlane.xlu2 %1742 }
 0xb8a   : > { %v1744_v9 = vmul.f32 %v1743_v8, %v3514_v28 }
 0xb8c   : > { %v1745_v10 = vsub.f32 %v1738_v5, %v1744_v9 }
 0xb8e   : > { %v1746_v11 = vmul.f32 %v1745_v10, %v1745_v10 }
 0xb90   : > { %v1747_v12 = vsel %vm975_vm0, %v1746_v11, 0.0  ;;  %v2526_v11 = vld [vmem:[#allocation24] ss:$0 sm:$0xff] }
 0xb91   : > { %1748 = vadd.xlane.f32.xlu0 %v1747_v12 }
 0xc04   : > { %v1749_v15 = vpop.xlane.xlu0 %1748 }
 0xc05   : > { %v1750_v16 = vmul.f32 %v1749_v15, %v3514_v28 }
 0xc07   : > { %v1751_v54 = vadd.f32 1e-12, %v1750_v16 }
 0xc09   : > { %2565 = vrsqrt.f32 %v1751_v54  ;;  %vm1758_vm9 = vweird.f32 %v1751_v54 }
 0xc0f   : > { %v2566_v17 = vpop.eup %2565 }
 0xc10   : > { %v1753_v18 = vmul.f32 %v2566_v17, %v1751_v54  ;;  %vm1759_vm8 = vweird.f32 %v2566_v17 }
 0xc11   : > { %vm1760_vm10 = vmor %vm1758_vm9, %vm1759_vm8 }
 0xc12   : > { %v1754_v19 = vmul.f32 %v2566_v17, %v1753_v18 }
 0xc14   : > { %v1755_v20 = vmul.f32 0.5, %v1754_v19 }
 0xc16   : > { %v1756_v21 = vsub.f32 1.5, %v1755_v20 }
 0xc18   : > { %v1757_v22 = vmul.f32 %v2566_v17, %v1756_v21 }
 0xc1a   : > { %v1761_v24 = vsel %vm1760_vm10, %v2566_v17, %v1757_v22 }
 0xc1b   : > { %v1762_v2 = vmul.f32 %v1761_v24, %v1745_v10 }
 0xc1d   : > { %v1766_v26 = vmul.f32 %v2523_v23, %v1762_v2 }
 0xc1f   : > { %v1770_v27 = vadd.f32 %v2524_v25, %v1766_v26 }
 0xc21   : > { %v1776_v29 = vpack.c.bf16 %v1770_v27, %v1770_v27 }
 0xc23   : > { %2284 = vmatmul.msk.bf16.vlgmr.msra.gmra.mxu1 %vm975_vm0, %v1776_v29 }
 0xca0   : > { %v1804_v31 = vpop.f32.mrf.mxu1 }
 0xca1   : > { %v1805_v32 = vadd.f32 %v2525_v30, %v1804_v31  ;;  %v2527_v30 = vld [vmem:[#allocation25] ss:$0 sm:$0xff] }
 0xca3   : > { %v1809_v33 = vmul.f32 0.70710677, %v1805_v32  ;;  %v1808_v7 = vmul.f32 0.5, %v1805_v32  ;;  %v2528_v32 = vld [vmem:[#allocation27] ss:$0 sm:$0xff] }
 0xca5   : > { %v1810_v34 = vand.u32 2147483647, %v1809_v33  ;;  %vm1843_vm15 = vcmp.ge.f32.partialorder %v1809_v33, 0.0 }
 0xca7   : > { %v1811_v35 = vmul.f32 0.3275911, %v1810_v34  ;;  %v1837_v52 = vsub.f32 0.0, %v1810_v34 }
 0xca8   : > { %v1806_v36 = vpop.f32.mrf.mxu1 }
 0xca9   : > { %v1812_v37 = vadd.f32 1.0, %v1811_v35  ;;  %v1838_v56 = vmul.f32 %v1837_v52, %v1810_v34 }
 0xcab   : > { %2567 = vrcp.f32 %v1812_v37  ;;  %v1824_v45 = vand.u32 2147483648, %v1812_v37  ;;  %v1822_v47 = vand.u32 2147483647, %v1812_v37  ;;  %vm1818_vm12 = vweird.f32 %v1812_v37 }
 0xcac   : > { %v1839_v59 = vmul.f32 1.442695, %v1838_v56 }
 0xcad   : > { %v1825_v40 = vor.u32 1.1754944e-38, %v1824_v45  ;;  %vm1823_vm14 = vcmp.eq.f32.partialorder %v1822_v47, 8.507059e+37 }
 0xcae   : > { %2569 = vpow2.f32 %v1839_v59 }
 0xcb1   : > { %v2568_v41 = vpop.eup %2567 }
 0xcb2   : > { %v1814_v42 = vmul.f32 %v2568_v41, %v1812_v37  ;;  %vm1819_vm11 = vweird.f32 %v2568_v41 }
 0xcb3   : > { %vm1820_vm13 = vmor %vm1818_vm12, %vm1819_vm11 }
 0xcb4   : > { %v1815_v44 = vsub.f32 1.0, %v1814_v42  ;;  %v2570_v1 = vpop.eup %2569 }
 0xcb6   : > { %v1816_v46 = vmul.f32 %v2568_v41, %v1815_v44 }
 0xcb8   : > { %v1817_v49 = vadd.f32 %v2568_v41, %v1816_v46 }
 0xcba   : > { %v1821_v50 = vsel %vm1820_vm13, %v2568_v41, %v1817_v49 }
 0xcbb   : > { %v1826_v51 = vsel %vm1823_vm14, %v1825_v40, %v1821_v50 }
 0xcbc   : > { %v1828_v53 = vmul.f32 1.0614054, %v1826_v51 }
 0xcbe   : > { %v1829_v55 = vadd.f32 -1.4531521, %v1828_v53 }
 0xcc0   : > { %v1830_v57 = vmul.f32 %v1829_v55, %v1826_v51 }
 0xcc2   : > { %v1831_v58 = vadd.f32 1.4214138, %v1830_v57 }
 0xcc4   : > { %v1832_v60 = vmul.f32 %v1831_v58, %v1826_v51 }
 0xcc6   : > { %v1833_v61 = vadd.f32 -0.28449672, %v1832_v60 }
 0xcc8   : > { %v1834_v62 = vmul.f32 %v1833_v61, %v1826_v51 }
 0xcca   : > { %v1835_v63 = vadd.f32 0.2548296, %v1834_v62 }
 0xccc   : > { %v1836_v0 = vmul.f32 %v1835_v63, %v1826_v51 }
 0xcce   : > { %v1841_v3 = vmul.f32 %v2570_v1, %v1836_v0 }
 0xcd0   : > { %v1842_v4 = vsub.f32 1.0, %v1841_v3 }
 0xcd2   : > { %v1844_v5 = vsub.f32 0.0, %v1842_v4 }
 0xcd4   : > { %v1845_v6 = vsel %vm1843_vm15, %v1842_v4, %v1844_v5 }
 0xcd5   : > { %v1846_v8 = vadd.f32 1.0, %v1845_v6 }
 0xcd7   : > { %v1847_v9 = vmul.f32 %v1846_v8, %v1808_v7 }
 0xcd9   : > { %v1857_v10 = vpack.c.bf16 %v1847_v9, %v1847_v9 }
 0xcdb   : > { %2301 = vmatmul.msk.bf16.vlgmr.msra.gmra.mxu3 %vm1885_vm1, %v1857_v10 }
 0xd5e   : > { %v1898_v12 = vpop.f32.mrf.mxu3 }
 0xd5f   : > { %v1899_v13 = vadd.f32 %v2526_v11, %v1898_v12 }
 0xd61   : > { %v1902_v14 = vadd.f32 %v1899_v13, %v1770_v27 }
 0xd63   : > { %v1905_v15 = vsel %vm975_vm0, %v1902_v14, 0.0 }
 0xd64   : > { %1906 = vadd.xlane.f32.xlu1 %v1905_v15 }
 0xd66   : > { %v1900_v16 = vpop.f32.mrf.mxu3 }
 0xdd7   : > { %v1907_v54 = vpop.xlane.xlu1 %1906 }
 0xdd8   : > { %v1908_v17 = vmul.f32 %v1907_v54, %v3514_v28 }
 0xdda   : > { %v1909_v18 = vsub.f32 %v1902_v14, %v1908_v17 }
 0xddc   : > { %v1910_v19 = vmul.f32 %v1909_v18, %v1909_v18 }
 0xdde   : > { %v1911_v20 = vsel %vm975_vm0, %v1910_v19, 0.0 }
 0xddf   : > { %1912 = vadd.xlane.f32.xlu2 %v1911_v20 }
 0xe52   : > { %v1913_v21 = vpop.xlane.xlu2 %1912 }
 0xe53   : > { %v1914_v22 = vmul.f32 %v1913_v21, %v3514_v28 }
 0xe55   : > { %v1915_v23 = vadd.f32 1e-12, %v1914_v22 }
 0xe57   : > { %2571 = vrsqrt.f32 %v1915_v23  ;;  %vm1922_vm3 = vweird.f32 %v1915_v23 }
 0xe5d   : > { %v2572_v24 = vpop.eup %2571 }
 0xe5e   : > { %v1917_v25 = vmul.f32 %v2572_v24, %v1915_v23  ;;  %vm1923_vm2 = vweird.f32 %v2572_v24 }
 0xe5f   : > { %vm1924_vm4 = vmor %vm1922_vm3, %vm1923_vm2 }
 0xe60   : > { %v1918_v2 = vmul.f32 %v2572_v24, %v1917_v25 }
 0xe62   : > { %v1919_v26 = vmul.f32 0.5, %v1918_v2 }
 0xe64   : > { %v1920_v27 = vsub.f32 1.5, %v1919_v26 }
 0xe66   : > { %v1921_v29 = vmul.f32 %v2572_v24, %v1920_v27 }
 0xe68   : > { %v1925_v31 = vsel %vm1924_vm4, %v2572_v24, %v1921_v29 }
 0xe69   : > { %v1926_v33 = vmul.f32 %v1925_v31, %v1909_v18 }
 0xe6b   : > { %v1930_v34 = vmul.f32 %v2527_v30, %v1926_v33 }
 0xe6d   : > { %v1934_v28 = vadd.f32 %v2528_v32, %v1930_v34 }
 0xe6f   : > { %1935 = vst.msk [vmem:[%s950_s3] sm:$0xff] %vm975_vm0, %v1934_v28 }
 0xe70 PF: > { %s3650_s4 = sld [smem:[#allocation37_spill]] }
 0xe76   : > { %s41_s3 = sadd.s32 1, %s3650_s4  }
 0xe77   : > { %p38_p7 = scmp.ge.s32.totalorder %s41_s3, 4  }
 0xe79   :  { %40 = sbr.rel (!%p38_p7) target bundleno = 20 (0x14), region = 210 }
 0xe7e   :  { %1955 = vsyncpa [#allocation3], 1 }
 0xe7f   :  { %1957 = vsyncpa [#allocation3 + $0x1], 1 }
 0xe80   :  { %1958 = vsyncpa [#allocation5], 1 }
 0xe81   :  { %1959 = vsyncpa [#allocation8], 1 }
 0xe82   :  { %1960 = vsyncpa [#allocation11], 1 }
 0xe83   :  { %1961 = vsyncpa [#allocation14], 1 }
 0xe84   :  { %1962 = vsyncpa [#allocation17], 1 }
 0xe85   :  { %1963 = vsyncpa [#allocation20], 1 }
 0xe86   :  { %1964 = vsyncpa [#allocation23], 1 }
 0xe87   :  { %1965 = vsyncpa [#allocation26], 1 }

</bundles_post_ra>
